<compile_context>
chip_gen: v7x
topology: tpu7x:2x2x1
jax: 0.10.0
libtpu: 0.0.40
codegen_flags: <defaults>
</compile_context>

<pallas_src>
import functools

import numpy as np
import jax
import jax.numpy as jnp
from jax.experimental import pallas as pl
from jax.experimental.pallas import tpu as pltpu


# ---------------------------------------------------------------------------
# Pallas kernel: Conv3d as a single (Cout, K) @ (K, tm) matmul + folded BN + ReLU
# ---------------------------------------------------------------------------
def _conv_matmul_kernel(w_ref, x_ref, scale_ref, bias_ref, o_ref, *, relu):
    # One MXU push per grid step; no accumulator scratch, no init/finalize.
    y = jnp.dot(w_ref[...], x_ref[...], preferred_element_type=jnp.float32)
    # Fused (inference-mode) BatchNorm affine + optional ReLU, f32 on the VPU.
    y = y * scale_ref[...] + bias_ref[...]
    if relu:
        y = jnp.maximum(y, 0.0)
    o_ref[...] = y.astype(o_ref.dtype)   # lane-dense store: last dim is M-tile


def _pick_m_tile(m):
    """Largest lane-dense tile (multiple of 128) giving >= 2 grid steps.

    >= 2 steps lets the "parallel" M axis be megacore-sharded (v7x) and keeps
    VMEM bounded when volumes grow; tiny levels fall back to one full block.
    """
    for tm in (2048, 1024, 512, 256, 128):
        if m % tm == 0 and m // tm >= 2:
            return tm
    return m


def _im2col_3d(x, k):
    """x: (Cin, N, D, H, W) -> (k^3*Cin, N*D*H*W) tap slab (XLA glue)."""
    cin, n, d, h, w = x.shape
    if k == 1:
        return x.reshape(cin, n * d * h * w)
    pad = k // 2
    xp = jnp.pad(x, ((0, 0), (0, 0), (pad, pad), (pad, pad), (pad, pad)))
    taps = []
    for kd in range(k):
        for kh in range(k):
            for kw in range(k):
                taps.append(
                    xp[:, :, kd:kd + d, kh:kh + h, kw:kw + w].reshape(cin, n * d * h * w))
    return jnp.concatenate(taps, axis=0)   # row index = tap*Cin + cin


def conv3d_bn_act(x, params, relu):
    """x: (Cin, N, D, H, W) -> (Cout, N, D, H, W).

    Conv3d(kernel=k, padding=k//2) + BatchNorm (inference mode, folded into
    scale/bias) + optional ReLU.  All FLOPs run inside one Pallas call; the
    im2col tap extraction / padding is JAX glue.
    """
    w, scale, bias, k = params["w"], params["scale"], params["bias"], params["k"]
    cin, n, d, h, wd = x.shape
    cout, kdim = w.shape                      # kdim == k^3 * cin
    m = n * d * h * wd

    x_col = _im2col_3d(x, k)                  # (K, M): contraction-major, lanes = M
    tm = _pick_m_tile(m)
    grid = (m // tm,)

    out = pl.pallas_call(
        functools.partial(_conv_matmul_kernel, relu=relu),
        out_shape=jax.ShapeDtypeStruct((cout, m), jnp.float32),
        grid=grid,
        in_specs=[
            pl.BlockSpec((cout, kdim), lambda i: (0, 0)),   # weights, resident
            pl.BlockSpec((kdim, tm), lambda i: (0, i)),     # im2col slab, M-tiled
            pl.BlockSpec((cout, 1), lambda i: (0, 0)),      # folded BN scale
            pl.BlockSpec((cout, 1), lambda i: (0, 0)),      # folded BN/conv bias
        ],
        out_specs=pl.BlockSpec((cout, tm), lambda i: (0, i)),  # lane-dense output
        compiler_params=pltpu.CompilerParams(
            dimension_semantics=("parallel",)),
    )(w, x_col, scale, bias)
    return out.reshape(cout, n, d, h, wd)


# ---------------------------------------------------------------------------
# JAX glue: pooling, nearest-neighbour resize, parameter init, U-Net wiring
# (all channel-major: activations are (C, N, D, H, W))
# ---------------------------------------------------------------------------
def max_pool3d_2(x):
    c, n, d, h, w = x.shape
    return x.reshape(c, n, d // 2, 2, h // 2, 2, w // 2, 2).max(axis=(3, 5, 7))


def nearest_resize(x, size):
    # F.interpolate default mode='nearest': src = floor(dst * in / out)
    _, _, d0, h0, w0 = x.shape
    d, h, w = size
    di = (jnp.arange(d) * d0) // d
    hi = (jnp.arange(h) * h0) // h
    wi = (jnp.arange(w) * w0) // w
    return x[:, :, di][:, :, :, hi][:, :, :, :, wi]


def init_conv(key, cin, cout, k=3, with_bn=True, conv_bias=False):
    kw, kg, kb, km, kv, kcb = jax.random.split(key, 6)
    fan_in = cin * k ** 3
    # Weight layout matches im2col rows: column index = tap*Cin + cin.
    w = jax.random.normal(kw, (cout, k ** 3 * cin), jnp.float32) / np.sqrt(fan_in)
    if with_bn:
        # TODO(synk): BatchNorm3d reproduced in inference (eval) mode with fixed
        # running stats; PyTorch training-mode per-batch statistics not computed.
        gamma = 1.0 + 0.1 * jax.random.normal(kg, (cout,), jnp.float32)
        beta = 0.1 * jax.random.normal(kb, (cout,), jnp.float32)
        mean = 0.1 * jax.random.normal(km, (cout,), jnp.float32)
        var = jax.random.uniform(kv, (cout,), jnp.float32, 0.5, 1.5)
        scale = gamma / jnp.sqrt(var + 1e-5)
        bias = beta - mean * scale
    else:
        scale = jnp.ones((cout,), jnp.float32)
        bias = (0.1 * jax.random.normal(kcb, (cout,), jnp.float32)
                if conv_bias else jnp.zeros((cout,), jnp.float32))
    return {"w": w, "scale": scale.reshape(cout, 1), "bias": bias.reshape(cout, 1), "k": k}


def init_unet_params(key, s=4):
    keys = iter(jax.random.split(key, 16))

    def blk(cin, mid, cout):
        return (init_conv(next(keys), cin, mid), init_conv(next(keys), mid, cout))

    return {
        "start": blk(1, s, s),
        "down1": blk(s, 2 * s, 2 * s),
        "down2": blk(2 * s, 4 * s, 4 * s),
        "bridge": blk(4 * s, 8 * s, 4 * s),
        "up2": blk(8 * s, 4 * s, 2 * s),
        "up1": blk(4 * s, 2 * s, s),
        "final_conv": init_conv(next(keys), 2 * s, s),
        "final_proj": init_conv(next(keys), s, 1, k=1, with_bn=False, conv_bias=True),
    }


def unet_block_apply(x, blk):
    # TODO(synk): the two convs of a block could be fused into a single
    # pallas_call (keep the intermediate in VMEM) to avoid one HBM round-trip.
    x = conv3d_bn_act(x, blk[0], relu=True)
    x = conv3d_bn_act(x, blk[1], relu=True)
    return x


def unet_forward(params, x_ncdhw):
    # (N, 1, D, H, W) -> channel-major (1, N, D, H, W); batch is folded into
    # the lane-dense M axis of every conv, so all samples share one kernel call.
    x = jnp.transpose(x_ncdhw, (1, 0, 2, 3, 4))
    r0 = unet_block_apply(x, params["start"])
    r1 = unet_block_apply(max_pool3d_2(r0), params["down1"])
    r2 = unet_block_apply(max_pool3d_2(r1), params["down2"])
    b = unet_block_apply(max_pool3d_2(r2), params["bridge"])
    x = nearest_resize(b, r2.shape[2:])
    x = unet_block_apply(jnp.concatenate([x, r2], axis=0), params["up2"])
    x = nearest_resize(x, r1.shape[2:])
    x = unet_block_apply(jnp.concatenate([x, r1], axis=0), params["up1"])
    x = nearest_resize(x, r0.shape[2:])
    x = jnp.concatenate([x, r0], axis=0)
    x = conv3d_bn_act(x, params["final_conv"], relu=True)
    x = conv3d_bn_act(x, params["final_proj"], relu=False)
    return jnp.transpose(x, (1, 0, 2, 3, 4))   # back to (N, 1, D, H, W)


if __name__ == "__main__":
    key = jax.random.PRNGKey(0)
    pkey, xkey = jax.random.split(key)

    s = 4                       # Unet(s=4) — small but exercises every branch
    N, D, H, W = 2, 8, 8, 8     # 3 levels of 2x pooling: 8 -> 4 -> 2 -> 1
    params = init_unet_params(pkey, s=s)
    x = jax.random.normal(xkey, (N, 1, D, H, W), jnp.float32)

    fwd = jax.jit(lambda xb: unet_forward(params, xb))
    out = jax.block_until_ready(fwd(x))

    assert out.shape == (N, 1, D, H, W), out.shape
    assert bool(jnp.all(jnp.isfinite(out)))
    print("KERNEL_OK")
</pallas_src>

<mosaic_0001>
module attributes {stable_mosaic.version = 11 : i64} {
  func.func @_conv_matmul_kernel(%arg0: i32, %arg1: memref<4x27xf32, #tpu.memory_space<vmem>>, %arg2: memref<27x512xf32, #tpu.memory_space<vmem>>, %arg3: memref<4x1xf32, #tpu.memory_space<vmem>>, %arg4: memref<4x1xf32, #tpu.memory_space<vmem>>, %arg5: memref<4x512xf32, #tpu.memory_space<vmem>>) attributes {dimension_semantics = [#tpu.dimension_semantics<parallel>], iteration_bounds = array<i64: 2>, scalar_prefetch = 0 : i64, scratch_operands = 0 : i64, tpu.core_type = #tpu.core_type<tc>, window_params = [{pipeline_mode = #tpu.pipeline_mode<synchronous>, transform_indices = @transform_0, window_bounds = array<i64: 4, 27>}, {transform_indices = @transform_1, window_bounds = array<i64: 27, 512>}, {pipeline_mode = #tpu.pipeline_mode<synchronous>, transform_indices = @transform_2, window_bounds = array<i64: 4, 1>}, {pipeline_mode = #tpu.pipeline_mode<synchronous>, transform_indices = @transform_3, window_bounds = array<i64: 4, 1>}, {transform_indices = @transform_4, window_bounds = array<i64: 4, 512>}]} {
    %c0 = arith.constant 0 : index
    %c0_0 = arith.constant 0 : index
    %0 = vector.load %arg1[%c0, %c0_0] : memref<4x27xf32, #tpu.memory_space<vmem>>, vector<4x27xf32>
    %c0_1 = arith.constant 0 : index
    %c0_2 = arith.constant 0 : index
    %1 = vector.load %arg2[%c0_1, %c0_2] : memref<27x512xf32, #tpu.memory_space<vmem>>, vector<27x512xf32>
    %cst = arith.constant dense<0.000000e+00> : vector<4x512xf32>
    %2 = tpu.matmul %0, %1, %cst {dimension_numbers = #tpu.dot_dimension_numbers<[1], [0], [0], [1], [0, 0, 1, 1], [], []>} : vector<4x27xf32>, vector<27x512xf32>, vector<4x512xf32> -> vector<4x512xf32>
    %c0_3 = arith.constant 0 : index
    %c0_4 = arith.constant 0 : index
    %3 = vector.load %arg3[%c0_3, %c0_4] : memref<4x1xf32, #tpu.memory_space<vmem>>, vector<4x1xf32>
    %4 = vector.broadcast %3 : vector<4x1xf32> to vector<4x512xf32>
    %5 = arith.mulf %2, %4 : vector<4x512xf32>
    %c0_5 = arith.constant 0 : index
    %c0_6 = arith.constant 0 : index
    %6 = vector.load %arg4[%c0_5, %c0_6] : memref<4x1xf32, #tpu.memory_space<vmem>>, vector<4x1xf32>
    %7 = vector.broadcast %6 : vector<4x1xf32> to vector<4x512xf32>
    %8 = arith.addf %5, %7 : vector<4x512xf32>
    %cst_7 = arith.constant 0.000000e+00 : f32
    %9 = vector.broadcast %cst_7 : f32 to vector<4x512xf32>
    %10 = arith.maximumf %8, %9 : vector<4x512xf32>
    %c0_8 = arith.constant 0 : index
    %c0_9 = arith.constant 0 : index
    %11 = vector.load %arg5[%c0_8, %c0_9] : memref<4x512xf32, #tpu.memory_space<vmem>>, vector<4x512xf32>
    tpu.vector_store %arg5[%c0_8, %c0_9], %10 {strides = array<i32>} : memref<4x512xf32, #tpu.memory_space<vmem>>, vector<4x512xf32>,
    return
  }
  func.func @transform_0(%arg0: i32) -> (i32, i32) {
    %c0_i32 = arith.constant 0 : i32
    %c0_i32_0 = arith.constant 0 : i32
    %c0_i32_1 = arith.constant 0 : i32
    return %c0_i32, %c0_i32_0 : i32, i32
  }
  func.func @transform_1(%arg0: i32) -> (i32, i32) {
    %c0_i32 = arith.constant 0 : i32
    %c0_i32_0 = arith.constant 0 : i32
    return %c0_i32, %arg0 : i32, i32
  }
  func.func @transform_2(%arg0: i32) -> (i32, i32) {
    %c0_i32 = arith.constant 0 : i32
    %c0_i32_0 = arith.constant 0 : i32
    %c0_i32_1 = arith.constant 0 : i32
    return %c0_i32, %c0_i32_0 : i32, i32
  }
  func.func @transform_3(%arg0: i32) -> (i32, i32) {
    %c0_i32 = arith.constant 0 : i32
    %c0_i32_0 = arith.constant 0 : i32
    %c0_i32_1 = arith.constant 0 : i32
    return %c0_i32, %c0_i32_0 : i32, i32
  }
  func.func @transform_4(%arg0: i32) -> (i32, i32) {
    %c0_i32 = arith.constant 0 : i32
    %c0_i32_0 = arith.constant 0 : i32
    return %c0_i32, %arg0 : i32, i32
  }
}

module attributes {stable_mosaic.version = 11 : i64} {
  func.func @_conv_matmul_kernel(%arg0: i32, %arg1: memref<4x108xf32, #tpu.memory_space<vmem>>, %arg2: memref<108x512xf32, #tpu.memory_space<vmem>>, %arg3: memref<4x1xf32, #tpu.memory_space<vmem>>, %arg4: memref<4x1xf32, #tpu.memory_space<vmem>>, %arg5: memref<4x512xf32, #tpu.memory_space<vmem>>) attributes {dimension_semantics = [#tpu.dimension_semantics<parallel>], iteration_bounds = array<i64: 2>, scalar_prefetch = 0 : i64, scratch_operands = 0 : i64, tpu.core_type = #tpu.core_type<tc>, window_params = [{pipeline_mode = #tpu.pipeline_mode<synchronous>, transform_indices = @transform_0, window_bounds = array<i64: 4, 108>}, {transform_indices = @transform_1, window_bounds = array<i64: 108, 512>}, {pipeline_mode = #tpu.pipeline_mode<synchronous>, transform_indices = @transform_2, window_bounds = array<i64: 4, 1>}, {pipeline_mode = #tpu.pipeline_mode<synchronous>, transform_indices = @transform_3, window_bounds = array<i64: 4, 1>}, {transform_indices = @transform_4, window_bounds = array<i64: 4, 512>}]} {
    %c0 = arith.constant 0 : index
    %c0_0 = arith.constant 0 : index
    %0 = vector.load %arg1[%c0, %c0_0] : memref<4x108xf32, #tpu.memory_space<vmem>>, vector<4x108xf32>
    %c0_1 = arith.constant 0 : index
    %c0_2 = arith.constant 0 : index
    %1 = vector.load %arg2[%c0_1, %c0_2] : memref<108x512xf32, #tpu.memory_space<vmem>>, vector<108x512xf32>
    %cst = arith.constant dense<0.000000e+00> : vector<4x512xf32>
    %2 = tpu.matmul %0, %1, %cst {dimension_numbers = #tpu.dot_dimension_numbers<[1], [0], [0], [1], [0, 0, 1, 1], [], []>} : vector<4x108xf32>, vector<108x512xf32>, vector<4x512xf32> -> vector<4x512xf32>
    %c0_3 = arith.constant 0 : index
    %c0_4 = arith.constant 0 : index
    %3 = vector.load %arg3[%c0_3, %c0_4] : memref<4x1xf32, #tpu.memory_space<vmem>>, vector<4x1xf32>
    %4 = vector.broadcast %3 : vector<4x1xf32> to vector<4x512xf32>
    %5 = arith.mulf %2, %4 : vector<4x512xf32>
    %c0_5 = arith.constant 0 : index
    %c0_6 = arith.constant 0 : index
    %6 = vector.load %arg4[%c0_5, %c0_6] : memref<4x1xf32, #tpu.memory_space<vmem>>, vector<4x1xf32>
    %7 = vector.broadcast %6 : vector<4x1xf32> to vector<4x512xf32>
    %8 = arith.addf %5, %7 : vector<4x512xf32>
    %cst_7 = arith.constant 0.000000e+00 : f32
    %9 = vector.broadcast %cst_7 : f32 to vector<4x512xf32>
    %10 = arith.maximumf %8, %9 : vector<4x512xf32>
    %c0_8 = arith.constant 0 : index
    %c0_9 = arith.constant 0 : index
    %11 = vector.load %arg5[%c0_8, %c0_9] : memref<4x512xf32, #tpu.memory_space<vmem>>, vector<4x512xf32>
    tpu.vector_store %arg5[%c0_8, %c0_9], %10 {strides = array<i32>} : memref<4x512xf32, #tpu.memory_space<vmem>>, vector<4x512xf32>,
    return
  }
  func.func @transform_0(%arg0: i32) -> (i32, i32) {
    %c0_i32 = arith.constant 0 : i32
    %c0_i32_0 = arith.constant 0 : i32
    %c0_i32_1 = arith.constant 0 : i32
    return %c0_i32, %c0_i32_0 : i32, i32
  }
  func.func @transform_1(%arg0: i32) -> (i32, i32) {
    %c0_i32 = arith.constant 0 : i32
    %c0_i32_0 = arith.constant 0 : i32
    return %c0_i32, %arg0 : i32, i32
  }
  func.func @transform_2(%arg0: i32) -> (i32, i32) {
    %c0_i32 = arith.constant 0 : i32
    %c0_i32_0 = arith.constant 0 : i32
    %c0_i32_1 = arith.constant 0 : i32
    return %c0_i32, %c0_i32_0 : i32, i32
  }
  func.func @transform_3(%arg0: i32) -> (i32, i32) {
    %c0_i32 = arith.constant 0 : i32
    %c0_i32_0 = arith.constant 0 : i32
    %c0_i32_1 = arith.constant 0 : i32
    return %c0_i32, %c0_i32_0 : i32, i32
  }
  func.func @transform_4(%arg0: i32) -> (i32, i32) {
    %c0_i32 = arith.constant 0 : i32
    %c0_i32_0 = arith.constant 0 : i32
    return %c0_i32, %arg0 : i32, i32
  }
}

module attributes {stable_mosaic.version = 11 : i64} {
  func.func @_conv_matmul_kernel(%arg0: i32, %arg1: memref<8x108xf32, #tpu.memory_space<vmem>>, %arg2: memref<108x128xf32, #tpu.memory_space<vmem>>, %arg3: memref<8x1xf32, #tpu.memory_space<vmem>>, %arg4: memref<8x1xf32, #tpu.memory_space<vmem>>, %arg5: memref<8x128xf32, #tpu.memory_space<vmem>>) attributes {dimension_semantics = [#tpu.dimension_semantics<parallel>], iteration_bounds = array<i64: 1>, scalar_prefetch = 0 : i64, scratch_operands = 0 : i64, tpu.core_type = #tpu.core_type<tc>, window_params = [{pipeline_mode = #tpu.pipeline_mode<synchronous>, transform_indices = @transform_0, window_bounds = array<i64: 8, 108>}, {transform_indices = @transform_1, window_bounds = array<i64: 108, 128>}, {pipeline_mode = #tpu.pipeline_mode<synchronous>, transform_indices = @transform_2, window_bounds = array<i64: 8, 1>}, {pipeline_mode = #tpu.pipeline_mode<synchronous>, transform_indices = @transform_3, window_bounds = array<i64: 8, 1>}, {transform_indices = @transform_4, window_bounds = array<i64: 8, 128>}]} {
    %c0 = arith.constant 0 : index
    %c0_0 = arith.constant 0 : index
    %0 = vector.load %arg1[%c0, %c0_0] : memref<8x108xf32, #tpu.memory_space<vmem>>, vector<8x108xf32>
    %c0_1 = arith.constant 0 : index
    %c0_2 = arith.constant 0 : index
    %1 = vector.load %arg2[%c0_1, %c0_2] : memref<108x128xf32, #tpu.memory_space<vmem>>, vector<108x128xf32>
    %cst = arith.constant dense<0.000000e+00> : vector<8x128xf32>
    %2 = tpu.matmul %0, %1, %cst {dimension_numbers = #tpu.dot_dimension_numbers<[1], [0], [0], [1], [0, 0, 1, 1], [], []>} : vector<8x108xf32>, vector<108x128xf32>, vector<8x128xf32> -> vector<8x128xf32>
    %c0_3 = arith.constant 0 : index
    %c0_4 = arith.constant 0 : index
    %3 = vector.load %arg3[%c0_3, %c0_4] : memref<8x1xf32, #tpu.memory_space<vmem>>, vector<8x1xf32>
    %4 = vector.broadcast %3 : vector<8x1xf32> to vector<8x128xf32>
    %5 = arith.mulf %2, %4 : vector<8x128xf32>
    %c0_5 = arith.constant 0 : index
    %c0_6 = arith.constant 0 : index
    %6 = vector.load %arg4[%c0_5, %c0_6] : memref<8x1xf32, #tpu.memory_space<vmem>>, vector<8x1xf32>
    %7 = vector.broadcast %6 : vector<8x1xf32> to vector<8x128xf32>
    %8 = arith.addf %5, %7 : vector<8x128xf32>
    %cst_7 = arith.constant 0.000000e+00 : f32
    %9 = vector.broadcast %cst_7 : f32 to vector<8x128xf32>
    %10 = arith.maximumf %8, %9 : vector<8x128xf32>
    %c0_8 = arith.constant 0 : index
    %c0_9 = arith.constant 0 : index
    %11 = vector.load %arg5[%c0_8, %c0_9] : memref<8x128xf32, #tpu.memory_space<vmem>>, vector<8x128xf32>
    tpu.vector_store %arg5[%c0_8, %c0_9], %10 {strides = array<i32>} : memref<8x128xf32, #tpu.memory_space<vmem>>, vector<8x128xf32>,
    return
  }
  func.func @transform_0(%arg0: i32) -> (i32, i32) {
    %c0_i32 = arith.constant 0 : i32
    %c0_i32_0 = arith.constant 0 : i32
    %c0_i32_1 = arith.constant 0 : i32
    return %c0_i32, %c0_i32_0 : i32, i32
  }
  func.func @transform_1(%arg0: i32) -> (i32, i32) {
    %c0_i32 = arith.constant 0 : i32
    %c0_i32_0 = arith.constant 0 : i32
    return %c0_i32, %arg0 : i32, i32
  }
  func.func @transform_2(%arg0: i32) -> (i32, i32) {
    %c0_i32 = arith.constant 0 : i32
    %c0_i32_0 = arith.constant 0 : i32
    %c0_i32_1 = arith.constant 0 : i32
    return %c0_i32, %c0_i32_0 : i32, i32
  }
  func.func @transform_3(%arg0: i32) -> (i32, i32) {
    %c0_i32 = arith.constant 0 : i32
    %c0_i32_0 = arith.constant 0 : i32
    %c0_i32_1 = arith.constant 0 : i32
    return %c0_i32, %c0_i32_0 : i32, i32
  }
  func.func @transform_4(%arg0: i32) -> (i32, i32) {
    %c0_i32 = arith.constant 0 : i32
    %c0_i32_0 = arith.constant 0 : i32
    return %c0_i32, %arg0 : i32, i32
  }
}

module attributes {stable_mosaic.version = 11 : i64} {
  func.func @_conv_matmul_kernel(%arg0: i32, %arg1: memref<8x216xf32, #tpu.memory_space<vmem>>, %arg2: memref<216x128xf32, #tpu.memory_space<vmem>>, %arg3: memref<8x1xf32, #tpu.memory_space<vmem>>, %arg4: memref<8x1xf32, #tpu.memory_space<vmem>>, %arg5: memref<8x128xf32, #tpu.memory_space<vmem>>) attributes {dimension_semantics = [#tpu.dimension_semantics<parallel>], iteration_bounds = array<i64: 1>, scalar_prefetch = 0 : i64, scratch_operands = 0 : i64, tpu.core_type = #tpu.core_type<tc>, window_params = [{pipeline_mode = #tpu.pipeline_mode<synchronous>, transform_indices = @transform_0, window_bounds = array<i64: 8, 216>}, {transform_indices = @transform_1, window_bounds = array<i64: 216, 128>}, {pipeline_mode = #tpu.pipeline_mode<synchronous>, transform_indices = @transform_2, window_bounds = array<i64: 8, 1>}, {pipeline_mode = #tpu.pipeline_mode<synchronous>, transform_indices = @transform_3, window_bounds = array<i64: 8, 1>}, {transform_indices = @transform_4, window_bounds = array<i64: 8, 128>}]} {
    %c0 = arith.constant 0 : index
    %c0_0 = arith.constant 0 : index
    %0 = vector.load %arg1[%c0, %c0_0] : memref<8x216xf32, #tpu.memory_space<vmem>>, vector<8x216xf32>
    %c0_1 = arith.constant 0 : index
    %c0_2 = arith.constant 0 : index
    %1 = vector.load %arg2[%c0_1, %c0_2] : memref<216x128xf32, #tpu.memory_space<vmem>>, vector<216x128xf32>
    %cst = arith.constant dense<0.000000e+00> : vector<8x128xf32>
    %2 = tpu.matmul %0, %1, %cst {dimension_numbers = #tpu.dot_dimension_numbers<[1], [0], [0], [1], [0, 0, 1, 1], [], []>} : vector<8x216xf32>, vector<216x128xf32>, vector<8x128xf32> -> vector<8x128xf32>
    %c0_3 = arith.constant 0 : index
    %c0_4 = arith.constant 0 : index
    %3 = vector.load %arg3[%c0_3, %c0_4] : memref<8x1xf32, #tpu.memory_space<vmem>>, vector<8x1xf32>
    %4 = vector.broadcast %3 : vector<8x1xf32> to vector<8x128xf32>
    %5 = arith.mulf %2, %4 : vector<8x128xf32>
    %c0_5 = arith.constant 0 : index
    %c0_6 = arith.constant 0 : index
    %6 = vector.load %arg4[%c0_5, %c0_6] : memref<8x1xf32, #tpu.memory_space<vmem>>, vector<8x1xf32>
    %7 = vector.broadcast %6 : vector<8x1xf32> to vector<8x128xf32>
    %8 = arith.addf %5, %7 : vector<8x128xf32>
    %cst_7 = arith.constant 0.000000e+00 : f32
    %9 = vector.broadcast %cst_7 : f32 to vector<8x128xf32>
    %10 = arith.maximumf %8, %9 : vector<8x128xf32>
    %c0_8 = arith.constant 0 : index
    %c0_9 = arith.constant 0 : index
    %11 = vector.load %arg5[%c0_8, %c0_9] : memref<8x128xf32, #tpu.memory_space<vmem>>, vector<8x128xf32>
    tpu.vector_store %arg5[%c0_8, %c0_9], %10 {strides = array<i32>} : memref<8x128xf32, #tpu.memory_space<vmem>>, vector<8x128xf32>,
    return
  }
  func.func @transform_0(%arg0: i32) -> (i32, i32) {
    %c0_i32 = arith.constant 0 : i32
    %c0_i32_0 = arith.constant 0 : i32
    %c0_i32_1 = arith.constant 0 : i32
    return %c0_i32, %c0_i32_0 : i32, i32
  }
  func.func @transform_1(%arg0: i32) -> (i32, i32) {
    %c0_i32 = arith.constant 0 : i32
    %c0_i32_0 = arith.constant 0 : i32
    return %c0_i32, %arg0 : i32, i32
  }
  func.func @transform_2(%arg0: i32) -> (i32, i32) {
    %c0_i32 = arith.constant 0 : i32
    %c0_i32_0 = arith.constant 0 : i32
    %c0_i32_1 = arith.constant 0 : i32
    return %c0_i32, %c0_i32_0 : i32, i32
  }
  func.func @transform_3(%arg0: i32) -> (i32, i32) {
    %c0_i32 = arith.constant 0 : i32
    %c0_i32_0 = arith.constant 0 : i32
    %c0_i32_1 = arith.constant 0 : i32
    return %c0_i32, %c0_i32_0 : i32, i32
  }
  func.func @transform_4(%arg0: i32) -> (i32, i32) {
    %c0_i32 = arith.constant 0 : i32
    %c0_i32_0 = arith.constant 0 : i32
    return %c0_i32, %arg0 : i32, i32
  }
}

module attributes {stable_mosaic.version = 11 : i64} {
  func.func @_conv_matmul_kernel(%arg0: i32, %arg1: memref<16x216xf32, #tpu.memory_space<vmem>>, %arg2: memref<216x16xf32, #tpu.memory_space<vmem>>, %arg3: memref<16x1xf32, #tpu.memory_space<vmem>>, %arg4: memref<16x1xf32, #tpu.memory_space<vmem>>, %arg5: memref<16x16xf32, #tpu.memory_space<vmem>>) attributes {dimension_semantics = [#tpu.dimension_semantics<parallel>], iteration_bounds = array<i64: 1>, scalar_prefetch = 0 : i64, scratch_operands = 0 : i64, tpu.core_type = #tpu.core_type<tc>, window_params = [{pipeline_mode = #tpu.pipeline_mode<synchronous>, transform_indices = @transform_0, window_bounds = array<i64: 16, 216>}, {transform_indices = @transform_1, window_bounds = array<i64: 216, 16>}, {pipeline_mode = #tpu.pipeline_mode<synchronous>, transform_indices = @transform_2, window_bounds = array<i64: 16, 1>}, {pipeline_mode = #tpu.pipeline_mode<synchronous>, transform_indices = @transform_3, window_bounds = array<i64: 16, 1>}, {transform_indices = @transform_4, window_bounds = array<i64: 16, 16>}]} {
    %c0 = arith.constant 0 : index
    %c0_0 = arith.constant 0 : index
    %0 = vector.load %arg1[%c0, %c0_0] : memref<16x216xf32, #tpu.memory_space<vmem>>, vector<16x216xf32>
    %c0_1 = arith.constant 0 : index
    %c0_2 = arith.constant 0 : index
    %1 = vector.load %arg2[%c0_1, %c0_2] : memref<216x16xf32, #tpu.memory_space<vmem>>, vector<216x16xf32>
    %cst = arith.constant dense<0.000000e+00> : vector<16x16xf32>
    %2 = tpu.matmul %0, %1, %cst {dimension_numbers = #tpu.dot_dimension_numbers<[1], [0], [0], [1], [0, 0, 1, 1], [], []>} : vector<16x216xf32>, vector<216x16xf32>, vector<16x16xf32> -> vector<16x16xf32>
    %c0_3 = arith.constant 0 : index
    %c0_4 = arith.constant 0 : index
    %3 = vector.load %arg3[%c0_3, %c0_4] : memref<16x1xf32, #tpu.memory_space<vmem>>, vector<16x1xf32>
    %4 = vector.broadcast %3 : vector<16x1xf32> to vector<16x16xf32>
    %5 = arith.mulf %2, %4 : vector<16x16xf32>
    %c0_5 = arith.constant 0 : index
    %c0_6 = arith.constant 0 : index
    %6 = vector.load %arg4[%c0_5, %c0_6] : memref<16x1xf32, #tpu.memory_space<vmem>>, vector<16x1xf32>
    %7 = vector.broadcast %6 : vector<16x1xf32> to vector<16x16xf32>
    %8 = arith.addf %5, %7 : vector<16x16xf32>
    %cst_7 = arith.constant 0.000000e+00 : f32
    %9 = vector.broadcast %cst_7 : f32 to vector<16x16xf32>
    %10 = arith.maximumf %8, %9 : vector<16x16xf32>
    %c0_8 = arith.constant 0 : index
    %c0_9 = arith.constant 0 : index
    %11 = vector.load %arg5[%c0_8, %c0_9] : memref<16x16xf32, #tpu.memory_space<vmem>>, vector<16x16xf32>
    tpu.vector_store %arg5[%c0_8, %c0_9], %10 {strides = array<i32>} : memref<16x16xf32, #tpu.memory_space<vmem>>, vector<16x16xf32>,
    return
  }
  func.func @transform_0(%arg0: i32) -> (i32, i32) {
    %c0_i32 = arith.constant 0 : i32
    %c0_i32_0 = arith.constant 0 : i32
    %c0_i32_1 = arith.constant 0 : i32
    return %c0_i32, %c0_i32_0 : i32, i32
  }
  func.func @transform_1(%arg0: i32) -> (i32, i32) {
    %c0_i32 = arith.constant 0 : i32
    %c0_i32_0 = arith.constant 0 : i32
    return %c0_i32, %arg0 : i32, i32
  }
  func.func @transform_2(%arg0: i32) -> (i32, i32) {
    %c0_i32 = arith.constant 0 : i32
    %c0_i32_0 = arith.constant 0 : i32
    %c0_i32_1 = arith.constant 0 : i32
    return %c0_i32, %c0_i32_0 : i32, i32
  }
  func.func @transform_3(%arg0: i32) -> (i32, i32) {
    %c0_i32 = arith.constant 0 : i32
    %c0_i32_0 = arith.constant 0 : i32
    %c0_i32_1 = arith.constant 0 : i32
    return %c0_i32, %c0_i32_0 : i32, i32
  }
  func.func @transform_4(%arg0: i32) -> (i32, i32) {
    %c0_i32 = arith.constant 0 : i32
    %c0_i32_0 = arith.constant 0 : i32
    return %c0_i32, %arg0 : i32, i32
  }
}

module attributes {stable_mosaic.version = 11 : i64} {
  func.func @_conv_matmul_kernel(%arg0: i32, %arg1: memref<16x432xf32, #tpu.memory_space<vmem>>, %arg2: memref<432x16xf32, #tpu.memory_space<vmem>>, %arg3: memref<16x1xf32, #tpu.memory_space<vmem>>, %arg4: memref<16x1xf32, #tpu.memory_space<vmem>>, %arg5: memref<16x16xf32, #tpu.memory_space<vmem>>) attributes {dimension_semantics = [#tpu.dimension_semantics<parallel>], iteration_bounds = array<i64: 1>, scalar_prefetch = 0 : i64, scratch_operands = 0 : i64, tpu.core_type = #tpu.core_type<tc>, window_params = [{pipeline_mode = #tpu.pipeline_mode<synchronous>, transform_indices = @transform_0, window_bounds = array<i64: 16, 432>}, {transform_indices = @transform_1, window_bounds = array<i64: 432, 16>}, {pipeline_mode = #tpu.pipeline_mode<synchronous>, transform_indices = @transform_2, window_bounds = array<i64: 16, 1>}, {pipeline_mode = #tpu.pipeline_mode<synchronous>, transform_indices = @transform_3, window_bounds = array<i64: 16, 1>}, {transform_indices = @transform_4, window_bounds = array<i64: 16, 16>}]} {
    %c0 = arith.constant 0 : index
    %c0_0 = arith.constant 0 : index
    %0 = vector.load %arg1[%c0, %c0_0] : memref<16x432xf32, #tpu.memory_space<vmem>>, vector<16x432xf32>
    %c0_1 = arith.constant 0 : index
    %c0_2 = arith.constant 0 : index
    %1 = vector.load %arg2[%c0_1, %c0_2] : memref<432x16xf32, #tpu.memory_space<vmem>>, vector<432x16xf32>
    %cst = arith.constant dense<0.000000e+00> : vector<16x16xf32>
    %2 = tpu.matmul %0, %1, %cst {dimension_numbers = #tpu.dot_dimension_numbers<[1], [0], [0], [1], [0, 0, 1, 1], [], []>} : vector<16x432xf32>, vector<432x16xf32>, vector<16x16xf32> -> vector<16x16xf32>
    %c0_3 = arith.constant 0 : index
    %c0_4 = arith.constant 0 : index
    %3 = vector.load %arg3[%c0_3, %c0_4] : memref<16x1xf32, #tpu.memory_space<vmem>>, vector<16x1xf32>
    %4 = vector.broadcast %3 : vector<16x1xf32> to vector<16x16xf32>
    %5 = arith.mulf %2, %4 : vector<16x16xf32>
    %c0_5 = arith.constant 0 : index
    %c0_6 = arith.constant 0 : index
    %6 = vector.load %arg4[%c0_5, %c0_6] : memref<16x1xf32, #tpu.memory_space<vmem>>, vector<16x1xf32>
    %7 = vector.broadcast %6 : vector<16x1xf32> to vector<16x16xf32>
    %8 = arith.addf %5, %7 : vector<16x16xf32>
    %cst_7 = arith.constant 0.000000e+00 : f32
    %9 = vector.broadcast %cst_7 : f32 to vector<16x16xf32>
    %10 = arith.maximumf %8, %9 : vector<16x16xf32>
    %c0_8 = arith.constant 0 : index
    %c0_9 = arith.constant 0 : index
    %11 = vector.load %arg5[%c0_8, %c0_9] : memref<16x16xf32, #tpu.memory_space<vmem>>, vector<16x16xf32>
    tpu.vector_store %arg5[%c0_8, %c0_9], %10 {strides = array<i32>} : memref<16x16xf32, #tpu.memory_space<vmem>>, vector<16x16xf32>,
    return
  }
  func.func @transform_0(%arg0: i32) -> (i32, i32) {
    %c0_i32 = arith.constant 0 : i32
    %c0_i32_0 = arith.constant 0 : i32
    %c0_i32_1 = arith.constant 0 : i32
    return %c0_i32, %c0_i32_0 : i32, i32
  }
  func.func @transform_1(%arg0: i32) -> (i32, i32) {
    %c0_i32 = arith.constant 0 : i32
    %c0_i32_0 = arith.constant 0 : i32
    return %c0_i32, %arg0 : i32, i32
  }
  func.func @transform_2(%arg0: i32) -> (i32, i32) {
    %c0_i32 = arith.constant 0 : i32
    %c0_i32_0 = arith.constant 0 : i32
    %c0_i32_1 = arith.constant 0 : i32
    return %c0_i32, %c0_i32_0 : i32, i32
  }
  func.func @transform_3(%arg0: i32) -> (i32, i32) {
    %c0_i32 = arith.constant 0 : i32
    %c0_i32_0 = arith.constant 0 : i32
    %c0_i32_1 = arith.constant 0 : i32
    return %c0_i32, %c0_i32_0 : i32, i32
  }
  func.func @transform_4(%arg0: i32) -> (i32, i32) {
    %c0_i32 = arith.constant 0 : i32
    %c0_i32_0 = arith.constant 0 : i32
    return %c0_i32, %arg0 : i32, i32
  }
}

module attributes {stable_mosaic.version = 11 : i64} {
  func.func @_conv_matmul_kernel(%arg0: i32, %arg1: memref<32x432xf32, #tpu.memory_space<vmem>>, %arg2: memref<432x2xf32, #tpu.memory_space<vmem>>, %arg3: memref<32x1xf32, #tpu.memory_space<vmem>>, %arg4: memref<32x1xf32, #tpu.memory_space<vmem>>, %arg5: memref<32x2xf32, #tpu.memory_space<vmem>>) attributes {dimension_semantics = [#tpu.dimension_semantics<parallel>], iteration_bounds = array<i64: 1>, scalar_prefetch = 0 : i64, scratch_operands = 0 : i64, tpu.core_type = #tpu.core_type<tc>, window_params = [{pipeline_mode = #tpu.pipeline_mode<synchronous>, transform_indices = @transform_0, window_bounds = array<i64: 32, 432>}, {transform_indices = @transform_1, window_bounds = array<i64: 432, 2>}, {pipeline_mode = #tpu.pipeline_mode<synchronous>, transform_indices = @transform_2, window_bounds = array<i64: 32, 1>}, {pipeline_mode = #tpu.pipeline_mode<synchronous>, transform_indices = @transform_3, window_bounds = array<i64: 32, 1>}, {transform_indices = @transform_4, window_bounds = array<i64: 32, 2>}]} {
    %c0 = arith.constant 0 : index
    %c0_0 = arith.constant 0 : index
    %0 = vector.load %arg1[%c0, %c0_0] : memref<32x432xf32, #tpu.memory_space<vmem>>, vector<32x432xf32>
    %c0_1 = arith.constant 0 : index
    %c0_2 = arith.constant 0 : index
    %1 = vector.load %arg2[%c0_1, %c0_2] : memref<432x2xf32, #tpu.memory_space<vmem>>, vector<432x2xf32>
    %cst = arith.constant dense<0.000000e+00> : vector<32x2xf32>
    %2 = tpu.matmul %0, %1, %cst {dimension_numbers = #tpu.dot_dimension_numbers<[1], [0], [0], [1], [0, 0, 1, 1], [], []>} : vector<32x432xf32>, vector<432x2xf32>, vector<32x2xf32> -> vector<32x2xf32>
    %c0_3 = arith.constant 0 : index
    %c0_4 = arith.constant 0 : index
    %3 = vector.load %arg3[%c0_3, %c0_4] : memref<32x1xf32, #tpu.memory_space<vmem>>, vector<32x1xf32>
    %4 = vector.broadcast %3 : vector<32x1xf32> to vector<32x2xf32>
    %5 = arith.mulf %2, %4 : vector<32x2xf32>
    %c0_5 = arith.constant 0 : index
    %c0_6 = arith.constant 0 : index
    %6 = vector.load %arg4[%c0_5, %c0_6] : memref<32x1xf32, #tpu.memory_space<vmem>>, vector<32x1xf32>
    %7 = vector.broadcast %6 : vector<32x1xf32> to vector<32x2xf32>
    %8 = arith.addf %5, %7 : vector<32x2xf32>
    %cst_7 = arith.constant 0.000000e+00 : f32
    %9 = vector.broadcast %cst_7 : f32 to vector<32x2xf32>
    %10 = arith.maximumf %8, %9 : vector<32x2xf32>
    %c0_8 = arith.constant 0 : index
    %c0_9 = arith.constant 0 : index
    %11 = vector.load %arg5[%c0_8, %c0_9] : memref<32x2xf32, #tpu.memory_space<vmem>>, vector<32x2xf32>
    tpu.vector_store %arg5[%c0_8, %c0_9], %10 {strides = array<i32>} : memref<32x2xf32, #tpu.memory_space<vmem>>, vector<32x2xf32>,
    return
  }
  func.func @transform_0(%arg0: i32) -> (i32, i32) {
    %c0_i32 = arith.constant 0 : i32
    %c0_i32_0 = arith.constant 0 : i32
    %c0_i32_1 = arith.constant 0 : i32
    return %c0_i32, %c0_i32_0 : i32, i32
  }
  func.func @transform_1(%arg0: i32) -> (i32, i32) {
    %c0_i32 = arith.constant 0 : i32
    %c0_i32_0 = arith.constant 0 : i32
    return %c0_i32, %arg0 : i32, i32
  }
  func.func @transform_2(%arg0: i32) -> (i32, i32) {
    %c0_i32 = arith.constant 0 : i32
    %c0_i32_0 = arith.constant 0 : i32
    %c0_i32_1 = arith.constant 0 : i32
    return %c0_i32, %c0_i32_0 : i32, i32
  }
  func.func @transform_3(%arg0: i32) -> (i32, i32) {
    %c0_i32 = arith.constant 0 : i32
    %c0_i32_0 = arith.constant 0 : i32
    %c0_i32_1 = arith.constant 0 : i32
    return %c0_i32, %c0_i32_0 : i32, i32
  }
  func.func @transform_4(%arg0: i32) -> (i32, i32) {
    %c0_i32 = arith.constant 0 : i32
    %c0_i32_0 = arith.constant 0 : i32
    return %c0_i32, %arg0 : i32, i32
  }
}

module attributes {stable_mosaic.version = 11 : i64} {
  func.func @_conv_matmul_kernel(%arg0: i32, %arg1: memref<16x864xf32, #tpu.memory_space<vmem>>, %arg2: memref<864x2xf32, #tpu.memory_space<vmem>>, %arg3: memref<16x1xf32, #tpu.memory_space<vmem>>, %arg4: memref<16x1xf32, #tpu.memory_space<vmem>>, %arg5: memref<16x2xf32, #tpu.memory_space<vmem>>) attributes {dimension_semantics = [#tpu.dimension_semantics<parallel>], iteration_bounds = array<i64: 1>, scalar_prefetch = 0 : i64, scratch_operands = 0 : i64, tpu.core_type = #tpu.core_type<tc>, window_params = [{pipeline_mode = #tpu.pipeline_mode<synchronous>, transform_indices = @transform_0, window_bounds = array<i64: 16, 864>}, {transform_indices = @transform_1, window_bounds = array<i64: 864, 2>}, {pipeline_mode = #tpu.pipeline_mode<synchronous>, transform_indices = @transform_2, window_bounds = array<i64: 16, 1>}, {pipeline_mode = #tpu.pipeline_mode<synchronous>, transform_indices = @transform_3, window_bounds = array<i64: 16, 1>}, {transform_indices = @transform_4, window_bounds = array<i64: 16, 2>}]} {
    %c0 = arith.constant 0 : index
    %c0_0 = arith.constant 0 : index
    %0 = vector.load %arg1[%c0, %c0_0] : memref<16x864xf32, #tpu.memory_space<vmem>>, vector<16x864xf32>
    %c0_1 = arith.constant 0 : index
    %c0_2 = arith.constant 0 : index
    %1 = vector.load %arg2[%c0_1, %c0_2] : memref<864x2xf32, #tpu.memory_space<vmem>>, vector<864x2xf32>
    %cst = arith.constant dense<0.000000e+00> : vector<16x2xf32>
    %2 = tpu.matmul %0, %1, %cst {dimension_numbers = #tpu.dot_dimension_numbers<[1], [0], [0], [1], [0, 0, 1, 1], [], []>} : vector<16x864xf32>, vector<864x2xf32>, vector<16x2xf32> -> vector<16x2xf32>
    %c0_3 = arith.constant 0 : index
    %c0_4 = arith.constant 0 : index
    %3 = vector.load %arg3[%c0_3, %c0_4] : memref<16x1xf32, #tpu.memory_space<vmem>>, vector<16x1xf32>
    %4 = vector.broadcast %3 : vector<16x1xf32> to vector<16x2xf32>
    %5 = arith.mulf %2, %4 : vector<16x2xf32>
    %c0_5 = arith.constant 0 : index
    %c0_6 = arith.constant 0 : index
    %6 = vector.load %arg4[%c0_5, %c0_6] : memref<16x1xf32, #tpu.memory_space<vmem>>, vector<16x1xf32>
    %7 = vector.broadcast %6 : vector<16x1xf32> to vector<16x2xf32>
    %8 = arith.addf %5, %7 : vector<16x2xf32>
    %cst_7 = arith.constant 0.000000e+00 : f32
    %9 = vector.broadcast %cst_7 : f32 to vector<16x2xf32>
    %10 = arith.maximumf %8, %9 : vector<16x2xf32>
    %c0_8 = arith.constant 0 : index
    %c0_9 = arith.constant 0 : index
    %11 = vector.load %arg5[%c0_8, %c0_9] : memref<16x2xf32, #tpu.memory_space<vmem>>, vector<16x2xf32>
    tpu.vector_store %arg5[%c0_8, %c0_9], %10 {strides = array<i32>} : memref<16x2xf32, #tpu.memory_space<vmem>>, vector<16x2xf32>,
    return
  }
  func.func @transform_0(%arg0: i32) -> (i32, i32) {
    %c0_i32 = arith.constant 0 : i32
    %c0_i32_0 = arith.constant 0 : i32
    %c0_i32_1 = arith.constant 0 : i32
    return %c0_i32, %c0_i32_0 : i32, i32
  }
  func.func @transform_1(%arg0: i32) -> (i32, i32) {
    %c0_i32 = arith.constant 0 : i32
    %c0_i32_0 = arith.constant 0 : i32
    return %c0_i32, %arg0 : i32, i32
  }
  func.func @transform_2(%arg0: i32) -> (i32, i32) {
    %c0_i32 = arith.constant 0 : i32
    %c0_i32_0 = arith.constant 0 : i32
    %c0_i32_1 = arith.constant 0 : i32
    return %c0_i32, %c0_i32_0 : i32, i32
  }
  func.func @transform_3(%arg0: i32) -> (i32, i32) {
    %c0_i32 = arith.constant 0 : i32
    %c0_i32_0 = arith.constant 0 : i32
    %c0_i32_1 = arith.constant 0 : i32
    return %c0_i32, %c0_i32_0 : i32, i32
  }
  func.func @transform_4(%arg0: i32) -> (i32, i32) {
    %c0_i32 = arith.constant 0 : i32
    %c0_i32_0 = arith.constant 0 : i32
    return %c0_i32, %arg0 : i32, i32
  }
}

module attributes {stable_mosaic.version = 11 : i64} {
  func.func @_conv_matmul_kernel(%arg0: i32, %arg1: memref<8x432xf32, #tpu.memory_space<vmem>>, %arg2: memref<432x16xf32, #tpu.memory_space<vmem>>, %arg3: memref<8x1xf32, #tpu.memory_space<vmem>>, %arg4: memref<8x1xf32, #tpu.memory_space<vmem>>, %arg5: memref<8x16xf32, #tpu.memory_space<vmem>>) attributes {dimension_semantics = [#tpu.dimension_semantics<parallel>], iteration_bounds = array<i64: 1>, scalar_prefetch = 0 : i64, scratch_operands = 0 : i64, tpu.core_type = #tpu.core_type<tc>, window_params = [{pipeline_mode = #tpu.pipeline_mode<synchronous>, transform_indices = @transform_0, window_bounds = array<i64: 8, 432>}, {transform_indices = @transform_1, window_bounds = array<i64: 432, 16>}, {pipeline_mode = #tpu.pipeline_mode<synchronous>, transform_indices = @transform_2, window_bounds = array<i64: 8, 1>}, {pipeline_mode = #tpu.pipeline_mode<synchronous>, transform_indices = @transform_3, window_bounds = array<i64: 8, 1>}, {transform_indices = @transform_4, window_bounds = array<i64: 8, 16>}]} {
    %c0 = arith.constant 0 : index
    %c0_0 = arith.constant 0 : index
    %0 = vector.load %arg1[%c0, %c0_0] : memref<8x432xf32, #tpu.memory_space<vmem>>, vector<8x432xf32>
    %c0_1 = arith.constant 0 : index
    %c0_2 = arith.constant 0 : index
    %1 = vector.load %arg2[%c0_1, %c0_2] : memref<432x16xf32, #tpu.memory_space<vmem>>, vector<432x16xf32>
    %cst = arith.constant dense<0.000000e+00> : vector<8x16xf32>
    %2 = tpu.matmul %0, %1, %cst {dimension_numbers = #tpu.dot_dimension_numbers<[1], [0], [0], [1], [0, 0, 1, 1], [], []>} : vector<8x432xf32>, vector<432x16xf32>, vector<8x16xf32> -> vector<8x16xf32>
    %c0_3 = arith.constant 0 : index
    %c0_4 = arith.constant 0 : index
    %3 = vector.load %arg3[%c0_3, %c0_4] : memref<8x1xf32, #tpu.memory_space<vmem>>, vector<8x1xf32>
    %4 = vector.broadcast %3 : vector<8x1xf32> to vector<8x16xf32>
    %5 = arith.mulf %2, %4 : vector<8x16xf32>
    %c0_5 = arith.constant 0 : index
    %c0_6 = arith.constant 0 : index
    %6 = vector.load %arg4[%c0_5, %c0_6] : memref<8x1xf32, #tpu.memory_space<vmem>>, vector<8x1xf32>
    %7 = vector.broadcast %6 : vector<8x1xf32> to vector<8x16xf32>
    %8 = arith.addf %5, %7 : vector<8x16xf32>
    %cst_7 = arith.constant 0.000000e+00 : f32
    %9 = vector.broadcast %cst_7 : f32 to vector<8x16xf32>
    %10 = arith.maximumf %8, %9 : vector<8x16xf32>
    %c0_8 = arith.constant 0 : index
    %c0_9 = arith.constant 0 : index
    %11 = vector.load %arg5[%c0_8, %c0_9] : memref<8x16xf32, #tpu.memory_space<vmem>>, vector<8x16xf32>
    tpu.vector_store %arg5[%c0_8, %c0_9], %10 {strides = array<i32>} : memref<8x16xf32, #tpu.memory_space<vmem>>, vector<8x16xf32>,
    return
  }
  func.func @transform_0(%arg0: i32) -> (i32, i32) {
    %c0_i32 = arith.constant 0 : i32
    %c0_i32_0 = arith.constant 0 : i32
    %c0_i32_1 = arith.constant 0 : i32
    return %c0_i32, %c0_i32_0 : i32, i32
  }
  func.func @transform_1(%arg0: i32) -> (i32, i32) {
    %c0_i32 = arith.constant 0 : i32
    %c0_i32_0 = arith.constant 0 : i32
    return %c0_i32, %arg0 : i32, i32
  }
  func.func @transform_2(%arg0: i32) -> (i32, i32) {
    %c0_i32 = arith.constant 0 : i32
    %c0_i32_0 = arith.constant 0 : i32
    %c0_i32_1 = arith.constant 0 : i32
    return %c0_i32, %c0_i32_0 : i32, i32
  }
  func.func @transform_3(%arg0: i32) -> (i32, i32) {
    %c0_i32 = arith.constant 0 : i32
    %c0_i32_0 = arith.constant 0 : i32
    %c0_i32_1 = arith.constant 0 : i32
    return %c0_i32, %c0_i32_0 : i32, i32
  }
  func.func @transform_4(%arg0: i32) -> (i32, i32) {
    %c0_i32 = arith.constant 0 : i32
    %c0_i32_0 = arith.constant 0 : i32
    return %c0_i32, %arg0 : i32, i32
  }
}

module attributes {stable_mosaic.version = 11 : i64} {
  func.func @_conv_matmul_kernel(%arg0: i32, %arg1: memref<16x864xf32, #tpu.memory_space<vmem>>, %arg2: memref<864x16xf32, #tpu.memory_space<vmem>>, %arg3: memref<16x1xf32, #tpu.memory_space<vmem>>, %arg4: memref<16x1xf32, #tpu.memory_space<vmem>>, %arg5: memref<16x16xf32, #tpu.memory_space<vmem>>) attributes {dimension_semantics = [#tpu.dimension_semantics<parallel>], iteration_bounds = array<i64: 1>, scalar_prefetch = 0 : i64, scratch_operands = 0 : i64, tpu.core_type = #tpu.core_type<tc>, window_params = [{pipeline_mode = #tpu.pipeline_mode<synchronous>, transform_indices = @transform_0, window_bounds = array<i64: 16, 864>}, {transform_indices = @transform_1, window_bounds = array<i64: 864, 16>}, {pipeline_mode = #tpu.pipeline_mode<synchronous>, transform_indices = @transform_2, window_bounds = array<i64: 16, 1>}, {pipeline_mode = #tpu.pipeline_mode<synchronous>, transform_indices = @transform_3, window_bounds = array<i64: 16, 1>}, {transform_indices = @transform_4, window_bounds = array<i64: 16, 16>}]} {
    %c0 = arith.constant 0 : index
    %c0_0 = arith.constant 0 : index
    %0 = vector.load %arg1[%c0, %c0_0] : memref<16x864xf32, #tpu.memory_space<vmem>>, vector<16x864xf32>
    %c0_1 = arith.constant 0 : index
    %c0_2 = arith.constant 0 : index
    %1 = vector.load %arg2[%c0_1, %c0_2] : memref<864x16xf32, #tpu.memory_space<vmem>>, vector<864x16xf32>
    %cst = arith.constant dense<0.000000e+00> : vector<16x16xf32>
    %2 = tpu.matmul %0, %1, %cst {dimension_numbers = #tpu.dot_dimension_numbers<[1], [0], [0], [1], [0, 0, 1, 1], [], []>} : vector<16x864xf32>, vector<864x16xf32>, vector<16x16xf32> -> vector<16x16xf32>
    %c0_3 = arith.constant 0 : index
    %c0_4 = arith.constant 0 : index
    %3 = vector.load %arg3[%c0_3, %c0_4] : memref<16x1xf32, #tpu.memory_space<vmem>>, vector<16x1xf32>
    %4 = vector.broadcast %3 : vector<16x1xf32> to vector<16x16xf32>
    %5 = arith.mulf %2, %4 : vector<16x16xf32>
    %c0_5 = arith.constant 0 : index
    %c0_6 = arith.constant 0 : index
    %6 = vector.load %arg4[%c0_5, %c0_6] : memref<16x1xf32, #tpu.memory_space<vmem>>, vector<16x1xf32>
    %7 = vector.broadcast %6 : vector<16x1xf32> to vector<16x16xf32>
    %8 = arith.addf %5, %7 : vector<16x16xf32>
    %cst_7 = arith.constant 0.000000e+00 : f32
    %9 = vector.broadcast %cst_7 : f32 to vector<16x16xf32>
    %10 = arith.maximumf %8, %9 : vector<16x16xf32>
    %c0_8 = arith.constant 0 : index
    %c0_9 = arith.constant 0 : index
    %11 = vector.load %arg5[%c0_8, %c0_9] : memref<16x16xf32, #tpu.memory_space<vmem>>, vector<16x16xf32>
    tpu.vector_store %arg5[%c0_8, %c0_9], %10 {strides = array<i32>} : memref<16x16xf32, #tpu.memory_space<vmem>>, vector<16x16xf32>,
    return
  }
  func.func @transform_0(%arg0: i32) -> (i32, i32) {
    %c0_i32 = arith.constant 0 : i32
    %c0_i32_0 = arith.constant 0 : i32
    %c0_i32_1 = arith.constant 0 : i32
    return %c0_i32, %c0_i32_0 : i32, i32
  }
  func.func @transform_1(%arg0: i32) -> (i32, i32) {
    %c0_i32 = arith.constant 0 : i32
    %c0_i32_0 = arith.constant 0 : i32
    return %c0_i32, %arg0 : i32, i32
  }
  func.func @transform_2(%arg0: i32) -> (i32, i32) {
    %c0_i32 = arith.constant 0 : i32
    %c0_i32_0 = arith.constant 0 : i32
    %c0_i32_1 = arith.constant 0 : i32
    return %c0_i32, %c0_i32_0 : i32, i32
  }
  func.func @transform_3(%arg0: i32) -> (i32, i32) {
    %c0_i32 = arith.constant 0 : i32
    %c0_i32_0 = arith.constant 0 : i32
    %c0_i32_1 = arith.constant 0 : i32
    return %c0_i32, %c0_i32_0 : i32, i32
  }
  func.func @transform_4(%arg0: i32) -> (i32, i32) {
    %c0_i32 = arith.constant 0 : i32
    %c0_i32_0 = arith.constant 0 : i32
    return %c0_i32, %arg0 : i32, i32
  }
}

module attributes {stable_mosaic.version = 11 : i64} {
  func.func @_conv_matmul_kernel(%arg0: i32, %arg1: memref<8x432xf32, #tpu.memory_space<vmem>>, %arg2: memref<432x128xf32, #tpu.memory_space<vmem>>, %arg3: memref<8x1xf32, #tpu.memory_space<vmem>>, %arg4: memref<8x1xf32, #tpu.memory_space<vmem>>, %arg5: memref<8x128xf32, #tpu.memory_space<vmem>>) attributes {dimension_semantics = [#tpu.dimension_semantics<parallel>], iteration_bounds = array<i64: 1>, scalar_prefetch = 0 : i64, scratch_operands = 0 : i64, tpu.core_type = #tpu.core_type<tc>, window_params = [{pipeline_mode = #tpu.pipeline_mode<synchronous>, transform_indices = @transform_0, window_bounds = array<i64: 8, 432>}, {transform_indices = @transform_1, window_bounds = array<i64: 432, 128>}, {pipeline_mode = #tpu.pipeline_mode<synchronous>, transform_indices = @transform_2, window_bounds = array<i64: 8, 1>}, {pipeline_mode = #tpu.pipeline_mode<synchronous>, transform_indices = @transform_3, window_bounds = array<i64: 8, 1>}, {transform_indices = @transform_4, window_bounds = array<i64: 8, 128>}]} {
    %c0 = arith.constant 0 : index
    %c0_0 = arith.constant 0 : index
    %0 = vector.load %arg1[%c0, %c0_0] : memref<8x432xf32, #tpu.memory_space<vmem>>, vector<8x432xf32>
    %c0_1 = arith.constant 0 : index
    %c0_2 = arith.constant 0 : index
    %1 = vector.load %arg2[%c0_1, %c0_2] : memref<432x128xf32, #tpu.memory_space<vmem>>, vector<432x128xf32>
    %cst = arith.constant dense<0.000000e+00> : vector<8x128xf32>
    %2 = tpu.matmul %0, %1, %cst {dimension_numbers = #tpu.dot_dimension_numbers<[1], [0], [0], [1], [0, 0, 1, 1], [], []>} : vector<8x432xf32>, vector<432x128xf32>, vector<8x128xf32> -> vector<8x128xf32>
    %c0_3 = arith.constant 0 : index
    %c0_4 = arith.constant 0 : index
    %3 = vector.load %arg3[%c0_3, %c0_4] : memref<8x1xf32, #tpu.memory_space<vmem>>, vector<8x1xf32>
    %4 = vector.broadcast %3 : vector<8x1xf32> to vector<8x128xf32>
    %5 = arith.mulf %2, %4 : vector<8x128xf32>
    %c0_5 = arith.constant 0 : index
    %c0_6 = arith.constant 0 : index
    %6 = vector.load %arg4[%c0_5, %c0_6] : memref<8x1xf32, #tpu.memory_space<vmem>>, vector<8x1xf32>
    %7 = vector.broadcast %6 : vector<8x1xf32> to vector<8x128xf32>
    %8 = arith.addf %5, %7 : vector<8x128xf32>
    %cst_7 = arith.constant 0.000000e+00 : f32
    %9 = vector.broadcast %cst_7 : f32 to vector<8x128xf32>
    %10 = arith.maximumf %8, %9 : vector<8x128xf32>
    %c0_8 = arith.constant 0 : index
    %c0_9 = arith.constant 0 : index
    %11 = vector.load %arg5[%c0_8, %c0_9] : memref<8x128xf32, #tpu.memory_space<vmem>>, vector<8x128xf32>
    tpu.vector_store %arg5[%c0_8, %c0_9], %10 {strides = array<i32>} : memref<8x128xf32, #tpu.memory_space<vmem>>, vector<8x128xf32>,
    return
  }
  func.func @transform_0(%arg0: i32) -> (i32, i32) {
    %c0_i32 = arith.constant 0 : i32
    %c0_i32_0 = arith.constant 0 : i32
    %c0_i32_1 = arith.constant 0 : i32
    return %c0_i32, %c0_i32_0 : i32, i32
  }
  func.func @transform_1(%arg0: i32) -> (i32, i32) {
    %c0_i32 = arith.constant 0 : i32
    %c0_i32_0 = arith.constant 0 : i32
    return %c0_i32, %arg0 : i32, i32
  }
  func.func @transform_2(%arg0: i32) -> (i32, i32) {
    %c0_i32 = arith.constant 0 : i32
    %c0_i32_0 = arith.constant 0 : i32
    %c0_i32_1 = arith.constant 0 : i32
    return %c0_i32, %c0_i32_0 : i32, i32
  }
  func.func @transform_3(%arg0: i32) -> (i32, i32) {
    %c0_i32 = arith.constant 0 : i32
    %c0_i32_0 = arith.constant 0 : i32
    %c0_i32_1 = arith.constant 0 : i32
    return %c0_i32, %c0_i32_0 : i32, i32
  }
  func.func @transform_4(%arg0: i32) -> (i32, i32) {
    %c0_i32 = arith.constant 0 : i32
    %c0_i32_0 = arith.constant 0 : i32
    return %c0_i32, %arg0 : i32, i32
  }
}

module attributes {stable_mosaic.version = 11 : i64} {
  func.func @_conv_matmul_kernel(%arg0: i32, %arg1: memref<4x216xf32, #tpu.memory_space<vmem>>, %arg2: memref<216x128xf32, #tpu.memory_space<vmem>>, %arg3: memref<4x1xf32, #tpu.memory_space<vmem>>, %arg4: memref<4x1xf32, #tpu.memory_space<vmem>>, %arg5: memref<4x128xf32, #tpu.memory_space<vmem>>) attributes {dimension_semantics = [#tpu.dimension_semantics<parallel>], iteration_bounds = array<i64: 1>, scalar_prefetch = 0 : i64, scratch_operands = 0 : i64, tpu.core_type = #tpu.core_type<tc>, window_params = [{pipeline_mode = #tpu.pipeline_mode<synchronous>, transform_indices = @transform_0, window_bounds = array<i64: 4, 216>}, {transform_indices = @transform_1, window_bounds = array<i64: 216, 128>}, {pipeline_mode = #tpu.pipeline_mode<synchronous>, transform_indices = @transform_2, window_bounds = array<i64: 4, 1>}, {pipeline_mode = #tpu.pipeline_mode<synchronous>, transform_indices = @transform_3, window_bounds = array<i64: 4, 1>}, {transform_indices = @transform_4, window_bounds = array<i64: 4, 128>}]} {
    %c0 = arith.constant 0 : index
    %c0_0 = arith.constant 0 : index
    %0 = vector.load %arg1[%c0, %c0_0] : memref<4x216xf32, #tpu.memory_space<vmem>>, vector<4x216xf32>
    %c0_1 = arith.constant 0 : index
    %c0_2 = arith.constant 0 : index
    %1 = vector.load %arg2[%c0_1, %c0_2] : memref<216x128xf32, #tpu.memory_space<vmem>>, vector<216x128xf32>
    %cst = arith.constant dense<0.000000e+00> : vector<4x128xf32>
    %2 = tpu.matmul %0, %1, %cst {dimension_numbers = #tpu.dot_dimension_numbers<[1], [0], [0], [1], [0, 0, 1, 1], [], []>} : vector<4x216xf32>, vector<216x128xf32>, vector<4x128xf32> -> vector<4x128xf32>
    %c0_3 = arith.constant 0 : index
    %c0_4 = arith.constant 0 : index
    %3 = vector.load %arg3[%c0_3, %c0_4] : memref<4x1xf32, #tpu.memory_space<vmem>>, vector<4x1xf32>
    %4 = vector.broadcast %3 : vector<4x1xf32> to vector<4x128xf32>
    %5 = arith.mulf %2, %4 : vector<4x128xf32>
    %c0_5 = arith.constant 0 : index
    %c0_6 = arith.constant 0 : index
    %6 = vector.load %arg4[%c0_5, %c0_6] : memref<4x1xf32, #tpu.memory_space<vmem>>, vector<4x1xf32>
    %7 = vector.broadcast %6 : vector<4x1xf32> to vector<4x128xf32>
    %8 = arith.addf %5, %7 : vector<4x128xf32>
    %cst_7 = arith.constant 0.000000e+00 : f32
    %9 = vector.broadcast %cst_7 : f32 to vector<4x128xf32>
    %10 = arith.maximumf %8, %9 : vector<4x128xf32>
    %c0_8 = arith.constant 0 : index
    %c0_9 = arith.constant 0 : index
    %11 = vector.load %arg5[%c0_8, %c0_9] : memref<4x128xf32, #tpu.memory_space<vmem>>, vector<4x128xf32>
    tpu.vector_store %arg5[%c0_8, %c0_9], %10 {strides = array<i32>} : memref<4x128xf32, #tpu.memory_space<vmem>>, vector<4x128xf32>,
    return
  }
  func.func @transform_0(%arg0: i32) -> (i32, i32) {
    %c0_i32 = arith.constant 0 : i32
    %c0_i32_0 = arith.constant 0 : i32
    %c0_i32_1 = arith.constant 0 : i32
    return %c0_i32, %c0_i32_0 : i32, i32
  }
  func.func @transform_1(%arg0: i32) -> (i32, i32) {
    %c0_i32 = arith.constant 0 : i32
    %c0_i32_0 = arith.constant 0 : i32
    return %c0_i32, %arg0 : i32, i32
  }
  func.func @transform_2(%arg0: i32) -> (i32, i32) {
    %c0_i32 = arith.constant 0 : i32
    %c0_i32_0 = arith.constant 0 : i32
    %c0_i32_1 = arith.constant 0 : i32
    return %c0_i32, %c0_i32_0 : i32, i32
  }
  func.func @transform_3(%arg0: i32) -> (i32, i32) {
    %c0_i32 = arith.constant 0 : i32
    %c0_i32_0 = arith.constant 0 : i32
    %c0_i32_1 = arith.constant 0 : i32
    return %c0_i32, %c0_i32_0 : i32, i32
  }
  func.func @transform_4(%arg0: i32) -> (i32, i32) {
    %c0_i32 = arith.constant 0 : i32
    %c0_i32_0 = arith.constant 0 : i32
    return %c0_i32, %arg0 : i32, i32
  }
}

module attributes {stable_mosaic.version = 11 : i64} {
  func.func @_conv_matmul_kernel(%arg0: i32, %arg1: memref<4x216xf32, #tpu.memory_space<vmem>>, %arg2: memref<216x512xf32, #tpu.memory_space<vmem>>, %arg3: memref<4x1xf32, #tpu.memory_space<vmem>>, %arg4: memref<4x1xf32, #tpu.memory_space<vmem>>, %arg5: memref<4x512xf32, #tpu.memory_space<vmem>>) attributes {dimension_semantics = [#tpu.dimension_semantics<parallel>], iteration_bounds = array<i64: 2>, scalar_prefetch = 0 : i64, scratch_operands = 0 : i64, tpu.core_type = #tpu.core_type<tc>, window_params = [{pipeline_mode = #tpu.pipeline_mode<synchronous>, transform_indices = @transform_0, window_bounds = array<i64: 4, 216>}, {transform_indices = @transform_1, window_bounds = array<i64: 216, 512>}, {pipeline_mode = #tpu.pipeline_mode<synchronous>, transform_indices = @transform_2, window_bounds = array<i64: 4, 1>}, {pipeline_mode = #tpu.pipeline_mode<synchronous>, transform_indices = @transform_3, window_bounds = array<i64: 4, 1>}, {transform_indices = @transform_4, window_bounds = array<i64: 4, 512>}]} {
    %c0 = arith.constant 0 : index
    %c0_0 = arith.constant 0 : index
    %0 = vector.load %arg1[%c0, %c0_0] : memref<4x216xf32, #tpu.memory_space<vmem>>, vector<4x216xf32>
    %c0_1 = arith.constant 0 : index
    %c0_2 = arith.constant 0 : index
    %1 = vector.load %arg2[%c0_1, %c0_2] : memref<216x512xf32, #tpu.memory_space<vmem>>, vector<216x512xf32>
    %cst = arith.constant dense<0.000000e+00> : vector<4x512xf32>
    %2 = tpu.matmul %0, %1, %cst {dimension_numbers = #tpu.dot_dimension_numbers<[1], [0], [0], [1], [0, 0, 1, 1], [], []>} : vector<4x216xf32>, vector<216x512xf32>, vector<4x512xf32> -> vector<4x512xf32>
    %c0_3 = arith.constant 0 : index
    %c0_4 = arith.constant 0 : index
    %3 = vector.load %arg3[%c0_3, %c0_4] : memref<4x1xf32, #tpu.memory_space<vmem>>, vector<4x1xf32>
    %4 = vector.broadcast %3 : vector<4x1xf32> to vector<4x512xf32>
    %5 = arith.mulf %2, %4 : vector<4x512xf32>
    %c0_5 = arith.constant 0 : index
    %c0_6 = arith.constant 0 : index
    %6 = vector.load %arg4[%c0_5, %c0_6] : memref<4x1xf32, #tpu.memory_space<vmem>>, vector<4x1xf32>
    %7 = vector.broadcast %6 : vector<4x1xf32> to vector<4x512xf32>
    %8 = arith.addf %5, %7 : vector<4x512xf32>
    %cst_7 = arith.constant 0.000000e+00 : f32
    %9 = vector.broadcast %cst_7 : f32 to vector<4x512xf32>
    %10 = arith.maximumf %8, %9 : vector<4x512xf32>
    %c0_8 = arith.constant 0 : index
    %c0_9 = arith.constant 0 : index
    %11 = vector.load %arg5[%c0_8, %c0_9] : memref<4x512xf32, #tpu.memory_space<vmem>>, vector<4x512xf32>
    tpu.vector_store %arg5[%c0_8, %c0_9], %10 {strides = array<i32>} : memref<4x512xf32, #tpu.memory_space<vmem>>, vector<4x512xf32>,
    return
  }
  func.func @transform_0(%arg0: i32) -> (i32, i32) {
    %c0_i32 = arith.constant 0 : i32
    %c0_i32_0 = arith.constant 0 : i32
    %c0_i32_1 = arith.constant 0 : i32
    return %c0_i32, %c0_i32_0 : i32, i32
  }
  func.func @transform_1(%arg0: i32) -> (i32, i32) {
    %c0_i32 = arith.constant 0 : i32
    %c0_i32_0 = arith.constant 0 : i32
    return %c0_i32, %arg0 : i32, i32
  }
  func.func @transform_2(%arg0: i32) -> (i32, i32) {
    %c0_i32 = arith.constant 0 : i32
    %c0_i32_0 = arith.constant 0 : i32
    %c0_i32_1 = arith.constant 0 : i32
    return %c0_i32, %c0_i32_0 : i32, i32
  }
  func.func @transform_3(%arg0: i32) -> (i32, i32) {
    %c0_i32 = arith.constant 0 : i32
    %c0_i32_0 = arith.constant 0 : i32
    %c0_i32_1 = arith.constant 0 : i32
    return %c0_i32, %c0_i32_0 : i32, i32
  }
  func.func @transform_4(%arg0: i32) -> (i32, i32) {
    %c0_i32 = arith.constant 0 : i32
    %c0_i32_0 = arith.constant 0 : i32
    return %c0_i32, %arg0 : i32, i32
  }
}

module attributes {stable_mosaic.version = 11 : i64} {
  func.func @_conv_matmul_kernel(%arg0: i32, %arg1: memref<1x4xf32, #tpu.memory_space<vmem>>, %arg2: memref<4x512xf32, #tpu.memory_space<vmem>>, %arg3: memref<1x1xf32, #tpu.memory_space<vmem>>, %arg4: memref<1x1xf32, #tpu.memory_space<vmem>>, %arg5: memref<1x512xf32, #tpu.memory_space<vmem>>) attributes {dimension_semantics = [#tpu.dimension_semantics<parallel>], iteration_bounds = array<i64: 2>, scalar_prefetch = 0 : i64, scratch_operands = 0 : i64, tpu.core_type = #tpu.core_type<tc>, window_params = [{pipeline_mode = #tpu.pipeline_mode<synchronous>, transform_indices = @transform_0, window_bounds = array<i64: 1, 4>}, {transform_indices = @transform_1, window_bounds = array<i64: 4, 512>}, {pipeline_mode = #tpu.pipeline_mode<synchronous>, transform_indices = @transform_2, window_bounds = array<i64: 1, 1>}, {pipeline_mode = #tpu.pipeline_mode<synchronous>, transform_indices = @transform_3, window_bounds = array<i64: 1, 1>}, {transform_indices = @transform_4, window_bounds = array<i64: 1, 512>}]} {
    %c0 = arith.constant 0 : index
    %c0_0 = arith.constant 0 : index
    %0 = vector.load %arg1[%c0, %c0_0] : memref<1x4xf32, #tpu.memory_space<vmem>>, vector<1x4xf32>
    %c0_1 = arith.constant 0 : index
    %c0_2 = arith.constant 0 : index
    %1 = vector.load %arg2[%c0_1, %c0_2] : memref<4x512xf32, #tpu.memory_space<vmem>>, vector<4x512xf32>
    %cst = arith.constant dense<0.000000e+00> : vector<1x512xf32>
    %2 = tpu.matmul %0, %1, %cst {dimension_numbers = #tpu.dot_dimension_numbers<[1], [0], [0], [1], [0, 0, 1, 1], [], []>} : vector<1x4xf32>, vector<4x512xf32>, vector<1x512xf32> -> vector<1x512xf32>
    %c0_3 = arith.constant 0 : index
    %c0_4 = arith.constant 0 : index
    %3 = vector.load %arg3[%c0_3, %c0_4] : memref<1x1xf32, #tpu.memory_space<vmem>>, vector<1x1xf32>
    %4 = vector.broadcast %3 : vector<1x1xf32> to vector<1x512xf32>
    %5 = arith.mulf %2, %4 : vector<1x512xf32>
    %c0_5 = arith.constant 0 : index
    %c0_6 = arith.constant 0 : index
    %6 = vector.load %arg4[%c0_5, %c0_6] : memref<1x1xf32, #tpu.memory_space<vmem>>, vector<1x1xf32>
    %7 = vector.broadcast %6 : vector<1x1xf32> to vector<1x512xf32>
    %8 = arith.addf %5, %7 : vector<1x512xf32>
    %c0_7 = arith.constant 0 : index
    %c0_8 = arith.constant 0 : index
    %9 = vector.load %arg5[%c0_7, %c0_8] : memref<1x512xf32, #tpu.memory_space<vmem>>, vector<1x512xf32>
    tpu.vector_store %arg5[%c0_7, %c0_8], %8 {strides = array<i32>} : memref<1x512xf32, #tpu.memory_space<vmem>>, vector<1x512xf32>,
    return
  }
  func.func @transform_0(%arg0: i32) -> (i32, i32) {
    %c0_i32 = arith.constant 0 : i32
    %c0_i32_0 = arith.constant 0 : i32
    %c0_i32_1 = arith.constant 0 : i32
    return %c0_i32, %c0_i32_0 : i32, i32
  }
  func.func @transform_1(%arg0: i32) -> (i32, i32) {
    %c0_i32 = arith.constant 0 : i32
    %c0_i32_0 = arith.constant 0 : i32
    return %c0_i32, %arg0 : i32, i32
  }
  func.func @transform_2(%arg0: i32) -> (i32, i32) {
    %c0_i32 = arith.constant 0 : i32
    %c0_i32_0 = arith.constant 0 : i32
    %c0_i32_1 = arith.constant 0 : i32
    return %c0_i32, %c0_i32_0 : i32, i32
  }
  func.func @transform_3(%arg0: i32) -> (i32, i32) {
    %c0_i32 = arith.constant 0 : i32
    %c0_i32_0 = arith.constant 0 : i32
    %c0_i32_1 = arith.constant 0 : i32
    return %c0_i32, %c0_i32_0 : i32, i32
  }
  func.func @transform_4(%arg0: i32) -> (i32, i32) {
    %c0_i32 = arith.constant 0 : i32
    %c0_i32_0 = arith.constant 0 : i32
    return %c0_i32, %arg0 : i32, i32
  }
}

</mosaic_0001>

<bundles_post_ra>
// kernel: _lambda_.14
= control target key start
LH: loop header
LB: loop body
LE: loop exit
PB: predicated region body
PF: predicated region fallthrough
CT: control target
= control target key end

     0   :  { %s642_s15 = smov 0   ;;  %s644_s16 = smov 0   ;;  %s733_s0 = inlined_call_operand.vmem [shape: f32[4,27], index: 0, kind: input, shape index: {}]   ;;  %s734_s1 = inlined_call_operand.vmem [shape: f32[27,1024], index: 1, kind: input, shape index: {}]   ;;  %s735_s2 = inlined_call_operand.vmem [shape: f32[4,1], index: 2, kind: input, shape index: {}]   ;;  %s736_s3 = inlined_call_operand.vmem [shape: f32[4,1], index: 3, kind: input, shape index: {}]   ;;  %s737_s4 = inlined_call_operand.vmem [shape: f32[4,1024], index: 4, kind: output, shape index: {}]  }
   0x1   :  { %s646_s17 = smov 0  }
   0x2 LB: > { %s522_s18 = sadd.s32 4294967295, %s612_s17   ;;  %s659_s19 = sadd.s32 1, %s612_s17   ;;  %s612_s17 = sphi %s646_s17, %s742_s17   ;;  %s608_s16 = sphi %s644_s16, %s741_s16   ;;  %s604_s15 = sphi %s642_s15, %s740_s15  }
   0x3   : > { %s39_s20 = ssub.s32 %s612_s17, %s659_s19  ;;  %s42_s21 = sadd.s32 1, %s608_s16 }
   0x4   : > { %p40_p0 = scmp.eq.s32.totalorder %s39_s20, 0  ;;  %p49_p1 = scmp.ne.s32.totalorder %s608_s16, %s604_s15 }
   0x5   : > { %p50_p2 = scmp.eq.s32.totalorder %s612_s17, 0  ;;  %p525_p4 = scmp.ge.s32.totalorder %s612_s17, 2 }
   0x6   : > { %s668_s22 = scalar_select %p40_p0, %s608_s16, %s42_s21  }
   0x7   : > { %p51_p3 = por %p50_p2, %p49_p1  ;;  %152 = sbr.rel (%p525_p4) target bundleno = 26 (0x1a), region = 28 }
   0xe   : > { %155 = sbr.rel (!%p51_p3) target bundleno = 26 (0x1a), region = 32  ;;  %s157_s23 = sand.u32 (%p51_p3), 1, %s608_s16  }
   0xf   : > { %s541_s24 = sshll.u32 (%p51_p3), %s612_s17, 5  ;;  %s526_s25 = sshll.u32 (%p51_p3), %s157_s23, 7 }
  0x10   : > { %s676_s28 = scalar_lea.vmem (%p51_p3), %s734_s1, %s541_s24  ;;  %s159_s29 = scalar_lea.vmem (%p51_p3), [#allocation2], %s526_s25 }
  0x11   : > { %v175_v0 = vld [vmem:[%s676_s28] sm:$0xff] (%p51_p3)  ;;  %v177_v1 = vld [vmem:[%s676_s28 + $0x8] sm:$0xff] (%p51_p3)  ;;  %v179_v2 = vld [vmem:[%s676_s28 + $0x10] sm:$0xff] (%p51_p3) }
  0x12   : > { %176 = vst [vmem:[%s159_s29] sm:$0xff] (%p51_p3), %v175_v0  ;;  %178 = vst [vmem:[%s159_s29 + $0x8] sm:$0xff] (%p51_p3), %v177_v1  ;;  %v181_v3 = vld [vmem:[%s676_s28 + $0x18] sm:$0xff] (%p51_p3)  ;;  %v183_v4 = vld [vmem:[%s676_s28 + $0x40] sm:$0xff] (%p51_p3) }
  0x13   : > { %180 = vst [vmem:[%s159_s29 + $0x10] sm:$0xff] (%p51_p3), %v179_v2  ;;  %v185_v5 = vld [vmem:[%s676_s28 + $0x48] sm:$0xff] (%p51_p3)  ;;  %182 = vst [vmem:[%s159_s29 + $0x18] sm:$0xff] (%p51_p3), %v181_v3  ;;  %v187_v6 = vld [vmem:[%s676_s28 + $0x50] sm:$0xff] (%p51_p3) }
  0x14   : > { %184 = vst [vmem:[%s159_s29 + $0x20] sm:$0xff] (%p51_p3), %v183_v4  ;;  %186 = vst [vmem:[%s159_s29 + $0x28] sm:$0xff] (%p51_p3), %v185_v5  ;;  %v189_v7 = vld [vmem:[%s676_s28 + $0x58] sm:$0xff] (%p51_p3)  ;;  %v191_v8 = vld [vmem:[%s676_s28 + $0x80] sm:$0xff] (%p51_p3) }
  0x15   : > { %188 = vst [vmem:[%s159_s29 + $0x30] sm:$0xff] %v187_v6  ;;  %190 = vst [vmem:[%s159_s29 + $0x38] sm:$0xff] %v189_v7  ;;  %v193_v9 = vld [vmem:[%s676_s28 + $0x88] sm:$0xff]  ;;  %v195_v10 = vld [vmem:[%s676_s28 + $0x90] sm:$0xff] }
  0x16   : > { %192 = vst [vmem:[%s159_s29 + $0x40] sm:$0xff] %v191_v8  ;;  %v197_v11 = vld [vmem:[%s676_s28 + $0x98] sm:$0xff]  ;;  %194 = vst [vmem:[%s159_s29 + $0x48] sm:$0xff] %v193_v9  ;;  %v199_v12 = vld [vmem:[%s676_s28 + $0xc0] sm:$0xff] }
  0x17   : > { %196 = vst [vmem:[%s159_s29 + $0x50] sm:$0xff] %v195_v10  ;;  %198 = vst [vmem:[%s159_s29 + $0x58] sm:$0xff] %v197_v11  ;;  %v201_v13 = vld [vmem:[%s676_s28 + $0xc8] sm:$0xff]  ;;  %v203_v14 = vld [vmem:[%s676_s28 + $0xd0] sm:$0xff] }
  0x18   : > { %200 = vst [vmem:[%s159_s29 + $0x60] sm:$0xff] %v199_v12  ;;  %202 = vst [vmem:[%s159_s29 + $0x68] sm:$0xff] %v201_v13  ;;  %v205_v15 = vld [vmem:[%s676_s28 + $0xd8] sm:$0xff] }
  0x19   : > { %204 = vst [vmem:[%s159_s29 + $0x70] sm:$0xff] %v203_v14  ;;  %206 = vst [vmem:[%s159_s29 + $0x78] sm:$0xff] %v205_v15 }
  0x1a PF: > { %p529_p5 = scmp.ge.s32.totalorder %s612_s17, 1  ;;  %p211_p6 = scmp.lt.s32.totalorder %s612_s17, 3 }
  0x1c   : > { %p212_p7 = pnand %p529_p5, %p211_p6 }
  0x1d   : > { %s218_s30 = sand.u32 (!%p212_p7), 1, %s604_s15   ;;  %vm271_vm0 = vcmask (!%p212_p7), 1042432   ;;  %v614_v16 = vmov (!%p212_p7), 0.0   ;;  %v426_v17 = vld [vmem:[%s735_s2] sm:$0xf] (!%p212_p7)  ;;  %vm615_vm1 = vmmov (!%p212_p7), 1  }
  0x1e   : > { %215 = sbr.rel (%p212_p7) target bundleno = 267 (0x10b), region = 55  ;;  %s530_s5 = sshll.u32 (!%p212_p7), %s218_s30, 7  ;;  %348 = vmatprep.mubr.f32.mxu0 (!%p212_p7), %v614_v16  ;;  %419 = vmatprep.mubr.f32.mxu1 (!%p212_p7), %v614_v16  ;;  %vm700_vm2 = vmpackc.low (!%p212_p7), %vm271_vm0, %vm615_vm1  ;;  %v616_v19 = vmov (!%p212_p7), 0   ;;  %v436_v23 = vld [vmem:[%s736_s3] sm:$0xf] (!%p212_p7)  ;;  %vm267_vm3 = vcmask (!%p212_p7), 220160  }
  0x1f   : > { %589 = vset.pattern.permute.xlu0 (!%p212_p7), %v616_v19  ;;  %s220_s8 = scalar_lea.vmem (!%p212_p7), [#allocation2], %s530_s5  ;;  %v250_v45 = vld [vmem:[%s733_s0] sm:$0xf] (!%p212_p7)  ;;  %s531_s13 = sshll.u32 (!%p212_p7), %s522_s18, 2 }
  0x20   : > { %v252_v20 = vld [vmem:[%s220_s8 + $0x8] sm:$0xff] (!%p212_p7)  ;;  %v254_v22 = vld [vmem:[%s220_s8 + $0x18] sm:$0xff] (!%p212_p7)  ;;  %429 = vperm.xlu0 (!%p212_p7), %589, %v426_v17   ;;  %v251_v26 = vld [vmem:[%s220_s8] sm:$0xff] (!%p212_p7)  ;;  %p245_p8 = scmp.lt.s32.totalorder (!%p212_p7), %s531_s13, 7 }
  0x21   : > { %v256_v21 = vld [vmem:[%s220_s8 + $0x28] sm:$0xff] (!%p212_p7)  ;;  %v258_v25 = vld [vmem:[%s220_s8 + $0x38] sm:$0xff] (!%p212_p7)  ;;  %v255_v27 = vld [vmem:[%s220_s8 + $0x20] sm:$0xff] (!%p212_p7) }
  0x22   : > { %v542_v24 = vpack.c.bf16 (!%p212_p7), %v256_v21, %v252_v20  ;;  %v552_v28 = vpack.c.bf16 (!%p212_p7), %v258_v25, %v254_v22  ;;  %v544_v29 = vpack.c.bf16 (!%p212_p7), %v255_v27, %v251_v26  ;;  %v253_v30 = vld [vmem:[%s220_s8 + $0x10] sm:$0xff] (!%p212_p7)  ;;  %v260_v32 = vld [vmem:[%s220_s8 + $0x48] sm:$0xff] (!%p212_p7)  ;;  %v262_v35 = vld [vmem:[%s220_s8 + $0x58] sm:$0xff] (!%p212_p7) }
  0x23   : > { %v257_v31 = vld [vmem:[%s220_s8 + $0x30] sm:$0xff] (!%p212_p7)  ;;  %v264_v34 = vld [vmem:[%s220_s8 + $0x68] sm:$0x7] (!%p212_p7)  ;;  %v266_v36 = vld [vmem:[%s220_s8 + $0x78] sm:$0x7] (!%p212_p7) }
  0x24   : > { %543 = vmatprep.subr.bf16.mxu0 (!%p212_p7), %v542_v24  ;;  %v554_v33 = vpack.c.bf16 (!%p212_p7), %v257_v31, %v253_v30  ;;  %553 = vmatprep.subr.bf16.mxu1 (!%p212_p7), %v552_v28  ;;  %v546_v37 = vpack.c.bf16 (!%p212_p7), %v264_v34, %v260_v32  ;;  %v556_v38 = vpack.c.bf16 (!%p212_p7), %v266_v36, %v262_v35  ;;  %v259_v39 = vld [vmem:[%s220_s8 + $0x40] sm:$0xff] (!%p212_p7)  ;;  %v261_v41 = vld [vmem:[%s220_s8 + $0x50] sm:$0xff] (!%p212_p7) }
  0x25   : > { %545 = vmatpush1.bf16.msra.mxu0 %v544_v29  ;;  %v263_v40 = vld [vmem:[%s220_s8 + $0x60] sm:$0x7]  ;;  %v265_v43 = vld [vmem:[%s220_s8 + $0x70] sm:$0x7]  ;;  %439 = vperm.xlu0 %589, %v436_v23   ;;  %s744_s13 = smov (!%p245_p8, %s531_s13), 7 }
  0x26   : > { %555 = vmatpush1.bf16.msra.mxu1 %v554_v33  ;;  %v549_v42 = vpack.c.bf16 %v263_v40, %v259_v39  ;;  %548 = vmatprep.subr.msk.bf16.mxu0 %vm700_vm2, %v546_v37  ;;  %v559_v44 = vpack.c.bf16 %v265_v43, %v261_v41  ;;  %s532_s14 = sshll.u32 %s744_s13, 2 }
  0x27   : > { %558 = vmatprep.subr.msk.bf16.mxu1 %vm700_vm2, %v556_v38  ;;  %s248_s18 = scalar_lea.vmem %s737_s4, %s532_s14 }
  0x29   : > { %551 = vmatpush1.bf16.msk.msra.mxu0 %vm700_vm2, %v549_v42 }
  0x2a   : > { %561 = vmatpush1.bf16.msk.msra.mxu1 %vm700_vm2, %v559_v44 }
  0x2c   : > { %535 = vmatmul.mubr.msk.f32.vlgmr.msra.gmra.mrb[0].mxu0 %vm267_vm3, %v250_v45 }
  0x2d   : > { %538 = vmatmul.mubr.msk.f32.vlgmr.msra.gmra.mrb[0].mxu1 %vm267_vm3, %v250_v45 }
  0x9f   : > { %v430_v46 = vpop.permute.xlu0 %429 }
  0xa4   : > { %v440_v51 = vpop.permute.xlu0 %439 }
  0xff   : > { %v350_v47 = vpop.f32.mrb[0].mxu0 }
 0x100   : > { %v432_v48 = vmul.f32 %v430_v46, %v350_v47  ;;  %v421_v49 = vpop.f32.mrb[0].mxu1  ;;  %v352_v50 = vpop.f32.mrb[1].mxu0 }
 0x101   : > { %v434_v52 = vmul.f32 %v430_v46, %v421_v49  ;;  %v433_v53 = vmul.f32 %v430_v46, %v352_v50  ;;  %v423_v54 = vpop.f32.mrb[1].mxu1 }
 0x102   : > { %v442_v55 = vadd.f32 %v440_v51, %v432_v48  ;;  %v435_v56 = vmul.f32 %v430_v46, %v423_v54 }
 0x103   : > { %v444_v57 = vadd.f32 %v440_v51, %v434_v52  ;;  %v443_v58 = vadd.f32 %v440_v51, %v433_v53 }
 0x104   : > { %v446_v59 = vmax.f32 %v442_v55, 0.0  ;;  %v445_v60 = vadd.f32 %v440_v51, %v435_v56 }
 0x105   : > { %v448_v61 = vmax.f32 %v444_v57, 0.0  ;;  %v447_v62 = vmax.f32 %v443_v58, 0.0 }
 0x106   : > { %v449_v63 = vmax.f32 %v445_v60, 0.0 }
 0x107   : > { %v454_v0 = vcombine.low %v446_v59, %v447_v62 }
 0x108   : > { %v455_v1 = vcombine.low %v448_v61, %v449_v63 }
 0x109   : > { %458 = vst [vmem:[%s248_s18] sm:$0xff] %v454_v0 }
 0x10a   : > { %459 = vst [vmem:[%s248_s18 + $0x8] sm:$0xff] %v455_v1 }
 0x10b PF: > { %p11_p9 = scmp.ge.s32.totalorder %s659_s19, 4   ;;  %s740_s15 = smov %s608_s16 }
 0x10c   : > { %s741_s16 = smov %s668_s22  ;;  %s742_s17 = smov %s659_s19 }
 0x10d   :  { %13 = sbr.rel (!%p11_p9) target bundleno = 2 (0x2), region = 94 }

// kernel: _lambda_.15
= control target key start
LH: loop header
LB: loop body
LE: loop exit
PB: predicated region body
PF: predicated region fallthrough
CT: control target
= control target key end

     0   :  { %s802_s15 = smov 0   ;;  %s804_s16 = smov 0   ;;  %s1037_s0 = inlined_call_operand.vmem [shape: f32[4,108], index: 0, kind: input, shape index: {}]   ;;  %s1038_s1 = inlined_call_operand.vmem [shape: f32[108,1024], index: 1, kind: input, shape index: {}]   ;;  %s1039_s2 = inlined_call_operand.vmem [shape: f32[4,1], index: 2, kind: input, shape index: {}]   ;;  %s1040_s3 = inlined_call_operand.vmem [shape: f32[4,1], index: 3, kind: input, shape index: {}]   ;;  %s1041_s4 = inlined_call_operand.vmem [shape: f32[4,1024], index: 4, kind: output, shape index: {}]  }
   0x1   :  { %s806_s17 = smov 0  }
   0x2 LB: > { %s642_s18 = sadd.s32 4294967295, %s772_s17   ;;  %s819_s19 = sadd.s32 1, %s772_s17   ;;  %s772_s17 = sphi %s806_s17, %s1044_s17   ;;  %s768_s16 = sphi %s804_s16, %s1043_s16   ;;  %s764_s15 = sphi %s802_s15, %s1042_s15  }
   0x3   : > { %s39_s20 = ssub.s32 %s772_s17, %s819_s19  ;;  %s42_s21 = sadd.s32 1, %s768_s16 }
   0x4   : > { %p40_p0 = scmp.eq.s32.totalorder %s39_s20, 0  ;;  %p49_p1 = scmp.ne.s32.totalorder %s768_s16, %s764_s15 }
   0x5   : > { %p50_p2 = scmp.eq.s32.totalorder %s772_s17, 0  ;;  %p645_p4 = scmp.ge.s32.totalorder %s772_s17, 2 }
   0x6   : > { %s828_s22 = scalar_select %p40_p0, %s768_s16, %s42_s21  }
   0x7   : > { %p51_p3 = por %p50_p2, %p49_p1  ;;  %152 = sbr.rel (%p645_p4) target bundleno = 47 (0x2f), region = 28 }
   0xe   : > { %155 = sbr.rel (!%p51_p3) target bundleno = 47 (0x2f), region = 32  ;;  %s157_s23 = sand.u32 (%p51_p3), 1, %s768_s16  }
   0xf   : > { %s659_s24 = sshll.u32 (%p51_p3), %s772_s17, 5  ;;  %s720_s25 = smul.u32 (%p51_p3), 448, %s157_s23 }
  0x10   : > { %s836_s28 = scalar_lea.vmem (%p51_p3), %s1038_s1, %s659_s24 }
  0x11   : > { %v175_v0 = vld [vmem:[%s836_s28] sm:$0xff] (%p51_p3)  ;;  %v177_v1 = vld [vmem:[%s836_s28 + $0x8] sm:$0xff] (%p51_p3)  ;;  %v179_v2 = vld [vmem:[%s836_s28 + $0x10] sm:$0xff] (%p51_p3)  ;;  %s844_s29 = scalar_lea.vmem (%p51_p3), [#allocation2], %s720_s25 }
  0x12   : > { %v181_v3 = vld [vmem:[%s836_s28 + $0x18] sm:$0xff] (%p51_p3)  ;;  %v183_v4 = vld [vmem:[%s836_s28 + $0x40] sm:$0xff] (%p51_p3)  ;;  %v185_v5 = vld [vmem:[%s836_s28 + $0x48] sm:$0xff] (%p51_p3)  ;;  %176 = vst [vmem:[%s844_s29] sm:$0xff] (%p51_p3), %v175_v0 }
  0x13   : > { %178 = vst [vmem:[%s844_s29 + $0x8] sm:$0xff] (%p51_p3), %v177_v1  ;;  %180 = vst [vmem:[%s844_s29 + $0x10] sm:$0xff] (%p51_p3), %v179_v2  ;;  %v187_v6 = vld [vmem:[%s836_s28 + $0x50] sm:$0xff] (%p51_p3)  ;;  %v189_v7 = vld [vmem:[%s836_s28 + $0x58] sm:$0xff] (%p51_p3) }
  0x14   : > { %182 = vst [vmem:[%s844_s29 + $0x18] sm:$0xff] (%p51_p3), %v181_v3  ;;  %184 = vst [vmem:[%s844_s29 + $0x20] sm:$0xff] (%p51_p3), %v183_v4  ;;  %v191_v8 = vld [vmem:[%s836_s28 + $0x80] sm:$0xff] (%p51_p3)  ;;  %v193_v9 = vld [vmem:[%s836_s28 + $0x88] sm:$0xff] (%p51_p3) }
  0x15   : > { %186 = vst [vmem:[%s844_s29 + $0x28] sm:$0xff] %v185_v5  ;;  %188 = vst [vmem:[%s844_s29 + $0x30] sm:$0xff] %v187_v6  ;;  %v195_v10 = vld [vmem:[%s836_s28 + $0x90] sm:$0xff]  ;;  %v197_v11 = vld [vmem:[%s836_s28 + $0x98] sm:$0xff] }
  0x16   : > { %190 = vst [vmem:[%s844_s29 + $0x38] sm:$0xff] %v189_v7  ;;  %192 = vst [vmem:[%s844_s29 + $0x40] sm:$0xff] %v191_v8  ;;  %v199_v12 = vld [vmem:[%s836_s28 + $0xc0] sm:$0xff]  ;;  %v201_v13 = vld [vmem:[%s836_s28 + $0xc8] sm:$0xff] }
  0x17   : > { %194 = vst [vmem:[%s844_s29 + $0x48] sm:$0xff] %v193_v9  ;;  %196 = vst [vmem:[%s844_s29 + $0x50] sm:$0xff] %v195_v10  ;;  %v203_v14 = vld [vmem:[%s836_s28 + $0xd0] sm:$0xff]  ;;  %v205_v15 = vld [vmem:[%s836_s28 + $0xd8] sm:$0xff] }
  0x18   : > { %198 = vst [vmem:[%s844_s29 + $0x58] sm:$0xff] %v197_v11  ;;  %200 = vst [vmem:[%s844_s29 + $0x60] sm:$0xff] %v199_v12  ;;  %v207_v16 = vld [vmem:[%s836_s28 + $0x100] sm:$0xff]  ;;  %v209_v17 = vld [vmem:[%s836_s28 + $0x108] sm:$0xff] }
  0x19   : > { %202 = vst [vmem:[%s844_s29 + $0x68] sm:$0xff] %v201_v13  ;;  %204 = vst [vmem:[%s844_s29 + $0x70] sm:$0xff] %v203_v14  ;;  %v211_v18 = vld [vmem:[%s836_s28 + $0x110] sm:$0xff]  ;;  %v213_v19 = vld [vmem:[%s836_s28 + $0x118] sm:$0xff] }
  0x1a   : > { %206 = vst [vmem:[%s844_s29 + $0x78] sm:$0xff] %v205_v15  ;;  %208 = vst [vmem:[%s844_s29 + $0x80] sm:$0xff] %v207_v16  ;;  %v215_v20 = vld [vmem:[%s836_s28 + $0x140] sm:$0xff]  ;;  %v217_v21 = vld [vmem:[%s836_s28 + $0x148] sm:$0xff] }
  0x1b   : > { %210 = vst [vmem:[%s844_s29 + $0x88] sm:$0xff] %v209_v17  ;;  %212 = vst [vmem:[%s844_s29 + $0x90] sm:$0xff] %v211_v18  ;;  %v219_v22 = vld [vmem:[%s836_s28 + $0x150] sm:$0xff]  ;;  %v221_v23 = vld [vmem:[%s836_s28 + $0x158] sm:$0xff] }
  0x1c   : > { %214 = vst [vmem:[%s844_s29 + $0x98] sm:$0xff] %v213_v19  ;;  %216 = vst [vmem:[%s844_s29 + $0xa0] sm:$0xff] %v215_v20  ;;  %v223_v24 = vld [vmem:[%s836_s28 + $0x180] sm:$0xff]  ;;  %v225_v25 = vld [vmem:[%s836_s28 + $0x188] sm:$0xff] }
  0x1d   : > { %218 = vst [vmem:[%s844_s29 + $0xa8] sm:$0xff] %v217_v21  ;;  %220 = vst [vmem:[%s844_s29 + $0xb0] sm:$0xff] %v219_v22  ;;  %v227_v26 = vld [vmem:[%s836_s28 + $0x190] sm:$0xff]  ;;  %v229_v27 = vld [vmem:[%s836_s28 + $0x198] sm:$0xff] }
  0x1e   : > { %222 = vst [vmem:[%s844_s29 + $0xb8] sm:$0xff] %v221_v23  ;;  %224 = vst [vmem:[%s844_s29 + $0xc0] sm:$0xff] %v223_v24  ;;  %v231_v28 = vld [vmem:[%s836_s28 + $0x1c0] sm:$0xff]  ;;  %v233_v29 = vld [vmem:[%s836_s28 + $0x1c8] sm:$0xff] }
  0x1f   : > { %226 = vst [vmem:[%s844_s29 + $0xc8] sm:$0xff] %v225_v25  ;;  %228 = vst [vmem:[%s844_s29 + $0xd0] sm:$0xff] %v227_v26  ;;  %v235_v30 = vld [vmem:[%s836_s28 + $0x1d0] sm:$0xff]  ;;  %v237_v31 = vld [vmem:[%s836_s28 + $0x1d8] sm:$0xff] }
  0x20   : > { %230 = vst [vmem:[%s844_s29 + $0xd8] sm:$0xff] %v229_v27  ;;  %232 = vst [vmem:[%s844_s29 + $0xe0] sm:$0xff] %v231_v28  ;;  %v239_v32 = vld [vmem:[%s836_s28 + $0x200] sm:$0xff]  ;;  %v241_v33 = vld [vmem:[%s836_s28 + $0x208] sm:$0xff] }
  0x21   : > { %234 = vst [vmem:[%s844_s29 + $0xe8] sm:$0xff] %v233_v29  ;;  %236 = vst [vmem:[%s844_s29 + $0xf0] sm:$0xff] %v235_v30  ;;  %v243_v34 = vld [vmem:[%s836_s28 + $0x210] sm:$0xff]  ;;  %v245_v35 = vld [vmem:[%s836_s28 + $0x218] sm:$0xff] }
  0x22   : > { %238 = vst [vmem:[%s844_s29 + $0xf8] sm:$0xff] %v237_v31  ;;  %240 = vst [vmem:[%s844_s29 + $0x100] sm:$0xff] %v239_v32  ;;  %v247_v36 = vld [vmem:[%s836_s28 + $0x240] sm:$0xff]  ;;  %v249_v37 = vld [vmem:[%s836_s28 + $0x248] sm:$0xff] }
  0x23   : > { %242 = vst [vmem:[%s844_s29 + $0x108] sm:$0xff] %v241_v33  ;;  %244 = vst [vmem:[%s844_s29 + $0x110] sm:$0xff] %v243_v34  ;;  %v251_v38 = vld [vmem:[%s836_s28 + $0x250] sm:$0xff]  ;;  %v253_v39 = vld [vmem:[%s836_s28 + $0x258] sm:$0xff] }
  0x24   : > { %246 = vst [vmem:[%s844_s29 + $0x118] sm:$0xff] %v245_v35  ;;  %248 = vst [vmem:[%s844_s29 + $0x120] sm:$0xff] %v247_v36  ;;  %v255_v40 = vld [vmem:[%s836_s28 + $0x280] sm:$0xff]  ;;  %v257_v41 = vld [vmem:[%s836_s28 + $0x288] sm:$0xff] }
  0x25   : > { %250 = vst [vmem:[%s844_s29 + $0x128] sm:$0xff] %v249_v37  ;;  %252 = vst [vmem:[%s844_s29 + $0x130] sm:$0xff] %v251_v38  ;;  %v259_v42 = vld [vmem:[%s836_s28 + $0x290] sm:$0xff]  ;;  %v261_v43 = vld [vmem:[%s836_s28 + $0x298] sm:$0xff] }
  0x26   : > { %254 = vst [vmem:[%s844_s29 + $0x138] sm:$0xff] %v253_v39  ;;  %256 = vst [vmem:[%s844_s29 + $0x140] sm:$0xff] %v255_v40  ;;  %v263_v44 = vld [vmem:[%s836_s28 + $0x2c0] sm:$0xff]  ;;  %v265_v45 = vld [vmem:[%s836_s28 + $0x2c8] sm:$0xff] }
  0x27   : > { %258 = vst [vmem:[%s844_s29 + $0x148] sm:$0xff] %v257_v41  ;;  %260 = vst [vmem:[%s844_s29 + $0x150] sm:$0xff] %v259_v42  ;;  %v267_v46 = vld [vmem:[%s836_s28 + $0x2d0] sm:$0xff]  ;;  %v269_v47 = vld [vmem:[%s836_s28 + $0x2d8] sm:$0xff] }
  0x28   : > { %262 = vst [vmem:[%s844_s29 + $0x158] sm:$0xff] %v261_v43  ;;  %264 = vst [vmem:[%s844_s29 + $0x160] sm:$0xff] %v263_v44  ;;  %v271_v48 = vld [vmem:[%s836_s28 + $0x300] sm:$0xff]  ;;  %v273_v49 = vld [vmem:[%s836_s28 + $0x308] sm:$0xff] }
  0x29   : > { %266 = vst [vmem:[%s844_s29 + $0x168] sm:$0xff] %v265_v45  ;;  %268 = vst [vmem:[%s844_s29 + $0x170] sm:$0xff] %v267_v46  ;;  %v275_v50 = vld [vmem:[%s836_s28 + $0x310] sm:$0xff]  ;;  %v277_v51 = vld [vmem:[%s836_s28 + $0x318] sm:$0xff] }
  0x2a   : > { %270 = vst [vmem:[%s844_s29 + $0x178] sm:$0xff] %v269_v47  ;;  %272 = vst [vmem:[%s844_s29 + $0x180] sm:$0xff] %v271_v48  ;;  %v279_v52 = vld [vmem:[%s836_s28 + $0x340] sm:$0xff]  ;;  %v281_v53 = vld [vmem:[%s836_s28 + $0x348] sm:$0xff] }
  0x2b   : > { %274 = vst [vmem:[%s844_s29 + $0x188] sm:$0xff] %v273_v49  ;;  %276 = vst [vmem:[%s844_s29 + $0x190] sm:$0xff] %v275_v50  ;;  %v283_v54 = vld [vmem:[%s836_s28 + $0x350] sm:$0xff]  ;;  %v285_v55 = vld [vmem:[%s836_s28 + $0x358] sm:$0xff] }
  0x2c   : > { %278 = vst [vmem:[%s844_s29 + $0x198] sm:$0xff] %v277_v51  ;;  %280 = vst [vmem:[%s844_s29 + $0x1a0] sm:$0xff] %v279_v52 }
  0x2d   : > { %282 = vst [vmem:[%s844_s29 + $0x1a8] sm:$0xff] %v281_v53  ;;  %284 = vst [vmem:[%s844_s29 + $0x1b0] sm:$0xff] %v283_v54 }
  0x2e   : > { %286 = vst [vmem:[%s844_s29 + $0x1b8] sm:$0xff] %v285_v55 }
  0x2f PF: > { %p648_p5 = scmp.ge.s32.totalorder %s772_s17, 1  ;;  %p291_p6 = scmp.lt.s32.totalorder %s772_s17, 3 }
  0x31   : > { %p292_p7 = pnand %p648_p5, %p291_p6 }
  0x32   : > { %s298_s30 = sand.u32 (!%p292_p7), 1, %s764_s15   ;;  %v774_v56 = vmov (!%p292_p7), 0.0   ;;  %v546_v57 = vld [vmem:[%s1039_s2] sm:$0xf] (!%p292_p7)  ;;  %v775_v58 = vmov (!%p292_p7), 0   ;;  %vm391_vm0 = vcmask (!%p292_p7), 1043456  }
  0x33   : > { %295 = sbr.rel (%p292_p7) target bundleno = 310 (0x136), region = 55  ;;  %468 = vmatprep.mubr.f32.mxu0 (!%p292_p7), %v774_v56  ;;  %539 = vmatprep.mubr.f32.mxu1 (!%p292_p7), %v774_v56  ;;  %v556_v59 = vld [vmem:[%s1040_s3] sm:$0xf] (!%p292_p7)  ;;  %vm776_vm1 = vmmov (!%p292_p7), 1   ;;  %vm387_vm3 = vcmask (!%p292_p7), 883712   ;;  %s649_s13 = sshll.u32 (!%p292_p7), %s642_s18, 2 }
  0x34   : > { %s721_s5 = smul.u32 (!%p292_p7), 448, %s298_s30  ;;  %749 = vset.pattern.permute.xlu0 (!%p292_p7), %v775_v58  ;;  %vm685_vm2 = vmpackc.low (!%p292_p7), %vm391_vm0, %vm776_vm1  ;;  %p325_p8 = scmp.lt.s32.totalorder (!%p292_p7), %s649_s13, 7 }
  0x35   : > { %549 = vperm.xlu0 (!%p292_p7), %749, %v546_v57  }
  0x36   : > { %s961_s10 = scalar_lea.vmem (!%p292_p7), [#allocation2], %s721_s5 }
  0x37   : > { %v332_v60 = vld [vmem:[%s961_s10 + $0x8] sm:$0xff] (!%p292_p7)  ;;  %v334_v62 = vld [vmem:[%s961_s10 + $0x18] sm:$0xff] (!%p292_p7)  ;;  %v331_v1 = vld [vmem:[%s961_s10] sm:$0xff] (!%p292_p7) }
  0x38   : > { %v336_v61 = vld [vmem:[%s961_s10 + $0x28] sm:$0xff] (!%p292_p7)  ;;  %v338_v0 = vld [vmem:[%s961_s10 + $0x38] sm:$0xff] (!%p292_p7)  ;;  %v335_v2 = vld [vmem:[%s961_s10 + $0x20] sm:$0xff] (!%p292_p7) }
  0x39   : > { %v660_v63 = vpack.c.bf16 (!%p292_p7), %v336_v61, %v332_v60  ;;  %v690_v3 = vpack.c.bf16 (!%p292_p7), %v338_v0, %v334_v62  ;;  %v662_v4 = vpack.c.bf16 (!%p292_p7), %v335_v2, %v331_v1  ;;  %v333_v5 = vld [vmem:[%s961_s10 + $0x10] sm:$0xff] (!%p292_p7)  ;;  %v340_v7 = vld [vmem:[%s961_s10 + $0x48] sm:$0xff] (!%p292_p7)  ;;  %v342_v10 = vld [vmem:[%s961_s10 + $0x58] sm:$0xff] (!%p292_p7)  ;;  %559 = vperm.xlu0 (!%p292_p7), %749, %v556_v59  }
  0x3a   : > { %v337_v6 = vld [vmem:[%s961_s10 + $0x30] sm:$0xff]  ;;  %v344_v9 = vld [vmem:[%s961_s10 + $0x68] sm:$0xff]  ;;  %v346_v11 = vld [vmem:[%s961_s10 + $0x78] sm:$0xff]  ;;  %s1046_s13 = smov (!%p325_p8, %s649_s13), 7 }
  0x3b   : > { %661 = vmatprep.subr.bf16.mxu0 %v660_v63  ;;  %v692_v8 = vpack.c.bf16 %v337_v6, %v333_v5  ;;  %691 = vmatprep.subr.bf16.mxu1 %v690_v3  ;;  %v664_v12 = vpack.c.bf16 %v344_v9, %v340_v7  ;;  %v694_v13 = vpack.c.bf16 %v346_v11, %v342_v10  ;;  %v339_v14 = vld [vmem:[%s961_s10 + $0x40] sm:$0xff]  ;;  %v341_v16 = vld [vmem:[%s961_s10 + $0x50] sm:$0xff]  ;;  %v348_v19 = vld [vmem:[%s961_s10 + $0x88] sm:$0xff]  ;;  %s650_s14 = sshll.u32 %s1046_s13, 2 }
  0x3c   : > { %663 = vmatpush1.bf16.msra.mxu0 %v662_v4  ;;  %v343_v15 = vld [vmem:[%s961_s10 + $0x60] sm:$0xff]  ;;  %v345_v18 = vld [vmem:[%s961_s10 + $0x70] sm:$0xff]  ;;  %v352_v20 = vld [vmem:[%s961_s10 + $0xa8] sm:$0xff]  ;;  %s328_s18 = scalar_lea.vmem %s1041_s4, %s650_s14 }
  0x3d   : > { %693 = vmatpush1.bf16.msra.mxu1 %v692_v8  ;;  %v666_v17 = vpack.c.bf16 %v343_v15, %v339_v14  ;;  %665 = vmatprep.subr.bf16.mxu0 %v664_v12  ;;  %v696_v21 = vpack.c.bf16 %v345_v18, %v341_v16  ;;  %v668_v22 = vpack.c.bf16 %v352_v20, %v348_v19  ;;  %v350_v23 = vld [vmem:[%s961_s10 + $0x98] sm:$0xff]  ;;  %v347_v25 = vld [vmem:[%s961_s10 + $0x80] sm:$0xff]  ;;  %v349_v28 = vld [vmem:[%s961_s10 + $0x90] sm:$0xff] }
  0x3e   : > { %695 = vmatprep.subr.bf16.mxu1 %v694_v13  ;;  %v354_v24 = vld [vmem:[%s961_s10 + $0xb8] sm:$0xff]  ;;  %v351_v27 = vld [vmem:[%s961_s10 + $0xa0] sm:$0xff]  ;;  %v353_v29 = vld [vmem:[%s961_s10 + $0xb0] sm:$0xff] }
  0x3f   : > { %v698_v26 = vpack.c.bf16 %v354_v24, %v350_v23  ;;  %v670_v30 = vpack.c.bf16 %v351_v27, %v347_v25  ;;  %v356_v31 = vld [vmem:[%s961_s10 + $0xc8] sm:$0xff]  ;;  %v358_v33 = vld [vmem:[%s961_s10 + $0xd8] sm:$0xff]  ;;  %v700_v34 = vpack.c.bf16 %v353_v29, %v349_v28  ;;  %v355_v37 = vld [vmem:[%s961_s10 + $0xc0] sm:$0xff] }
  0x40   : > { %667 = vmatpush1.bf16.msra.mxu0 %v666_v17  ;;  %v360_v32 = vld [vmem:[%s961_s10 + $0xe8] sm:$0xff]  ;;  %v362_v36 = vld [vmem:[%s961_s10 + $0xf8] sm:$0xff]  ;;  %v359_v38 = vld [vmem:[%s961_s10 + $0xe0] sm:$0xff] }
  0x41   : > { %697 = vmatpush1.bf16.msra.mxu1 %v696_v21  ;;  %669 = vmatprep.subr.bf16.mxu0 %v668_v22  ;;  %v672_v35 = vpack.c.bf16 %v360_v32, %v356_v31  ;;  %v702_v39 = vpack.c.bf16 %v362_v36, %v358_v33  ;;  %v357_v40 = vld [vmem:[%s961_s10 + $0xd0] sm:$0xff]  ;;  %v364_v42 = vld [vmem:[%s961_s10 + $0x108] sm:$0xff]  ;;  %v366_v44 = vld [vmem:[%s961_s10 + $0x118] sm:$0xff]  ;;  %v674_v46 = vpack.c.bf16 %v359_v38, %v355_v37 }
  0x42   : > { %699 = vmatprep.subr.bf16.mxu1 %v698_v26  ;;  %v361_v41 = vld [vmem:[%s961_s10 + $0xf0] sm:$0xff]  ;;  %v368_v43 = vld [vmem:[%s961_s10 + $0x128] sm:$0xff]  ;;  %v370_v45 = vld [vmem:[%s961_s10 + $0x138] sm:$0xff] }
  0x43   : > { %v704_v47 = vpack.c.bf16 %v361_v41, %v357_v40  ;;  %v676_v48 = vpack.c.bf16 %v368_v43, %v364_v42  ;;  %v363_v49 = vld [vmem:[%s961_s10 + $0x100] sm:$0xff]  ;;  %v365_v51 = vld [vmem:[%s961_s10 + $0x110] sm:$0xff]  ;;  %v706_v52 = vpack.c.bf16 %v370_v45, %v366_v44  ;;  %v372_v54 = vld [vmem:[%s961_s10 + $0x148] sm:$0xff] }
  0x44   : > { %671 = vmatpush1.bf16.msra.mxu0 %v670_v30  ;;  %v367_v50 = vld [vmem:[%s961_s10 + $0x120] sm:$0xff]  ;;  %v369_v53 = vld [vmem:[%s961_s10 + $0x130] sm:$0xff]  ;;  %v376_v55 = vld [vmem:[%s961_s10 + $0x168] sm:$0xff] }
  0x45   : > { %701 = vmatpush1.bf16.msra.mxu1 %v700_v34  ;;  %673 = vmatprep.subr.bf16.mxu0 %v672_v35  ;;  %v374_v56 = vld [vmem:[%s961_s10 + $0x158] sm:$0xff]  ;;  %v678_v58 = vpack.c.bf16 %v367_v50, %v363_v49  ;;  %v708_v59 = vpack.c.bf16 %v369_v53, %v365_v51  ;;  %v680_v60 = vpack.c.bf16 %v376_v55, %v372_v54  ;;  %v371_v61 = vld [vmem:[%s961_s10 + $0x140] sm:$0xff]  ;;  %v373_v63 = vld [vmem:[%s961_s10 + $0x150] sm:$0xff] }
  0x46   : > { %703 = vmatprep.subr.bf16.mxu1 %v702_v39  ;;  %v378_v57 = vld [vmem:[%s961_s10 + $0x178] sm:$0xff]  ;;  %v375_v62 = vld [vmem:[%s961_s10 + $0x160] sm:$0xff]  ;;  %v377_v1 = vld [vmem:[%s961_s10 + $0x170] sm:$0xff] }
  0x47   : > { %v710_v0 = vpack.c.bf16 %v378_v57, %v374_v56  ;;  %v380_v2 = vld [vmem:[%s961_s10 + $0x188] sm:$0xff]  ;;  %v382_v4 = vld [vmem:[%s961_s10 + $0x198] sm:$0xff]  ;;  %v682_v6 = vpack.c.bf16 %v375_v62, %v371_v61  ;;  %v712_v7 = vpack.c.bf16 %v377_v1, %v373_v63  ;;  %v379_v9 = vld [vmem:[%s961_s10 + $0x180] sm:$0xff] }
  0x48   : > { %675 = vmatpush1.bf16.msra.mxu0 %v674_v46  ;;  %v384_v3 = vld [vmem:[%s961_s10 + $0x1a8] sm:$0xf]  ;;  %v386_v5 = vld [vmem:[%s961_s10 + $0x1b8] sm:$0xf]  ;;  %v383_v10 = vld [vmem:[%s961_s10 + $0x1a0] sm:$0xf] }
  0x49   : > { %705 = vmatpush1.bf16.msra.mxu1 %v704_v47  ;;  %677 = vmatprep.subr.bf16.mxu0 %v676_v48  ;;  %v684_v8 = vpack.c.bf16 %v384_v3, %v380_v2  ;;  %v714_v11 = vpack.c.bf16 %v386_v5, %v382_v4  ;;  %v381_v12 = vld [vmem:[%s961_s10 + $0x190] sm:$0xff]  ;;  %v687_v14 = vpack.c.bf16 %v383_v10, %v379_v9  ;;  %v330_v16 = vld [vmem:[%s1037_s0] sm:$0xf] }
  0x4a   : > { %707 = vmatprep.subr.bf16.mxu1 %v706_v52  ;;  %v385_v13 = vld [vmem:[%s961_s10 + $0x1b0] sm:$0xf] }
  0x4b   : > { %v717_v15 = vpack.c.bf16 %v385_v13, %v381_v12 }
  0x4c   : > { %679 = vmatpush1.bf16.msra.mxu0 %v678_v58 }
  0x4d   : > { %709 = vmatpush1.bf16.msra.mxu1 %v708_v59  ;;  %681 = vmatprep.subr.bf16.mxu0 %v680_v60 }
  0x4e   : > { %711 = vmatprep.subr.bf16.mxu1 %v710_v0 }
  0x50   : > { %683 = vmatpush1.bf16.msra.mxu0 %v682_v6 }
  0x51   : > { %713 = vmatpush1.bf16.msra.mxu1 %v712_v7  ;;  %686 = vmatprep.subr.msk.bf16.mxu0 %vm685_vm2, %v684_v8 }
  0x52   : > { %716 = vmatprep.subr.msk.bf16.mxu1 %vm685_vm2, %v714_v11 }
  0x54   : > { %689 = vmatpush1.bf16.msk.msra.mxu0 %vm685_vm2, %v687_v14 }
  0x55   : > { %719 = vmatpush1.bf16.msk.msra.mxu1 %vm685_vm2, %v717_v15 }
  0x57   : > { %653 = vmatmul.mubr.msk.f32.vlgmr.msra.gmra.mrb[0].mxu0 %vm387_vm3, %v330_v16 }
  0x58   : > { %656 = vmatmul.mubr.msk.f32.vlgmr.msra.gmra.mrb[0].mxu1 %vm387_vm3, %v330_v16 }
  0xb4   : > { %v550_v17 = vpop.permute.xlu0 %549 }
  0xb8   : > { %v560_v22 = vpop.permute.xlu0 %559 }
 0x12a   : > { %v470_v18 = vpop.f32.mrb[0].mxu0 }
 0x12b   : > { %v552_v19 = vmul.f32 %v550_v17, %v470_v18  ;;  %v541_v20 = vpop.f32.mrb[0].mxu1  ;;  %v472_v21 = vpop.f32.mrb[1].mxu0 }
 0x12c   : > { %v554_v23 = vmul.f32 %v550_v17, %v541_v20  ;;  %v553_v24 = vmul.f32 %v550_v17, %v472_v21  ;;  %v543_v25 = vpop.f32.mrb[1].mxu1 }
 0x12d   : > { %v562_v26 = vadd.f32 %v560_v22, %v552_v19  ;;  %v555_v27 = vmul.f32 %v550_v17, %v543_v25 }
 0x12e   : > { %v564_v28 = vadd.f32 %v560_v22, %v554_v23  ;;  %v563_v29 = vadd.f32 %v560_v22, %v553_v24 }
 0x12f   : > { %v566_v30 = vmax.f32 %v562_v26, 0.0  ;;  %v565_v31 = vadd.f32 %v560_v22, %v555_v27 }
 0x130   : > { %v568_v32 = vmax.f32 %v564_v28, 0.0  ;;  %v567_v33 = vmax.f32 %v563_v29, 0.0 }
 0x131   : > { %v569_v34 = vmax.f32 %v565_v31, 0.0 }
 0x132   : > { %v574_v35 = vcombine.low %v566_v30, %v567_v33 }
 0x133   : > { %v575_v36 = vcombine.low %v568_v32, %v569_v34 }
 0x134   : > { %578 = vst [vmem:[%s328_s18] sm:$0xff] %v574_v35 }
 0x135   : > { %579 = vst [vmem:[%s328_s18 + $0x8] sm:$0xff] %v575_v36 }
 0x136 PF: > { %p11_p9 = scmp.ge.s32.totalorder %s819_s19, 4   ;;  %s1042_s15 = smov %s768_s16 }
 0x137   : > { %s1043_s16 = smov %s828_s22  ;;  %s1044_s17 = smov %s819_s19 }
 0x138   :  { %13 = sbr.rel (!%p11_p9) target bundleno = 2 (0x2), region = 94 }

// kernel: _lambda_.16
= control target key start
LH: loop header
LB: loop body
LE: loop exit
PB: predicated region body
PF: predicated region fallthrough
CT: control target
= control target key end

     0   :  { %v206_v0 = vmov 0.0|0.0   ;;  %vm207_vm0 = vmmov 0   ;;  %v208_v6 = vmov 0.0   ;;  %v209_v7 = vmov 0   ;;  %s290_s1 = inlined_call_operand.vmem [shape: f32[108,128], index: 1, kind: input, shape index: {}]   ;;  %s291_s2 = inlined_call_operand.vmem [shape: f32[8,1], index: 2, kind: input, shape index: {}]   ;;  %s292_s3 = inlined_call_operand.vmem [shape: f32[8,1], index: 3, kind: input, shape index: {}]   ;;  %s293_s0 = inlined_call_operand.vmem [shape: f32[8,108], index: 0, kind: input, shape index: {}]   ;;  %s294_s4 = inlined_call_operand.vmem [shape: f32[8,128], index: 4, kind: output, shape index: {}]  }
   0x1   :  { %178 = vmatprep.subr.bf16.mxu0 %v206_v0  ;;  %v18_v1 = vld [vmem:[%s290_s1] sm:$0xff]  ;;  %v19_v2 = vld [vmem:[%s290_s1 + $0x8] sm:$0xff]  ;;  %v20_v3 = vld [vmem:[%s290_s1 + $0x10] sm:$0xff]  ;;  %175 = vmatprep.mubr.msk.f32.mxu0 %vm207_vm0, %v208_v6  ;;  %vm36_vm1 = vcmask 1043456   ;;  %vm210_vm2 = vmmov 1   ;;  %vm32_vm4 = vcmask 883712  }
   0x2   :  { %v179_v4 = vpack.c.bf16 %v19_v2, %v18_v1  ;;  %v21_v5 = vld [vmem:[%s290_s1 + $0x18] sm:$0xff]  ;;  %205 = vset.pattern.permute.xlu0 %v209_v7  ;;  %v22_v9 = vld [vmem:[%s290_s1 + $0x20] sm:$0xff]  ;;  %v23_v10 = vld [vmem:[%s290_s1 + $0x28] sm:$0xff] }
   0x3   :  { %v182_v8 = vpack.c.bf16 %v21_v5, %v20_v3  ;;  %v110_v11 = vld [vmem:[%s291_s2] sm:$0xff]  ;;  %v185_v12 = vpack.c.bf16 %v23_v10, %v22_v9  ;;  %v24_v14 = vld [vmem:[%s290_s1 + $0x30] sm:$0xff]  ;;  %v25_v15 = vld [vmem:[%s290_s1 + $0x38] sm:$0xff] }
   0x4   :  { %180 = vmatpush3.bf16.msra.mxu0 %v179_v4  ;;  %113 = vperm.xlu0 %205, %v110_v11   ;;  %v117_v13 = vld [vmem:[%s292_s3] sm:$0xff]  ;;  %v188_v16 = vpack.c.bf16 %v25_v15, %v24_v14  ;;  %v27_v18 = vld [vmem:[%s290_s1 + $0x48] sm:$0xff]  ;;  %v28_v20 = vld [vmem:[%s290_s1 + $0x50] sm:$0xff] }
   0x5   :  { %181 = vmatprep.subr.bf16.mxu0 %v206_v0  ;;  %v26_v17 = vld [vmem:[%s290_s1 + $0x40] sm:$0xff]  ;;  %v29_v21 = vld [vmem:[%s290_s1 + $0x58] sm:$0xff]  ;;  %v31_v24 = vld [vmem:[%s290_s1 + $0x68] sm:$0xf] }
   0x6   :  { %v191_v19 = vpack.c.bf16 %v27_v18, %v26_v17  ;;  %v194_v22 = vpack.c.bf16 %v29_v21, %v28_v20  ;;  %v30_v23 = vld [vmem:[%s290_s1 + $0x60] sm:$0xff]  ;;  %vm198_vm3 = vmpackc.low %vm36_vm1, %vm210_vm2 }
   0x7   :  { %v197_v25 = vpack.c.bf16 %v31_v24, %v30_v23  ;;  %v17_v26 = vld [vmem:[%s293_s0] sm:$0xff] }
   0x8   :  { %183 = vmatpush3.bf16.msra.mxu0 %v182_v8  ;;  %120 = vperm.xlu0 %205, %v117_v13  }
   0x9   :  { %184 = vmatprep.subr.bf16.mxu0 %v206_v0 }
   0xc   :  { %186 = vmatpush3.bf16.msra.mxu0 %v185_v12 }
   0xd   :  { %187 = vmatprep.subr.bf16.mxu0 %v206_v0 }
  0x10   :  { %189 = vmatpush3.bf16.msra.mxu0 %v188_v16 }
  0x11   :  { %190 = vmatprep.subr.bf16.mxu0 %v206_v0 }
  0x14   :  { %192 = vmatpush3.bf16.msra.mxu0 %v191_v19 }
  0x15   :  { %193 = vmatprep.subr.bf16.mxu0 %v206_v0 }
  0x18   :  { %195 = vmatpush3.bf16.msra.mxu0 %v194_v22 }
  0x19   :  { %196 = vmatprep.subr.bf16.mxu0 %v206_v0 }
  0x1c   :  { %199 = vmatpush3.bf16.msk.msra.mxu0 %vm198_vm3, %v197_v25 }
  0x1f   :  { %176 = vmatmul.mubr.msk.f32.vlgmr.msra.gmra.mrb[0].mxu0 %vm32_vm4, %v17_v26 }
  0x83   :  { %v114_v27 = vpop.permute.xlu0 %113 }
  0x87   :  { %v121_v31 = vpop.permute.xlu0 %120 }
  0xf2   :  { %v106_v28 = vpop.f32.mrb[0].mxu0 }
  0xf3   :  { %v116_v29 = vmul.f32 %v114_v27, %v106_v28  ;;  %v177_v30 = vpop.f32.mrb[1].mxu0 }
  0xf5   :  { %v123_v32 = vadd.f32 %v121_v31, %v116_v29 }
  0xf7   :  { %v124_v33 = vmax.f32 %v123_v32, 0.0 }
  0xf9   :  { %125 = vst [vmem:[%s294_s4] sm:$0xff] %v124_v33 }

// kernel: _lambda_.17
= control target key start
LH: loop header
LB: loop body
LE: loop exit
PB: predicated region body
PF: predicated region fallthrough
CT: control target
= control target key end

     0   :  { %v184_v0 = vmov 0.0|0.0   ;;  %v185_v4 = vmov 0   ;;  %vm46_vm0 = vcmask 719872   ;;  %v186_v44 = vmov 0.0   ;;  %s321_s1 = inlined_call_operand.vmem [shape: f32[216,128], index: 1, kind: input, shape index: {}]   ;;  %s322_s0 = inlined_call_operand.vmem [shape: f32[8,216], index: 0, kind: input, shape index: {}]   ;;  %s323_s2 = inlined_call_operand.vmem [shape: f32[8,1], index: 2, kind: input, shape index: {}]   ;;  %s324_s3 = inlined_call_operand.vmem [shape: f32[8,1], index: 3, kind: input, shape index: {}]   ;;  %s325_s4 = inlined_call_operand.vmem [shape: f32[8,128], index: 4, kind: output, shape index: {}]  }
   0x1   :  { %141 = vmatprep.subr.bf16.mxu0 %v184_v0  ;;  %v19_v1 = vld [vmem:[%s321_s1] sm:$0xff]  ;;  %v20_v2 = vld [vmem:[%s321_s1 + $0x8] sm:$0xff]  ;;  %v21_v3 = vld [vmem:[%s321_s1 + $0x10] sm:$0xff]  ;;  %183 = vset.pattern.permute.xlu0 %v185_v4 }
   0x2   :  { %v142_v5 = vpack.c.bf16 %v20_v2, %v19_v1  ;;  %v22_v6 = vld [vmem:[%s321_s1 + $0x18] sm:$0xff]  ;;  %v23_v8 = vld [vmem:[%s321_s1 + $0x20] sm:$0xff]  ;;  %v24_v9 = vld [vmem:[%s321_s1 + $0x28] sm:$0xff] }
   0x3   :  { %v145_v7 = vpack.c.bf16 %v22_v6, %v21_v3  ;;  %v148_v10 = vpack.c.bf16 %v24_v9, %v23_v8  ;;  %v25_v11 = vld [vmem:[%s321_s1 + $0x30] sm:$0xff]  ;;  %v26_v12 = vld [vmem:[%s321_s1 + $0x38] sm:$0xff]  ;;  %v18_v13 = vld [vmem:[%s322_s0 + $0x8] sm:$0xff] }
   0x4   :  { %143 = vmatpush1.bf16.msra.mxu0 %v142_v5  ;;  %v120_v14 = vld [vmem:[%s323_s2] sm:$0xff]  ;;  %140 = vmatprep.mubr.msk.f32.mxu0 %vm46_vm0, %v18_v13  ;;  %v151_v15 = vpack.c.bf16 %v26_v12, %v25_v11  ;;  %v28_v18 = vld [vmem:[%s321_s1 + $0x48] sm:$0xff]  ;;  %v29_v20 = vld [vmem:[%s321_s1 + $0x50] sm:$0xff] }
   0x5   :  { %144 = vmatprep.subr.bf16.mxu0 %v184_v0  ;;  %123 = vperm.xlu0 %183, %v120_v14   ;;  %v127_v16 = vld [vmem:[%s324_s3] sm:$0xff]  ;;  %v30_v21 = vld [vmem:[%s321_s1 + $0x58] sm:$0xff]  ;;  %v32_v24 = vld [vmem:[%s321_s1 + $0x68] sm:$0xff] }
   0x6   :  { %v27_v17 = vld [vmem:[%s321_s1 + $0x40] sm:$0xff]  ;;  %v157_v22 = vpack.c.bf16 %v30_v21, %v29_v20  ;;  %v33_v26 = vld [vmem:[%s321_s1 + $0x70] sm:$0xff]  ;;  %v34_v27 = vld [vmem:[%s321_s1 + $0x78] sm:$0xff] }
   0x7   :  { %v154_v19 = vpack.c.bf16 %v28_v18, %v27_v17  ;;  %v31_v23 = vld [vmem:[%s321_s1 + $0x60] sm:$0xff]  ;;  %v163_v28 = vpack.c.bf16 %v34_v27, %v33_v26  ;;  %v36_v30 = vld [vmem:[%s321_s1 + $0x88] sm:$0xff]  ;;  %v37_v32 = vld [vmem:[%s321_s1 + $0x90] sm:$0xff] }
   0x8   :  { %146 = vmatpush1.bf16.msra.mxu0 %v145_v7  ;;  %v160_v25 = vpack.c.bf16 %v32_v24, %v31_v23  ;;  %v35_v29 = vld [vmem:[%s321_s1 + $0x80] sm:$0xff]  ;;  %v38_v33 = vld [vmem:[%s321_s1 + $0x98] sm:$0xff]  ;;  %v40_v36 = vld [vmem:[%s321_s1 + $0xa8] sm:$0xff] }
   0x9   :  { %147 = vmatprep.subr.bf16.mxu0 %v184_v0  ;;  %130 = vperm.xlu0 %183, %v127_v16   ;;  %v166_v31 = vpack.c.bf16 %v36_v30, %v35_v29  ;;  %v169_v34 = vpack.c.bf16 %v38_v33, %v37_v32  ;;  %v39_v35 = vld [vmem:[%s321_s1 + $0xa0] sm:$0xff]  ;;  %v41_v38 = vld [vmem:[%s321_s1 + $0xb0] sm:$0xff]  ;;  %v42_v39 = vld [vmem:[%s321_s1 + $0xb8] sm:$0xff] }
   0xa   :  { %v172_v37 = vpack.c.bf16 %v40_v36, %v39_v35  ;;  %v175_v40 = vpack.c.bf16 %v42_v39, %v41_v38  ;;  %v43_v41 = vld [vmem:[%s321_s1 + $0xc0] sm:$0xff]  ;;  %v44_v42 = vld [vmem:[%s321_s1 + $0xc8] sm:$0xff]  ;;  %v45_v45 = vld [vmem:[%s321_s1 + $0xd0] sm:$0xff] }
   0xb   :  { %v178_v43 = vpack.c.bf16 %v44_v42, %v43_v41  ;;  %v17_v46 = vld [vmem:[%s322_s0] sm:$0xff] }
   0xc   :  { %149 = vmatpush1.bf16.msra.mxu0 %v148_v10 }
   0xd   :  { %150 = vmatprep.subr.bf16.mxu0 %v184_v0 }
  0x10   :  { %152 = vmatpush1.bf16.msra.mxu0 %v151_v15 }
  0x11   :  { %153 = vmatprep.subr.bf16.mxu0 %v184_v0 }
  0x14   :  { %155 = vmatpush1.bf16.msra.mxu0 %v154_v19 }
  0x15   :  { %156 = vmatprep.subr.bf16.mxu0 %v184_v0 }
  0x18   :  { %158 = vmatpush1.bf16.msra.mxu0 %v157_v22 }
  0x19   :  { %159 = vmatprep.subr.bf16.mxu0 %v184_v0 }
  0x1c   :  { %161 = vmatpush1.bf16.msra.mxu0 %v160_v25 }
  0x1d   :  { %162 = vmatprep.subr.bf16.mxu0 %v184_v0 }
  0x20   :  { %164 = vmatpush1.bf16.msra.mxu0 %v163_v28 }
  0x21   :  { %165 = vmatprep.subr.bf16.mxu0 %v184_v0 }
  0x24   :  { %167 = vmatpush1.bf16.msra.mxu0 %v166_v31 }
  0x25   :  { %168 = vmatprep.subr.bf16.mxu0 %v184_v0 }
  0x28   :  { %170 = vmatpush1.bf16.msra.mxu0 %v169_v34 }
  0x29   :  { %171 = vmatprep.subr.bf16.mxu0 %v184_v0 }
  0x2c   :  { %173 = vmatpush1.bf16.msra.mxu0 %v172_v37 }
  0x2d   :  { %174 = vmatprep.subr.bf16.mxu0 %v184_v0 }
  0x30   :  { %176 = vmatpush1.bf16.msra.mxu0 %v175_v40 }
  0x31   :  { %177 = vmatprep.subr.bf16.mxu0 %v184_v0 }
  0x34   :  { %179 = vmatpush1.bf16.msra.mxu0 %v178_v43 }
  0x35   :  { %102 = vmatprep.subr.mxu0 %v186_v44 }
  0x38   :  { %103 = vmatpush1.msra.mxu0 %v45_v45 }
  0x39   :  { %115 = vmatmul.mubr.f32.vlgmr.msra.gmra.mrb[0].mxu0 %v17_v46 }
  0x84   :  { %v124_v47 = vpop.permute.xlu0 %123 }
  0x88   :  { %v131_v51 = vpop.permute.xlu0 %130 }
 0x10c   :  { %v116_v48 = vpop.f32.mrb[0].mxu0 }
 0x10d   :  { %v126_v49 = vmul.f32 %v124_v47, %v116_v48  ;;  %v118_v50 = vpop.f32.mrb[1].mxu0 }
 0x10f   :  { %v133_v52 = vadd.f32 %v131_v51, %v126_v49 }
 0x111   :  { %v134_v53 = vmax.f32 %v133_v52, 0.0 }
 0x113   :  { %135 = vst [vmem:[%s325_s4] sm:$0xff] %v134_v53 }

// kernel: _lambda_.18
= control target key start
LH: loop header
LB: loop body
LE: loop exit
PB: predicated region body
PF: predicated region fallthrough
CT: control target
= control target key end

     0   :  { %v241_v0 = vmov 0.0|0.0   ;;  %v242_v6 = vmov 0   ;;  %vm48_vm0 = vcmask 719872   ;;  %v243_v47 = vmov 0.0   ;;  %s406_s1 = inlined_call_operand.vmem [shape: f32[216,16], index: 1, kind: input, shape index: {}]   ;;  %s407_s0 = inlined_call_operand.vmem [shape: f32[16,216], index: 0, kind: input, shape index: {}]   ;;  %s408_s2 = inlined_call_operand.vmem [shape: f32[16,1], index: 2, kind: input, shape index: {}]   ;;  %s409_s3 = inlined_call_operand.vmem [shape: f32[16,1], index: 3, kind: input, shape index: {}]   ;;  %s410_s4 = inlined_call_operand.vmem [shape: f32[16,16], index: 4, kind: output, shape index: {}]  }
   0x1   :  { %169 = vmatprep.subr.bf16.mxu0 %v241_v0  ;;  %208 = vmatprep.subr.bf16.mxu1 %v241_v0  ;;  %v21_v1 = vld [vmem:[%s406_s1] sm:$0xff]  ;;  %v22_v2 = vld [vmem:[%s406_s1 + $0x8] sm:$0xff]  ;;  %v23_v3 = vld [vmem:[%s406_s1 + $0x10] sm:$0xff]  ;;  %vm160_vm1 = vcmask 130048  }
   0x2   :  { %v170_v4 = vpack.c.bf16 %v22_v2, %v21_v1  ;;  %v24_v5 = vld [vmem:[%s406_s1 + $0x18] sm:$0xff]  ;;  %239 = vset.pattern.permute.xlu0 %v242_v6  ;;  %240 = vset.pattern.permute.xlu1 %v242_v6  ;;  %v25_v8 = vld [vmem:[%s406_s1 + $0x20] sm:$0xff]  ;;  %v26_v9 = vld [vmem:[%s406_s1 + $0x28] sm:$0xff] }
   0x3   :  { %v173_v7 = vpack.c.bf16 %v24_v5, %v23_v3  ;;  %v176_v10 = vpack.c.bf16 %v26_v9, %v25_v8  ;;  %v27_v11 = vld [vmem:[%s406_s1 + $0x30] sm:$0xff]  ;;  %v28_v12 = vld [vmem:[%s406_s1 + $0x38] sm:$0xff]  ;;  %v18_v13 = vld [vmem:[%s407_s0 + $0x8] sm:$0xff] }
   0x4   :  { %171 = vmatpush1.bf16.msra.mxu0 %v170_v4  ;;  %222 = vmatpush1.bf16.msra.mxu1 %v170_v4  ;;  %v20_v14 = vld [vmem:[%s407_s0 + $0x18] sm:$0xff]  ;;  %v130_v15 = vld [vmem:[%s408_s2] sm:$0xff]  ;;  %v179_v17 = vpack.c.bf16 %v28_v12, %v27_v11  ;;  %v30_v19 = vld [vmem:[%s406_s1 + $0x48] sm:$0xff] }
   0x5   :  { %172 = vmatprep.subr.bf16.mxu0 %v241_v0  ;;  %209 = vmatprep.subr.bf16.mxu1 %v241_v0  ;;  %v144_v16 = vld [vmem:[%s409_s3] sm:$0xff]  ;;  %v131_v20 = vld [vmem:[%s408_s2 + $0x8] sm:$0xff]  ;;  %v31_v23 = vld [vmem:[%s406_s1 + $0x50] sm:$0xff] }
   0x6   :  { %167 = vmatprep.mubr.msk.f32.mxu0 %vm48_vm0, %v18_v13  ;;  %168 = vmatprep.mubr.msk.f32.mxu1 %vm48_vm0, %v20_v14  ;;  %v29_v18 = vld [vmem:[%s406_s1 + $0x40] sm:$0xff]  ;;  %v145_v21 = vld [vmem:[%s409_s3 + $0x8] sm:$0xff]  ;;  %v32_v24 = vld [vmem:[%s406_s1 + $0x58] sm:$0xff] }
   0x7   :  { %134 = vperm.xlu0 %239, %v130_v15   ;;  %148 = vperm.xlu1 %240, %v144_v16   ;;  %v182_v22 = vpack.c.bf16 %v30_v19, %v29_v18  ;;  %v185_v25 = vpack.c.bf16 %v32_v24, %v31_v23  ;;  %v33_v26 = vld [vmem:[%s406_s1 + $0x60] sm:$0xff]  ;;  %v34_v27 = vld [vmem:[%s406_s1 + $0x68] sm:$0xff]  ;;  %v35_v29 = vld [vmem:[%s406_s1 + $0x70] sm:$0xff] }
   0x8   :  { %174 = vmatpush1.bf16.msra.mxu0 %v173_v7  ;;  %223 = vmatpush1.bf16.msra.mxu1 %v173_v7  ;;  %v188_v28 = vpack.c.bf16 %v34_v27, %v33_v26  ;;  %v36_v30 = vld [vmem:[%s406_s1 + $0x78] sm:$0xff]  ;;  %v37_v32 = vld [vmem:[%s406_s1 + $0x80] sm:$0xff]  ;;  %v38_v33 = vld [vmem:[%s406_s1 + $0x88] sm:$0xff] }
   0x9   :  { %175 = vmatprep.subr.bf16.mxu0 %v241_v0  ;;  %210 = vmatprep.subr.bf16.mxu1 %v241_v0  ;;  %v191_v31 = vpack.c.bf16 %v36_v30, %v35_v29  ;;  %v194_v34 = vpack.c.bf16 %v38_v33, %v37_v32  ;;  %v39_v35 = vld [vmem:[%s406_s1 + $0x90] sm:$0xff]  ;;  %v40_v36 = vld [vmem:[%s406_s1 + $0x98] sm:$0xff]  ;;  %v41_v38 = vld [vmem:[%s406_s1 + $0xa0] sm:$0xff] }
   0xa   :  { %v197_v37 = vpack.c.bf16 %v40_v36, %v39_v35  ;;  %v42_v39 = vld [vmem:[%s406_s1 + $0xa8] sm:$0xff]  ;;  %v43_v41 = vld [vmem:[%s406_s1 + $0xb0] sm:$0xff]  ;;  %v44_v42 = vld [vmem:[%s406_s1 + $0xb8] sm:$0xff] }
   0xb   :  { %139 = vperm.xlu0 %239, %v131_v20   ;;  %153 = vperm.xlu1 %240, %v145_v21   ;;  %v200_v40 = vpack.c.bf16 %v42_v39, %v41_v38  ;;  %v203_v43 = vpack.c.bf16 %v44_v42, %v43_v41  ;;  %v45_v44 = vld [vmem:[%s406_s1 + $0xc0] sm:$0xff]  ;;  %v46_v45 = vld [vmem:[%s406_s1 + $0xc8] sm:$0xff]  ;;  %v47_v48 = vld [vmem:[%s406_s1 + $0xd0] sm:$0xff] }
   0xc   :  { %177 = vmatpush1.bf16.msra.mxu0 %v176_v10  ;;  %224 = vmatpush1.bf16.msra.mxu1 %v176_v10  ;;  %v206_v46 = vpack.c.bf16 %v46_v45, %v45_v44  ;;  %v17_v49 = vld [vmem:[%s407_s0] sm:$0xff]  ;;  %v19_v50 = vld [vmem:[%s407_s0 + $0x10] sm:$0xff] }
   0xd   :  { %178 = vmatprep.subr.bf16.mxu0 %v241_v0  ;;  %211 = vmatprep.subr.bf16.mxu1 %v241_v0 }
  0x10   :  { %180 = vmatpush1.bf16.msra.mxu0 %v179_v17  ;;  %225 = vmatpush1.bf16.msra.mxu1 %v179_v17 }
  0x11   :  { %181 = vmatprep.subr.bf16.mxu0 %v241_v0  ;;  %212 = vmatprep.subr.bf16.mxu1 %v241_v0 }
  0x14   :  { %183 = vmatpush1.bf16.msra.mxu0 %v182_v22  ;;  %226 = vmatpush1.bf16.msra.mxu1 %v182_v22 }
  0x15   :  { %184 = vmatprep.subr.bf16.mxu0 %v241_v0  ;;  %213 = vmatprep.subr.bf16.mxu1 %v241_v0 }
  0x18   :  { %186 = vmatpush1.bf16.msra.mxu0 %v185_v25  ;;  %227 = vmatpush1.bf16.msra.mxu1 %v185_v25 }
  0x19   :  { %187 = vmatprep.subr.bf16.mxu0 %v241_v0  ;;  %214 = vmatprep.subr.bf16.mxu1 %v241_v0 }
  0x1c   :  { %189 = vmatpush1.bf16.msra.mxu0 %v188_v28  ;;  %228 = vmatpush1.bf16.msra.mxu1 %v188_v28 }
  0x1d   :  { %190 = vmatprep.subr.bf16.mxu0 %v241_v0  ;;  %215 = vmatprep.subr.bf16.mxu1 %v241_v0 }
  0x20   :  { %192 = vmatpush1.bf16.msra.mxu0 %v191_v31  ;;  %229 = vmatpush1.bf16.msra.mxu1 %v191_v31 }
  0x21   :  { %193 = vmatprep.subr.bf16.mxu0 %v241_v0  ;;  %216 = vmatprep.subr.bf16.mxu1 %v241_v0 }
  0x24   :  { %195 = vmatpush1.bf16.msra.mxu0 %v194_v34  ;;  %230 = vmatpush1.bf16.msra.mxu1 %v194_v34 }
  0x25   :  { %196 = vmatprep.subr.bf16.mxu0 %v241_v0  ;;  %217 = vmatprep.subr.bf16.mxu1 %v241_v0 }
  0x28   :  { %198 = vmatpush1.bf16.msra.mxu0 %v197_v37  ;;  %231 = vmatpush1.bf16.msra.mxu1 %v197_v37 }
  0x29   :  { %199 = vmatprep.subr.bf16.mxu0 %v241_v0  ;;  %218 = vmatprep.subr.bf16.mxu1 %v241_v0 }
  0x2c   :  { %201 = vmatpush1.bf16.msra.mxu0 %v200_v40  ;;  %232 = vmatpush1.bf16.msra.mxu1 %v200_v40 }
  0x2d   :  { %202 = vmatprep.subr.bf16.mxu0 %v241_v0  ;;  %219 = vmatprep.subr.bf16.mxu1 %v241_v0 }
  0x30   :  { %204 = vmatpush1.bf16.msra.mxu0 %v203_v43  ;;  %233 = vmatpush1.bf16.msra.mxu1 %v203_v43 }
  0x31   :  { %205 = vmatprep.subr.bf16.mxu0 %v241_v0  ;;  %220 = vmatprep.subr.bf16.mxu1 %v241_v0 }
  0x34   :  { %207 = vmatpush1.bf16.msra.mxu0 %v206_v46  ;;  %234 = vmatpush1.bf16.msra.mxu1 %v206_v46 }
  0x35   :  { %107 = vmatprep.subr.mxu0 %v243_v47  ;;  %221 = vmatprep.subr.mxu1 %v243_v47 }
  0x38   :  { %108 = vmatpush1.msra.mxu0 %v47_v48  ;;  %235 = vmatpush1.msra.mxu1 %v47_v48 }
  0x39   :  { %120 = vmatmul.mubr.f32.vlgmr.msra.gmra.mrb[0].mxu0 %v17_v49  ;;  %125 = vmatmul.mubr.f32.vlgmr.msra.gmra.mrb[0].mxu1 %v19_v50 }
  0x86   :  { %v135_v51 = vpop.permute.xlu0 %134  ;;  %v149_v52 = vpop.permute.xlu1 %148 }
  0x8a   :  { %v140_v53 = vpop.permute.xlu0 %139  ;;  %v154_v60 = vpop.permute.xlu1 %153 }
 0x10c   :  { %v121_v54 = vpop.f32.mrb[0].mxu0  ;;  %v126_v55 = vpop.f32.mrb[0].mxu1 }
 0x10d   :  { %v142_v56 = vmul.f32 %v135_v51, %v121_v54  ;;  %v143_v57 = vmul.f32 %v140_v53, %v126_v55  ;;  %v123_v58 = vpop.f32.mrb[1].mxu0  ;;  %v128_v59 = vpop.f32.mrb[1].mxu1 }
 0x10f   :  { %v156_v61 = vadd.f32 %v149_v52, %v142_v56  ;;  %v157_v62 = vadd.f32 %v154_v60, %v143_v57 }
 0x111   :  { %v158_v63 = vmax.f32 %v156_v61, 0.0  ;;  %v159_v0 = vmax.f32 %v157_v62, 0.0 }
 0x113   :  { %161 = vst.msk [vmem:[%s410_s4] sm:$0xff] %vm160_vm1, %v158_v63  ;;  %162 = vst.msk [vmem:[%s410_s4 + $0x8] sm:$0xff] %vm160_vm1, %v159_v0 }

// kernel: _lambda_.19
= control target key start
LH: loop header
LB: loop body
LE: loop exit
PB: predicated region body
PF: predicated region fallthrough
CT: control target
= control target key end

     0   :  { %v382_v0 = vmov 0.0|0.0   ;;  %v383_v4 = vmov 0   ;;  %vm79_vm0 = vcmask 392192   ;;  %vm266_vm1 = vcmask 130048   ;;  %s626_s1 = inlined_call_operand.vmem [shape: f32[432,16], index: 1, kind: input, shape index: {}]   ;;  %s627_s0 = inlined_call_operand.vmem [shape: f32[16,432], index: 0, kind: input, shape index: {}]   ;;  %s628_s2 = inlined_call_operand.vmem [shape: f32[16,1], index: 2, kind: input, shape index: {}]   ;;  %s629_s3 = inlined_call_operand.vmem [shape: f32[16,1], index: 3, kind: input, shape index: {}]   ;;  %s630_s4 = inlined_call_operand.vmem [shape: f32[16,16], index: 4, kind: output, shape index: {}]  }
   0x1   :  { %345 = vmatprep.subr.bf16.mxu1 %v382_v0  ;;  %v57_v1 = vld [vmem:[%s626_s1 + $0x100] sm:$0xff]  ;;  %v58_v2 = vld [vmem:[%s626_s1 + $0x108] sm:$0xff]  ;;  %v59_v3 = vld [vmem:[%s626_s1 + $0x110] sm:$0xff]  ;;  %380 = vset.pattern.permute.xlu0 %v383_v4 }
   0x2   :  { %v346_v5 = vpack.c.bf16 %v58_v2, %v57_v1  ;;  %v60_v6 = vld [vmem:[%s626_s1 + $0x118] sm:$0xff]  ;;  %v41_v7 = vld [vmem:[%s626_s1 + $0x80] sm:$0xff]  ;;  %v42_v8 = vld [vmem:[%s626_s1 + $0x88] sm:$0xff]  ;;  %381 = vset.pattern.permute.xlu1 %v383_v4 }
   0x3   :  { %v313_v9 = vpack.c.bf16 %v42_v8, %v41_v7  ;;  %v25_v10 = vld [vmem:[%s626_s1] sm:$0xff]  ;;  %v26_v11 = vld [vmem:[%s626_s1 + $0x8] sm:$0xff]  ;;  %v349_v12 = vpack.c.bf16 %v60_v6, %v59_v3  ;;  %v43_v15 = vld [vmem:[%s626_s1 + $0x90] sm:$0xff] }
   0x4   :  { %347 = vmatpush1.bf16.msra.mxu1 %v346_v5  ;;  %v315_v13 = vpack.c.bf16 %v26_v11, %v25_v10  ;;  %v61_v14 = vld [vmem:[%s626_s1 + $0x120] sm:$0xff]  ;;  %v44_v16 = vld [vmem:[%s626_s1 + $0x98] sm:$0xff]  ;;  %v62_v17 = vld [vmem:[%s626_s1 + $0x128] sm:$0xff] }
   0x5   :  { %348 = vmatprep.subr.bf16.mxu1 %v382_v0  ;;  %314 = vmatprep.subr.bf16.mxu0 %v313_v9  ;;  %v317_v18 = vpack.c.bf16 %v44_v16, %v43_v15  ;;  %v27_v19 = vld [vmem:[%s626_s1 + $0x10] sm:$0xff]  ;;  %v28_v20 = vld [vmem:[%s626_s1 + $0x18] sm:$0xff]  ;;  %v45_v22 = vld [vmem:[%s626_s1 + $0xa0] sm:$0xff]  ;;  %v352_v27 = vpack.c.bf16 %v62_v17, %v61_v14 }
   0x6   :  { %316 = vmatpush3.bf16.msra.mxu0 %v315_v13  ;;  %v319_v21 = vpack.c.bf16 %v28_v20, %v27_v19  ;;  %v46_v23 = vld [vmem:[%s626_s1 + $0xa8] sm:$0xff]  ;;  %v29_v25 = vld [vmem:[%s626_s1 + $0x20] sm:$0xff]  ;;  %v47_v28 = vld [vmem:[%s626_s1 + $0xb0] sm:$0xff] }
   0x7   :  { %318 = vmatprep.subr.bf16.mxu0 %v317_v18  ;;  %v321_v24 = vpack.c.bf16 %v46_v23, %v45_v22  ;;  %v30_v26 = vld [vmem:[%s626_s1 + $0x28] sm:$0xff]  ;;  %v48_v29 = vld [vmem:[%s626_s1 + $0xb8] sm:$0xff]  ;;  %v63_v30 = vld [vmem:[%s626_s1 + $0x130] sm:$0xff] }
   0x8   :  { %350 = vmatpush1.bf16.msra.mxu1 %v349_v12  ;;  %v64_v31 = vld [vmem:[%s626_s1 + $0x138] sm:$0xff]  ;;  %v323_v32 = vpack.c.bf16 %v30_v26, %v29_v25  ;;  %v325_v33 = vpack.c.bf16 %v48_v29, %v47_v28  ;;  %v31_v34 = vld [vmem:[%s626_s1 + $0x30] sm:$0xff]  ;;  %v49_v37 = vld [vmem:[%s626_s1 + $0xc0] sm:$0xff] }
   0x9   :  { %351 = vmatprep.subr.bf16.mxu1 %v382_v0  ;;  %v32_v35 = vld [vmem:[%s626_s1 + $0x38] sm:$0xff]  ;;  %v355_v36 = vpack.c.bf16 %v64_v31, %v63_v30  ;;  %v50_v38 = vld [vmem:[%s626_s1 + $0xc8] sm:$0xff]  ;;  %v65_v39 = vld [vmem:[%s626_s1 + $0x140] sm:$0xff] }
   0xa   :  { %320 = vmatpush3.bf16.msra.mxu0 %v319_v21  ;;  %v66_v40 = vld [vmem:[%s626_s1 + $0x148] sm:$0xff]  ;;  %v327_v41 = vpack.c.bf16 %v32_v35, %v31_v34  ;;  %v329_v42 = vpack.c.bf16 %v50_v38, %v49_v37  ;;  %v33_v43 = vld [vmem:[%s626_s1 + $0x40] sm:$0xff]  ;;  %v51_v46 = vld [vmem:[%s626_s1 + $0xd0] sm:$0xff] }
   0xb   :  { %322 = vmatprep.subr.bf16.mxu0 %v321_v24  ;;  %v34_v44 = vld [vmem:[%s626_s1 + $0x48] sm:$0xff]  ;;  %v358_v45 = vpack.c.bf16 %v66_v40, %v65_v39  ;;  %v52_v47 = vld [vmem:[%s626_s1 + $0xd8] sm:$0xff]  ;;  %v67_v48 = vld [vmem:[%s626_s1 + $0x150] sm:$0xff] }
   0xc   :  { %353 = vmatpush1.bf16.msra.mxu1 %v352_v27  ;;  %v68_v49 = vld [vmem:[%s626_s1 + $0x158] sm:$0xff]  ;;  %v331_v50 = vpack.c.bf16 %v34_v44, %v33_v43  ;;  %v18_v51 = vld [vmem:[%s627_s0 + $0x8] sm:$0xff]  ;;  %v333_v52 = vpack.c.bf16 %v52_v47, %v51_v46  ;;  %v35_v53 = vld [vmem:[%s626_s1 + $0x50] sm:$0xff] }
   0xd   :  { %354 = vmatprep.subr.bf16.mxu1 %v382_v0  ;;  %v36_v54 = vld [vmem:[%s626_s1 + $0x58] sm:$0xff]  ;;  %150 = vmatprep.mubr.f32.mxu0 %v18_v51  ;;  %v361_v55 = vpack.c.bf16 %v68_v49, %v67_v48  ;;  %v53_v56 = vld [vmem:[%s626_s1 + $0xe0] sm:$0xff]  ;;  %v54_v57 = vld [vmem:[%s626_s1 + $0xe8] sm:$0xff] }
   0xe   :  { %324 = vmatpush3.bf16.msra.mxu0 %v323_v32  ;;  %v20_v58 = vld [vmem:[%s627_s0 + $0x18] sm:$0xff]  ;;  %v69_v59 = vld [vmem:[%s626_s1 + $0x160] sm:$0xff]  ;;  %v70_v60 = vld [vmem:[%s626_s1 + $0x168] sm:$0xff]  ;;  %v335_v62 = vpack.c.bf16 %v36_v54, %v35_v53  ;;  %v337_v1 = vpack.c.bf16 %v54_v57, %v53_v56 }
   0xf   :  { %326 = vmatprep.subr.bf16.mxu0 %v325_v33  ;;  %273 = vmatprep.mubr.msk.f32.mxu1 %vm79_vm0, %v20_v58  ;;  %v236_v61 = vld [vmem:[%s628_s2] sm:$0xff]  ;;  %v38_v3 = vld [vmem:[%s626_s1 + $0x68] sm:$0xff]  ;;  %v364_v5 = vpack.c.bf16 %v70_v60, %v69_v59  ;;  %v55_v6 = vld [vmem:[%s626_s1 + $0xf0] sm:$0xff] }
  0x10   :  { %356 = vmatpush1.bf16.msra.mxu1 %v355_v36  ;;  %240 = vperm.xlu0 %380, %v236_v61   ;;  %v250_v63 = vld [vmem:[%s629_s3] sm:$0xff]  ;;  %v237_v4 = vld [vmem:[%s628_s2 + $0x8] sm:$0xff]  ;;  %v56_v7 = vld [vmem:[%s626_s1 + $0xf8] sm:$0xff] }
  0x11   :  { %357 = vmatprep.subr.bf16.mxu1 %v382_v0  ;;  %v37_v2 = vld [vmem:[%s626_s1 + $0x60] sm:$0xff]  ;;  %254 = vperm.xlu1 %381, %v250_v63   ;;  %v251_v8 = vld [vmem:[%s629_s3 + $0x8] sm:$0xff]  ;;  %v71_v9 = vld [vmem:[%s626_s1 + $0x170] sm:$0xff]  ;;  %v341_v12 = vpack.c.bf16 %v56_v7, %v55_v6 }
  0x12   :  { %328 = vmatpush3.bf16.msra.mxu0 %v327_v41  ;;  %v72_v10 = vld [vmem:[%s626_s1 + $0x178] sm:$0xff]  ;;  %v339_v11 = vpack.c.bf16 %v38_v3, %v37_v2  ;;  %v39_v13 = vld [vmem:[%s626_s1 + $0x70] sm:$0xff]  ;;  %v73_v16 = vld [vmem:[%s626_s1 + $0x180] sm:$0xff] }
  0x13   :  { %330 = vmatprep.subr.bf16.mxu0 %v329_v42  ;;  %v40_v14 = vld [vmem:[%s626_s1 + $0x78] sm:$0xff]  ;;  %v367_v15 = vpack.c.bf16 %v72_v10, %v71_v9  ;;  %v74_v17 = vld [vmem:[%s626_s1 + $0x188] sm:$0xff]  ;;  %v75_v20 = vld [vmem:[%s626_s1 + $0x190] sm:$0xff] }
  0x14   :  { %359 = vmatpush1.bf16.msra.mxu1 %v358_v45  ;;  %245 = vperm.xlu0 %380, %v237_v4   ;;  %v343_v18 = vpack.c.bf16 %v40_v14, %v39_v13  ;;  %v370_v19 = vpack.c.bf16 %v74_v17, %v73_v16  ;;  %v76_v21 = vld [vmem:[%s626_s1 + $0x198] sm:$0xff]  ;;  %v17_v22 = vld [vmem:[%s627_s0] sm:$0xff]  ;;  %v22_v23 = vld [vmem:[%s627_s0 + $0x28] sm:$0xff] }
  0x15   :  { %360 = vmatprep.subr.bf16.mxu1 %v382_v0  ;;  %259 = vperm.xlu1 %381, %v251_v8   ;;  %v373_v24 = vpack.c.bf16 %v76_v21, %v75_v20  ;;  %v77_v25 = vld [vmem:[%s626_s1 + $0x1a0] sm:$0xff]  ;;  %v78_v26 = vld [vmem:[%s626_s1 + $0x1a8] sm:$0xff]  ;;  %v19_v29 = vld [vmem:[%s627_s0 + $0x10] sm:$0xff] }
  0x16   :  { %332 = vmatpush3.bf16.msra.mxu0 %v331_v50  ;;  %v21_v27 = vld [vmem:[%s627_s0 + $0x20] sm:$0xff]  ;;  %v376_v28 = vpack.c.bf16 %v78_v26, %v77_v25  ;;  %v24_v30 = vld [vmem:[%s627_s0 + $0x38] sm:$0xff]  ;;  %v23_v31 = vld [vmem:[%s627_s0 + $0x30] sm:$0xff] }
  0x17   :  { %334 = vmatprep.subr.bf16.mxu0 %v333_v52 }
  0x18   :  { %362 = vmatpush1.bf16.msra.mxu1 %v361_v55 }
  0x19   :  { %363 = vmatprep.subr.bf16.mxu1 %v382_v0 }
  0x1a   :  { %336 = vmatpush3.bf16.msra.mxu0 %v335_v62 }
  0x1b   :  { %338 = vmatprep.subr.bf16.mxu0 %v337_v1 }
  0x1c   :  { %365 = vmatpush1.bf16.msra.mxu1 %v364_v5 }
  0x1d   :  { %366 = vmatprep.subr.bf16.mxu1 %v382_v0 }
  0x1e   :  { %340 = vmatpush3.bf16.msra.mxu0 %v339_v11 }
  0x1f   :  { %342 = vmatprep.subr.bf16.mxu0 %v341_v12 }
  0x20   :  { %368 = vmatpush1.bf16.msra.mxu1 %v367_v15 }
  0x21   :  { %369 = vmatprep.subr.bf16.mxu1 %v382_v0 }
  0x22   :  { %344 = vmatpush3.bf16.msra.mxu0 %v343_v18 }
  0x24   :  { %371 = vmatpush1.bf16.msra.mxu1 %v370_v19 }
  0x25   :  { %372 = vmatprep.subr.bf16.mxu1 %v382_v0  ;;  %151 = vmatmul.mubr.f32.vlgmr.msra.gmra.mrb[0].mxu0 %v17_v22 }
  0x26   :  { %155 = vmatprep.mubr.f32.mxu0 %v22_v23 }
  0x28   :  { %374 = vmatpush1.bf16.msra.mxu1 %v373_v24 }
  0x29   :  { %375 = vmatprep.subr.bf16.mxu1 %v382_v0  ;;  %156 = vmatmul.mubr.f32.gmra.mrb[2].mxu0 %v21_v27 }
  0x2c   :  { %377 = vmatpush1.bf16.msra.mxu1 %v376_v28 }
  0x2f   :  { %226 = vmatmul.mubr.f32.vlgmr.msra.gmra.mrb[0].mxu1 %v19_v29 }
  0x30   :  { %274 = vmatprep.mubr.msk.f32.mxu1 %vm79_vm0, %v24_v30 }
  0x33   :  { %231 = vmatmul.mubr.f32.gmra.mrb[2].mxu1 %v23_v31 }
  0x8f   :  { %v241_v37 = vpop.permute.xlu0 %240 }
  0x90   :  { %v255_v41 = vpop.permute.xlu1 %254 }
  0x93   :  { %v246_v47 = vpop.permute.xlu0 %245 }
  0x94   :  { %v260_v50 = vpop.permute.xlu1 %259 }
  0xf8   :  { %v307_v32 = vpop.f32.mrb[0].mxu0 }
  0xf9   :  { %v308_v0 = vpop.f32.mrb[1].mxu0 }
  0xfa   :  { %v309_v33 = vadd.f32 %v308_v0, %v307_v32 }
  0xfc   :  { %v310_v34 = vpop.f32.mrb[2].mxu0 }
  0xfd   :  { %v311_v35 = vpop.f32.mrb[3].mxu0 }
  0xfe   :  { %v312_v36 = vadd.f32 %v311_v35, %v310_v34 }
 0x102   :  { %v227_v38 = vpop.f32.mrb[0].mxu1 }
 0x103   :  { %v228_v39 = vadd.f32 %v309_v33, %v227_v38  ;;  %v229_v40 = vpop.f32.mrb[1].mxu1 }
 0x105   :  { %v248_v42 = vmul.f32 %v241_v37, %v228_v39 }
 0x106   :  { %v232_v43 = vpop.f32.mrb[2].mxu1 }
 0x107   :  { %v262_v44 = vadd.f32 %v255_v41, %v248_v42  ;;  %v233_v45 = vadd.f32 %v312_v36, %v232_v43  ;;  %v234_v46 = vpop.f32.mrb[3].mxu1 }
 0x109   :  { %v264_v48 = vmax.f32 %v262_v44, 0.0  ;;  %v249_v49 = vmul.f32 %v246_v47, %v233_v45 }
 0x10b   :  { %267 = vst.msk [vmem:[%s630_s4] sm:$0xff] %vm266_vm1, %v264_v48  ;;  %v263_v51 = vadd.f32 %v260_v50, %v249_v49 }
 0x10d   :  { %v265_v52 = vmax.f32 %v263_v51, 0.0 }
 0x10f   :  { %268 = vst.msk [vmem:[%s630_s4 + $0x8] sm:$0xff] %vm266_vm1, %v265_v52 }

// kernel: _lambda_.20
= control target key start
LH: loop header
LB: loop body
LE: loop exit
PB: predicated region body
PF: predicated region fallthrough
CT: control target
= control target key end

     0   :  { %v456_v0 = vmov 0.0|0.0   ;;  %v457_v4 = vmov 0   ;;  %vm87_vm0 = vcmask 392192   ;;  %vm330_vm1 = vcmask 15360   ;;  %s748_s1 = inlined_call_operand.vmem [shape: f32[432,2], index: 1, kind: input, shape index: {}]   ;;  %s749_s0 = inlined_call_operand.vmem [shape: f32[32,432], index: 0, kind: input, shape index: {}]   ;;  %s750_s2 = inlined_call_operand.vmem [shape: f32[32,1], index: 2, kind: input, shape index: {}]   ;;  %s751_s3 = inlined_call_operand.vmem [shape: f32[32,1], index: 3, kind: input, shape index: {}]   ;;  %s752_s4 = inlined_call_operand.vmem [shape: f32[32,2], index: 4, kind: output, shape index: {}]  }
   0x1   :  { %419 = vmatprep.subr.bf16.mxu1 %v456_v0  ;;  %v65_v1 = vld [vmem:[%s748_s1 + $0x100] sm:$0xff]  ;;  %v66_v2 = vld [vmem:[%s748_s1 + $0x108] sm:$0xff]  ;;  %v67_v3 = vld [vmem:[%s748_s1 + $0x110] sm:$0xff]  ;;  %455 = vset.pattern.permute.xlu1 %v457_v4 }
   0x2   :  { %v420_v5 = vpack.c.bf16 %v66_v2, %v65_v1  ;;  %v68_v6 = vld [vmem:[%s748_s1 + $0x118] sm:$0xff]  ;;  %v49_v7 = vld [vmem:[%s748_s1 + $0x80] sm:$0xff]  ;;  %v50_v8 = vld [vmem:[%s748_s1 + $0x88] sm:$0xff]  ;;  %454 = vset.pattern.permute.xlu0 %v457_v4 }
   0x3   :  { %v387_v9 = vpack.c.bf16 %v50_v8, %v49_v7  ;;  %v33_v10 = vld [vmem:[%s748_s1] sm:$0xff]  ;;  %v34_v11 = vld [vmem:[%s748_s1 + $0x8] sm:$0xff]  ;;  %v423_v12 = vpack.c.bf16 %v68_v6, %v67_v3  ;;  %v51_v15 = vld [vmem:[%s748_s1 + $0x90] sm:$0xff] }
   0x4   :  { %421 = vmatpush1.bf16.msra.mxu1 %v420_v5  ;;  %v389_v13 = vpack.c.bf16 %v34_v11, %v33_v10  ;;  %v69_v14 = vld [vmem:[%s748_s1 + $0x120] sm:$0xff]  ;;  %v52_v16 = vld [vmem:[%s748_s1 + $0x98] sm:$0xff]  ;;  %v70_v17 = vld [vmem:[%s748_s1 + $0x128] sm:$0xff] }
   0x5   :  { %422 = vmatprep.subr.bf16.mxu1 %v456_v0  ;;  %388 = vmatprep.subr.bf16.mxu0 %v387_v9  ;;  %v391_v18 = vpack.c.bf16 %v52_v16, %v51_v15  ;;  %v35_v19 = vld [vmem:[%s748_s1 + $0x10] sm:$0xff]  ;;  %v36_v20 = vld [vmem:[%s748_s1 + $0x18] sm:$0xff]  ;;  %v53_v22 = vld [vmem:[%s748_s1 + $0xa0] sm:$0xff]  ;;  %v426_v27 = vpack.c.bf16 %v70_v17, %v69_v14 }
   0x6   :  { %390 = vmatpush3.bf16.msra.mxu0 %v389_v13  ;;  %v393_v21 = vpack.c.bf16 %v36_v20, %v35_v19  ;;  %v54_v23 = vld [vmem:[%s748_s1 + $0xa8] sm:$0xff]  ;;  %v37_v25 = vld [vmem:[%s748_s1 + $0x20] sm:$0xff]  ;;  %v55_v28 = vld [vmem:[%s748_s1 + $0xb0] sm:$0xff] }
   0x7   :  { %392 = vmatprep.subr.bf16.mxu0 %v391_v18  ;;  %v395_v24 = vpack.c.bf16 %v54_v23, %v53_v22  ;;  %v38_v26 = vld [vmem:[%s748_s1 + $0x28] sm:$0xff]  ;;  %v56_v29 = vld [vmem:[%s748_s1 + $0xb8] sm:$0xff]  ;;  %v71_v30 = vld [vmem:[%s748_s1 + $0x130] sm:$0xff] }
   0x8   :  { %424 = vmatpush1.bf16.msra.mxu1 %v423_v12  ;;  %v72_v31 = vld [vmem:[%s748_s1 + $0x138] sm:$0xff]  ;;  %v397_v32 = vpack.c.bf16 %v38_v26, %v37_v25  ;;  %v399_v33 = vpack.c.bf16 %v56_v29, %v55_v28  ;;  %v39_v34 = vld [vmem:[%s748_s1 + $0x30] sm:$0xff]  ;;  %v57_v37 = vld [vmem:[%s748_s1 + $0xc0] sm:$0xff] }
   0x9   :  { %425 = vmatprep.subr.bf16.mxu1 %v456_v0  ;;  %v40_v35 = vld [vmem:[%s748_s1 + $0x38] sm:$0xff]  ;;  %v429_v36 = vpack.c.bf16 %v72_v31, %v71_v30  ;;  %v58_v38 = vld [vmem:[%s748_s1 + $0xc8] sm:$0xff]  ;;  %v73_v39 = vld [vmem:[%s748_s1 + $0x140] sm:$0xff] }
   0xa   :  { %394 = vmatpush3.bf16.msra.mxu0 %v393_v21  ;;  %v74_v40 = vld [vmem:[%s748_s1 + $0x148] sm:$0xff]  ;;  %v401_v41 = vpack.c.bf16 %v40_v35, %v39_v34  ;;  %v403_v42 = vpack.c.bf16 %v58_v38, %v57_v37  ;;  %v41_v43 = vld [vmem:[%s748_s1 + $0x40] sm:$0xff]  ;;  %v59_v46 = vld [vmem:[%s748_s1 + $0xd0] sm:$0xff] }
   0xb   :  { %396 = vmatprep.subr.bf16.mxu0 %v395_v24  ;;  %v42_v44 = vld [vmem:[%s748_s1 + $0x48] sm:$0xff]  ;;  %v432_v45 = vpack.c.bf16 %v74_v40, %v73_v39  ;;  %v60_v47 = vld [vmem:[%s748_s1 + $0xd8] sm:$0xff]  ;;  %v75_v48 = vld [vmem:[%s748_s1 + $0x150] sm:$0xff] }
   0xc   :  { %427 = vmatpush1.bf16.msra.mxu1 %v426_v27  ;;  %v76_v49 = vld [vmem:[%s748_s1 + $0x158] sm:$0xff]  ;;  %v405_v50 = vpack.c.bf16 %v42_v44, %v41_v43  ;;  %v18_v51 = vld [vmem:[%s749_s0 + $0x8] sm:$0xff]  ;;  %v407_v52 = vpack.c.bf16 %v60_v47, %v59_v46  ;;  %v43_v53 = vld [vmem:[%s748_s1 + $0x50] sm:$0xff] }
   0xd   :  { %428 = vmatprep.subr.bf16.mxu1 %v456_v0  ;;  %v44_v54 = vld [vmem:[%s748_s1 + $0x58] sm:$0xff]  ;;  %164 = vmatprep.mubr.f32.mxu0 %v18_v51  ;;  %v435_v55 = vpack.c.bf16 %v76_v49, %v75_v48  ;;  %v61_v56 = vld [vmem:[%s748_s1 + $0xe0] sm:$0xff]  ;;  %v62_v57 = vld [vmem:[%s748_s1 + $0xe8] sm:$0xff] }
   0xe   :  { %398 = vmatpush3.bf16.msra.mxu0 %v397_v32  ;;  %v20_v58 = vld [vmem:[%s749_s0 + $0x18] sm:$0xff]  ;;  %v77_v59 = vld [vmem:[%s748_s1 + $0x160] sm:$0xff]  ;;  %v78_v60 = vld [vmem:[%s748_s1 + $0x168] sm:$0xff]  ;;  %v409_v61 = vpack.c.bf16 %v44_v54, %v43_v53  ;;  %v411_v62 = vpack.c.bf16 %v62_v57, %v61_v56 }
   0xf   :  { %400 = vmatprep.subr.bf16.mxu0 %v399_v33  ;;  %339 = vmatprep.mubr.msk.f32.mxu1 %vm87_vm0, %v20_v58  ;;  %v45_v63 = vld [vmem:[%s748_s1 + $0x60] sm:$0xff]  ;;  %v46_v1 = vld [vmem:[%s748_s1 + $0x68] sm:$0xff]  ;;  %v63_v2 = vld [vmem:[%s748_s1 + $0xf0] sm:$0xff]  ;;  %v438_v3 = vpack.c.bf16 %v78_v60, %v77_v59 }
  0x10   :  { %430 = vmatpush1.bf16.msra.mxu1 %v429_v36  ;;  %v64_v4 = vld [vmem:[%s748_s1 + $0xf8] sm:$0xff]  ;;  %v272_v5 = vld [vmem:[%s750_s2 + $0x10] sm:$0xff]  ;;  %v270_v6 = vld [vmem:[%s750_s2] sm:$0xff]  ;;  %v413_v9 = vpack.c.bf16 %v46_v1, %v45_v63 }
  0x11   :  { %431 = vmatprep.subr.bf16.mxu1 %v456_v0  ;;  %v79_v7 = vld [vmem:[%s748_s1 + $0x170] sm:$0xff]  ;;  %v80_v8 = vld [vmem:[%s748_s1 + $0x178] sm:$0xff]  ;;  %286 = vperm.xlu1 %455, %v272_v5   ;;  %v415_v11 = vpack.c.bf16 %v64_v4, %v63_v2  ;;  %v271_v14 = vld [vmem:[%s750_s2 + $0x8] sm:$0xff] }
  0x12   :  { %402 = vmatpush3.bf16.msra.mxu0 %v401_v41  ;;  %276 = vperm.xlu0 %454, %v270_v6   ;;  %v273_v10 = vld [vmem:[%s750_s2 + $0x18] sm:$0xff]  ;;  %v47_v12 = vld [vmem:[%s748_s1 + $0x70] sm:$0xff]  ;;  %v441_v15 = vpack.c.bf16 %v80_v8, %v79_v7  ;;  %v81_v16 = vld [vmem:[%s748_s1 + $0x180] sm:$0xff] }
  0x13   :  { %404 = vmatprep.subr.bf16.mxu0 %v403_v42  ;;  %v48_v13 = vld [vmem:[%s748_s1 + $0x78] sm:$0xff]  ;;  %v82_v17 = vld [vmem:[%s748_s1 + $0x188] sm:$0xff]  ;;  %v298_v20 = vld [vmem:[%s751_s3] sm:$0xff] }
  0x14   :  { %433 = vmatpush1.bf16.msra.mxu1 %v432_v45  ;;  %v417_v18 = vpack.c.bf16 %v48_v13, %v47_v12  ;;  %v299_v19 = vld [vmem:[%s751_s3 + $0x8] sm:$0xff]  ;;  %v444_v21 = vpack.c.bf16 %v82_v17, %v81_v16  ;;  %v83_v22 = vld [vmem:[%s748_s1 + $0x190] sm:$0xff]  ;;  %v84_v23 = vld [vmem:[%s748_s1 + $0x198] sm:$0xff] }
  0x15   :  { %434 = vmatprep.subr.bf16.mxu1 %v456_v0  ;;  %291 = vperm.xlu1 %455, %v273_v10   ;;  %v17_v24 = vld [vmem:[%s749_s0] sm:$0xff]  ;;  %v22_v25 = vld [vmem:[%s749_s0 + $0x28] sm:$0xff]  ;;  %v301_v26 = vld [vmem:[%s751_s3 + $0x18] sm:$0xff]  ;;  %v447_v27 = vpack.c.bf16 %v84_v23, %v83_v22 }
  0x16   :  { %406 = vmatpush3.bf16.msra.mxu0 %v405_v50  ;;  %281 = vperm.xlu0 %454, %v271_v14   ;;  %v300_v28 = vld [vmem:[%s751_s3 + $0x10] sm:$0xff]  ;;  %v85_v29 = vld [vmem:[%s748_s1 + $0x1a0] sm:$0xff]  ;;  %v86_v30 = vld [vmem:[%s748_s1 + $0x1a8] sm:$0xff] }
  0x17   :  { %408 = vmatprep.subr.bf16.mxu0 %v407_v52  ;;  %v21_v31 = vld [vmem:[%s749_s0 + $0x20] sm:$0xff]  ;;  %v26_v32 = vld [vmem:[%s749_s0 + $0x48] sm:$0xff]  ;;  %v450_v33 = vpack.c.bf16 %v86_v30, %v85_v29  ;;  %v19_v36 = vld [vmem:[%s749_s0 + $0x10] sm:$0xff] }
  0x18   :  { %436 = vmatpush1.bf16.msra.mxu1 %v435_v55  ;;  %v25_v34 = vld [vmem:[%s749_s0 + $0x40] sm:$0xff]  ;;  %v30_v35 = vld [vmem:[%s749_s0 + $0x68] sm:$0xff]  ;;  %v24_v37 = vld [vmem:[%s749_s0 + $0x38] sm:$0xff] }
  0x19   :  { %437 = vmatprep.subr.bf16.mxu1 %v456_v0  ;;  %309 = vperm.xlu1 %455, %v299_v19   ;;  %v23_v38 = vld [vmem:[%s749_s0 + $0x30] sm:$0xff]  ;;  %v28_v39 = vld [vmem:[%s749_s0 + $0x58] sm:$0xff] }
  0x1a   :  { %410 = vmatpush3.bf16.msra.mxu0 %v409_v61  ;;  %304 = vperm.xlu0 %454, %v298_v20   ;;  %v27_v40 = vld [vmem:[%s749_s0 + $0x50] sm:$0xff]  ;;  %v32_v41 = vld [vmem:[%s749_s0 + $0x78] sm:$0xff] }
  0x1b   :  { %412 = vmatprep.subr.bf16.mxu0 %v411_v62  ;;  %v31_v42 = vld [vmem:[%s749_s0 + $0x70] sm:$0xff] }
  0x1c   :  { %439 = vmatpush1.bf16.msra.mxu1 %v438_v3 }
  0x1d   :  { %440 = vmatprep.subr.bf16.mxu1 %v456_v0  ;;  %319 = vperm.xlu1 %455, %v301_v26  }
  0x1e   :  { %414 = vmatpush3.bf16.msra.mxu0 %v413_v9  ;;  %314 = vperm.xlu0 %454, %v300_v28  }
  0x1f   :  { %416 = vmatprep.subr.bf16.mxu0 %v415_v11 }
  0x20   :  { %442 = vmatpush1.bf16.msra.mxu1 %v441_v15 }
  0x21   :  { %443 = vmatprep.subr.bf16.mxu1 %v456_v0 }
  0x22   :  { %418 = vmatpush3.bf16.msra.mxu0 %v417_v18 }
  0x24   :  { %445 = vmatpush1.bf16.msra.mxu1 %v444_v21 }
  0x25   :  { %446 = vmatprep.subr.bf16.mxu1 %v456_v0  ;;  %165 = vmatmul.mubr.f32.vlgmr.msra.gmra.mrb[0].mxu0 %v17_v24 }
  0x26   :  { %169 = vmatprep.mubr.f32.mxu0 %v22_v25 }
  0x28   :  { %448 = vmatpush1.bf16.msra.mxu1 %v447_v27 }
  0x29   :  { %449 = vmatprep.subr.bf16.mxu1 %v456_v0  ;;  %170 = vmatmul.mubr.f32.gmra.mrb[2].mxu0 %v21_v31  ;;  %v29_v0 = vld [vmem:[%s749_s0 + $0x60] sm:$0xff] }
  0x2a   :  { %174 = vmatprep.mubr.f32.mxu0 %v26_v32 }
  0x2c   :  { %451 = vmatpush1.bf16.msra.mxu1 %v450_v33 }
  0x2d   :  { %175 = vmatmul.mubr.f32.gmra.mrb[4].mxu0 %v25_v34 }
  0x2e   :  { %179 = vmatprep.mubr.f32.mxu0 %v30_v35 }
  0x2f   :  { %250 = vmatmul.mubr.f32.vlgmr.msra.gmra.mrb[0].mxu1 %v19_v36 }
  0x30   :  { %340 = vmatprep.mubr.msk.f32.mxu1 %vm87_vm0, %v24_v37 }
  0x31   :  { %180 = vmatmul.mubr.f32.gmra.mrb[6].mxu0 %v29_v0 }
  0x33   :  { %255 = vmatmul.mubr.f32.gmra.mrb[2].mxu1 %v23_v38 }
  0x34   :  { %341 = vmatprep.mubr.msk.f32.mxu1 %vm87_vm0, %v28_v39 }
  0x37   :  { %260 = vmatmul.mubr.f32.gmra.mrb[4].mxu1 %v27_v40 }
  0x38   :  { %342 = vmatprep.mubr.msk.f32.mxu1 %vm87_vm0, %v32_v41 }
  0x3b   :  { %265 = vmatmul.mubr.f32.gmra.mrb[6].mxu1 %v31_v42 }
  0x90   :  { %v287_v49 = vpop.permute.xlu1 %286 }
  0x91   :  { %v277_v45 = vpop.permute.xlu0 %276 }
  0x94   :  { %v292_v58 = vpop.permute.xlu1 %291 }
  0x95   :  { %v282_v51 = vpop.permute.xlu0 %281 }
  0x98   :  { %v310_v7 = vpop.permute.xlu1 %309 }
  0x99   :  { %v305_v62 = vpop.permute.xlu0 %304 }
  0x9c   :  { %v320_v21 = vpop.permute.xlu1 %319 }
  0x9d   :  { %v315_v14 = vpop.permute.xlu0 %314 }
  0xf8   :  { %v375_v43 = vpop.f32.mrb[0].mxu0 }
  0xf9   :  { %v376_v44 = vpop.f32.mrb[1].mxu0 }
  0xfa   :  { %v377_v46 = vadd.f32 %v376_v44, %v375_v43 }
  0xfc   :  { %v378_v47 = vpop.f32.mrb[2].mxu0 }
  0xfd   :  { %v379_v48 = vpop.f32.mrb[3].mxu0 }
  0xfe   :  { %v380_v50 = vadd.f32 %v379_v48, %v378_v47 }
 0x100   :  { %v381_v52 = vpop.f32.mrb[4].mxu0 }
 0x101   :  { %v382_v53 = vpop.f32.mrb[5].mxu0 }
 0x102   :  { %v251_v54 = vpop.f32.mrb[0].mxu1  ;;  %v383_v55 = vadd.f32 %v382_v53, %v381_v52 }
 0x103   :  { %v252_v56 = vadd.f32 %v377_v46, %v251_v54  ;;  %v253_v57 = vpop.f32.mrb[1].mxu1 }
 0x104   :  { %v384_v59 = vpop.f32.mrb[6].mxu0 }
 0x105   :  { %v294_v60 = vmul.f32 %v277_v45, %v252_v56  ;;  %v385_v61 = vpop.f32.mrb[7].mxu0 }
 0x106   :  { %v256_v63 = vpop.f32.mrb[2].mxu1  ;;  %v386_v1 = vadd.f32 %v385_v61, %v384_v59 }
 0x107   :  { %v322_v2 = vadd.f32 %v305_v62, %v294_v60  ;;  %v257_v3 = vadd.f32 %v380_v50, %v256_v63  ;;  %v258_v4 = vpop.f32.mrb[3].mxu1 }
 0x109   :  { %v326_v5 = vmax.f32 %v322_v2, 0.0  ;;  %v295_v6 = vmul.f32 %v282_v51, %v257_v3 }
 0x10a   :  { %v261_v8 = vpop.f32.mrb[4].mxu1 }
 0x10b   :  { %331 = vst.msk [vmem:[%s752_s4] sm:$0xff] %vm330_vm1, %v326_v5  ;;  %v323_v9 = vadd.f32 %v310_v7, %v295_v6  ;;  %v262_v10 = vadd.f32 %v383_v55, %v261_v8  ;;  %v263_v11 = vpop.f32.mrb[5].mxu1 }
 0x10d   :  { %v327_v12 = vmax.f32 %v323_v9, 0.0  ;;  %v296_v13 = vmul.f32 %v287_v49, %v262_v10 }
 0x10e   :  { %v266_v15 = vpop.f32.mrb[6].mxu1 }
 0x10f   :  { %332 = vst.msk [vmem:[%s752_s4 + $0x8] sm:$0xff] %vm330_vm1, %v327_v12  ;;  %v324_v16 = vadd.f32 %v315_v14, %v296_v13  ;;  %v267_v17 = vadd.f32 %v386_v1, %v266_v15  ;;  %v268_v18 = vpop.f32.mrb[7].mxu1 }
 0x111   :  { %v328_v19 = vmax.f32 %v324_v16, 0.0  ;;  %v297_v20 = vmul.f32 %v292_v58, %v267_v17 }
 0x113   :  { %333 = vst.msk [vmem:[%s752_s4 + $0x10] sm:$0xff] %vm330_vm1, %v328_v19  ;;  %v325_v22 = vadd.f32 %v320_v21, %v297_v20 }
 0x115   :  { %v329_v23 = vmax.f32 %v325_v22, 0.0 }
 0x117   :  { %334 = vst.msk [vmem:[%s752_s4 + $0x18] sm:$0xff] %vm330_vm1, %v329_v23 }

// kernel: _lambda_.21
= control target key start
LH: loop header
LB: loop body
LE: loop exit
PB: predicated region body
PF: predicated region fallthrough
CT: control target
= control target key end

     0   :  { %v763_v3 = vmov 0   ;;  %vm139_vm0 = vcmask 785408   ;;  %vm476_vm1 = vcmask 15360   ;;  %s1175_s1 = inlined_call_operand.vmem [shape: f32[864,2], index: 1, kind: input, shape index: {}]   ;;  %s1176_s0 = inlined_call_operand.vmem [shape: f32[16,864], index: 0, kind: input, shape index: {}]   ;;  %s1177_s2 = inlined_call_operand.vmem [shape: f32[16,1], index: 2, kind: input, shape index: {}]   ;;  %s1178_s3 = inlined_call_operand.vmem [shape: f32[16,1], index: 3, kind: input, shape index: {}]   ;;  %s1179_s4 = inlined_call_operand.vmem [shape: f32[16,2], index: 4, kind: output, shape index: {}]  }
   0x1   :  { %v47_v0 = vld [vmem:[%s1175_s1 + $0x80] sm:$0xff]  ;;  %v48_v1 = vld [vmem:[%s1175_s1 + $0x88] sm:$0xff]  ;;  %761 = vset.pattern.permute.xlu0 %v763_v3  ;;  %762 = vset.pattern.permute.xlu1 %v763_v3  ;;  %v49_v12 = vld [vmem:[%s1175_s1 + $0x90] sm:$0xff] }
   0x2   :  { %v79_v2 = vld [vmem:[%s1175_s1 + $0x180] sm:$0xff]  ;;  %v640_v4 = vpack.c.bf16 %v48_v1, %v47_v0  ;;  %v80_v5 = vld [vmem:[%s1175_s1 + $0x188] sm:$0xff]  ;;  %v50_v14 = vld [vmem:[%s1175_s1 + $0x98] sm:$0xff] }
   0x3   :  { %v31_v6 = vld [vmem:[%s1175_s1] sm:$0xff]  ;;  %v32_v7 = vld [vmem:[%s1175_s1 + $0x8] sm:$0xff]  ;;  %v672_v8 = vpack.c.bf16 %v80_v5, %v79_v2  ;;  %v81_v15 = vld [vmem:[%s1175_s1 + $0x190] sm:$0xff]  ;;  %v644_v17 = vpack.c.bf16 %v50_v14, %v49_v12 }
   0x4   :  { %v642_v9 = vpack.c.bf16 %v32_v7, %v31_v6  ;;  %v63_v10 = vld [vmem:[%s1175_s1 + $0x100] sm:$0xff]  ;;  %v64_v11 = vld [vmem:[%s1175_s1 + $0x108] sm:$0xff]  ;;  %641 = vmatprep.subr.bf16.mxu0 %v640_v4  ;;  %v82_v16 = vld [vmem:[%s1175_s1 + $0x198] sm:$0xff] }
   0x5   :  { %v674_v13 = vpack.c.bf16 %v64_v11, %v63_v10  ;;  %673 = vmatprep.subr.bf16.mxu1 %v672_v8  ;;  %v676_v18 = vpack.c.bf16 %v82_v16, %v81_v15  ;;  %v33_v19 = vld [vmem:[%s1175_s1 + $0x10] sm:$0xff]  ;;  %v34_v20 = vld [vmem:[%s1175_s1 + $0x18] sm:$0xff]  ;;  %v51_v24 = vld [vmem:[%s1175_s1 + $0xa0] sm:$0xff] }
   0x6   :  { %643 = vmatpush3.bf16.msra.mxu0 %v642_v9  ;;  %v65_v21 = vld [vmem:[%s1175_s1 + $0x110] sm:$0xff]  ;;  %v646_v22 = vpack.c.bf16 %v34_v20, %v33_v19  ;;  %v66_v23 = vld [vmem:[%s1175_s1 + $0x118] sm:$0xff]  ;;  %v52_v25 = vld [vmem:[%s1175_s1 + $0xa8] sm:$0xff] }
   0x7   :  { %675 = vmatpush3.bf16.msra.mxu1 %v674_v13  ;;  %645 = vmatprep.subr.bf16.mxu0 %v644_v17  ;;  %v678_v26 = vpack.c.bf16 %v66_v23, %v65_v21  ;;  %v648_v27 = vpack.c.bf16 %v52_v25, %v51_v24  ;;  %v83_v28 = vld [vmem:[%s1175_s1 + $0x1a0] sm:$0xff]  ;;  %v84_v29 = vld [vmem:[%s1175_s1 + $0x1a8] sm:$0xff]  ;;  %v53_v36 = vld [vmem:[%s1175_s1 + $0xb0] sm:$0xff] }
   0x8   :  { %677 = vmatprep.subr.bf16.mxu1 %v676_v18  ;;  %v35_v30 = vld [vmem:[%s1175_s1 + $0x20] sm:$0xff]  ;;  %v680_v31 = vpack.c.bf16 %v84_v29, %v83_v28  ;;  %v36_v32 = vld [vmem:[%s1175_s1 + $0x28] sm:$0xff]  ;;  %v54_v37 = vld [vmem:[%s1175_s1 + $0xb8] sm:$0xff] }
   0x9   :  { %v67_v33 = vld [vmem:[%s1175_s1 + $0x120] sm:$0xff]  ;;  %v68_v34 = vld [vmem:[%s1175_s1 + $0x128] sm:$0xff]  ;;  %v650_v35 = vpack.c.bf16 %v36_v32, %v35_v30  ;;  %v85_v38 = vld [vmem:[%s1175_s1 + $0x1b0] sm:$0xff]  ;;  %v652_v40 = vpack.c.bf16 %v54_v37, %v53_v36 }
   0xa   :  { %647 = vmatpush3.bf16.msra.mxu0 %v646_v22  ;;  %v682_v39 = vpack.c.bf16 %v68_v34, %v67_v33  ;;  %v86_v41 = vld [vmem:[%s1175_s1 + $0x1b8] sm:$0xff]  ;;  %v37_v42 = vld [vmem:[%s1175_s1 + $0x30] sm:$0xff]  ;;  %v55_v47 = vld [vmem:[%s1175_s1 + $0xc0] sm:$0xff] }
   0xb   :  { %679 = vmatpush3.bf16.msra.mxu1 %v678_v26  ;;  %649 = vmatprep.subr.bf16.mxu0 %v648_v27  ;;  %v38_v43 = vld [vmem:[%s1175_s1 + $0x38] sm:$0xff]  ;;  %v684_v44 = vpack.c.bf16 %v86_v41, %v85_v38  ;;  %v69_v45 = vld [vmem:[%s1175_s1 + $0x130] sm:$0xff]  ;;  %v56_v48 = vld [vmem:[%s1175_s1 + $0xc8] sm:$0xff] }
   0xc   :  { %681 = vmatprep.subr.bf16.mxu1 %v680_v31  ;;  %v70_v46 = vld [vmem:[%s1175_s1 + $0x138] sm:$0xff]  ;;  %v87_v49 = vld [vmem:[%s1175_s1 + $0x1c0] sm:$0xff]  ;;  %v88_v50 = vld [vmem:[%s1175_s1 + $0x1c8] sm:$0xff]  ;;  %v654_v51 = vpack.c.bf16 %v38_v43, %v37_v42  ;;  %v656_v53 = vpack.c.bf16 %v56_v48, %v55_v47 }
   0xd   :  { %v686_v52 = vpack.c.bf16 %v70_v46, %v69_v45  ;;  %v39_v54 = vld [vmem:[%s1175_s1 + $0x40] sm:$0xff]  ;;  %v40_v55 = vld [vmem:[%s1175_s1 + $0x48] sm:$0xff]  ;;  %v688_v57 = vpack.c.bf16 %v88_v50, %v87_v49  ;;  %v57_v59 = vld [vmem:[%s1175_s1 + $0xd0] sm:$0xff] }
   0xe   :  { %651 = vmatpush3.bf16.msra.mxu0 %v650_v35  ;;  %v71_v56 = vld [vmem:[%s1175_s1 + $0x140] sm:$0xff]  ;;  %v72_v58 = vld [vmem:[%s1175_s1 + $0x148] sm:$0xff]  ;;  %v58_v60 = vld [vmem:[%s1175_s1 + $0xd8] sm:$0xff]  ;;  %v658_v63 = vpack.c.bf16 %v40_v55, %v39_v54 }
   0xf   :  { %683 = vmatpush3.bf16.msra.mxu1 %v682_v39  ;;  %653 = vmatprep.subr.bf16.mxu0 %v652_v40  ;;  %v89_v61 = vld [vmem:[%s1175_s1 + $0x1d0] sm:$0xff]  ;;  %v90_v62 = vld [vmem:[%s1175_s1 + $0x1d8] sm:$0xff]  ;;  %v690_v0 = vpack.c.bf16 %v72_v58, %v71_v56  ;;  %v660_v1 = vpack.c.bf16 %v58_v60, %v57_v59  ;;  %v59_v7 = vld [vmem:[%s1175_s1 + $0xe0] sm:$0xff] }
  0x10   :  { %685 = vmatprep.subr.bf16.mxu1 %v684_v44  ;;  %v41_v2 = vld [vmem:[%s1175_s1 + $0x50] sm:$0xff]  ;;  %v42_v3 = vld [vmem:[%s1175_s1 + $0x58] sm:$0xff]  ;;  %v692_v5 = vpack.c.bf16 %v90_v62, %v89_v61  ;;  %v60_v8 = vld [vmem:[%s1175_s1 + $0xe8] sm:$0xff] }
  0x11   :  { %v73_v4 = vld [vmem:[%s1175_s1 + $0x150] sm:$0xff]  ;;  %v74_v6 = vld [vmem:[%s1175_s1 + $0x158] sm:$0xff]  ;;  %v91_v9 = vld [vmem:[%s1175_s1 + $0x1e0] sm:$0xff]  ;;  %v662_v11 = vpack.c.bf16 %v42_v3, %v41_v2  ;;  %v664_v15 = vpack.c.bf16 %v60_v8, %v59_v7 }
  0x12   :  { %655 = vmatpush3.bf16.msra.mxu0 %v654_v51  ;;  %v92_v10 = vld [vmem:[%s1175_s1 + $0x1e8] sm:$0xff]  ;;  %v43_v12 = vld [vmem:[%s1175_s1 + $0x60] sm:$0xff]  ;;  %v694_v14 = vpack.c.bf16 %v74_v6, %v73_v4  ;;  %v20_v18 = vld [vmem:[%s1176_s0 + $0x18] sm:$0xff] }
  0x13   :  { %687 = vmatpush3.bf16.msra.mxu1 %v686_v52  ;;  %657 = vmatprep.subr.bf16.mxu0 %v656_v53  ;;  %v44_v13 = vld [vmem:[%s1175_s1 + $0x68] sm:$0xff]  ;;  %v75_v16 = vld [vmem:[%s1175_s1 + $0x160] sm:$0xff]  ;;  %v696_v19 = vpack.c.bf16 %v92_v10, %v91_v9  ;;  %v61_v21 = vld [vmem:[%s1175_s1 + $0xf0] sm:$0xff] }
  0x14   :  { %689 = vmatprep.subr.bf16.mxu1 %v688_v57  ;;  %v18_v17 = vld [vmem:[%s1176_s0 + $0x8] sm:$0xff]  ;;  %v62_v22 = vld [vmem:[%s1175_s1 + $0xf8] sm:$0xff]  ;;  %v93_v23 = vld [vmem:[%s1175_s1 + $0x1f0] sm:$0xff]  ;;  %285 = vmatprep.mubr.f32.mxu1 %v20_v18  ;;  %v666_v25 = vpack.c.bf16 %v44_v13, %v43_v12 }
  0x15   :  { %v76_v20 = vld [vmem:[%s1175_s1 + $0x168] sm:$0xff]  ;;  %210 = vmatprep.mubr.f32.mxu0 %v18_v17  ;;  %v94_v24 = vld [vmem:[%s1175_s1 + $0x1f8] sm:$0xff]  ;;  %v668_v27 = vpack.c.bf16 %v62_v22, %v61_v21  ;;  %v45_v28 = vld [vmem:[%s1175_s1 + $0x70] sm:$0xff] }
  0x16   :  { %659 = vmatpush3.bf16.msra.mxu0 %v658_v63  ;;  %v698_v26 = vpack.c.bf16 %v76_v20, %v75_v16  ;;  %v46_v29 = vld [vmem:[%s1175_s1 + $0x78] sm:$0xff]  ;;  %v77_v30 = vld [vmem:[%s1175_s1 + $0x170] sm:$0xff]  ;;  %v700_v31 = vpack.c.bf16 %v94_v24, %v93_v23  ;;  %v111_v33 = vld [vmem:[%s1175_s1 + $0x280] sm:$0xff] }
  0x17   :  { %691 = vmatpush3.bf16.msra.mxu1 %v690_v0  ;;  %661 = vmatprep.subr.bf16.mxu0 %v660_v1  ;;  %v78_v32 = vld [vmem:[%s1175_s1 + $0x178] sm:$0xff]  ;;  %v112_v34 = vld [vmem:[%s1175_s1 + $0x288] sm:$0xff]  ;;  %v127_v35 = vld [vmem:[%s1175_s1 + $0x300] sm:$0xff]  ;;  %v670_v37 = vpack.c.bf16 %v46_v29, %v45_v28 }
  0x18   :  { %693 = vmatprep.subr.bf16.mxu1 %v692_v5  ;;  %v128_v36 = vld [vmem:[%s1175_s1 + $0x308] sm:$0xff]  ;;  %v702_v38 = vpack.c.bf16 %v78_v32, %v77_v30  ;;  %v704_v39 = vpack.c.bf16 %v112_v34, %v111_v33  ;;  %v95_v40 = vld [vmem:[%s1175_s1 + $0x200] sm:$0xff]  ;;  %v113_v42 = vld [vmem:[%s1175_s1 + $0x290] sm:$0xff] }
  0x19   :  { %v96_v41 = vld [vmem:[%s1175_s1 + $0x208] sm:$0xff]  ;;  %v114_v43 = vld [vmem:[%s1175_s1 + $0x298] sm:$0xff]  ;;  %v736_v44 = vpack.c.bf16 %v128_v36, %v127_v35  ;;  %v129_v45 = vld [vmem:[%s1175_s1 + $0x310] sm:$0xff] }
  0x1a   :  { %663 = vmatpush3.bf16.msra.mxu0 %v662_v11  ;;  %v130_v46 = vld [vmem:[%s1175_s1 + $0x318] sm:$0xff]  ;;  %v17_v47 = vld [vmem:[%s1176_s0] sm:$0xff]  ;;  %v706_v48 = vpack.c.bf16 %v96_v41, %v95_v40  ;;  %v19_v49 = vld [vmem:[%s1176_s0 + $0x10] sm:$0xff]  ;;  %v708_v50 = vpack.c.bf16 %v114_v43, %v113_v42 }
  0x1b   :  { %695 = vmatpush3.bf16.msra.mxu1 %v694_v14  ;;  %665 = vmatprep.subr.bf16.mxu0 %v664_v15  ;;  %v97_v51 = vld [vmem:[%s1175_s1 + $0x210] sm:$0xff]  ;;  %v98_v52 = vld [vmem:[%s1175_s1 + $0x218] sm:$0xff]  ;;  %v115_v53 = vld [vmem:[%s1175_s1 + $0x2a0] sm:$0xff]  ;;  %v740_v55 = vpack.c.bf16 %v130_v46, %v129_v45 }
  0x1c   :  { %697 = vmatprep.subr.bf16.mxu1 %v696_v19  ;;  %v116_v54 = vld [vmem:[%s1175_s1 + $0x2a8] sm:$0xff]  ;;  %v131_v56 = vld [vmem:[%s1175_s1 + $0x320] sm:$0xff]  ;;  %v710_v59 = vpack.c.bf16 %v98_v52, %v97_v51  ;;  %v27_v60 = vld [vmem:[%s1176_s0 + $0x50] sm:$0xff] }
  0x1d   :  { %v132_v57 = vld [vmem:[%s1175_s1 + $0x328] sm:$0xff]  ;;  %v25_v58 = vld [vmem:[%s1176_s0 + $0x40] sm:$0xff]  ;;  %v24_v61 = vld [vmem:[%s1176_s0 + $0x38] sm:$0xff]  ;;  %v712_v62 = vpack.c.bf16 %v116_v54, %v115_v53 }
  0x1e   :  { %667 = vmatpush3.bf16.msra.mxu0 %v666_v25  ;;  %v99_v63 = vld [vmem:[%s1175_s1 + $0x220] sm:$0xff]  ;;  %v100_v0 = vld [vmem:[%s1175_s1 + $0x228] sm:$0xff]  ;;  %v117_v2 = vld [vmem:[%s1175_s1 + $0x2b0] sm:$0xff]  ;;  %v744_v4 = vpack.c.bf16 %v132_v57, %v131_v56 }
  0x1f   :  { %699 = vmatpush3.bf16.msra.mxu1 %v698_v26  ;;  %669 = vmatprep.subr.bf16.mxu0 %v668_v27  ;;  %v26_v1 = vld [vmem:[%s1176_s0 + $0x48] sm:$0xff]  ;;  %v118_v3 = vld [vmem:[%s1175_s1 + $0x2b8] sm:$0xff]  ;;  %v133_v5 = vld [vmem:[%s1175_s1 + $0x330] sm:$0xff]  ;;  %v714_v8 = vpack.c.bf16 %v100_v0, %v99_v63 }
  0x20   :  { %701 = vmatprep.subr.bf16.mxu1 %v700_v31  ;;  %v134_v6 = vld [vmem:[%s1175_s1 + $0x338] sm:$0xff]  ;;  %v22_v7 = vld [vmem:[%s1176_s0 + $0x28] sm:$0xff]  ;;  %v23_v9 = vld [vmem:[%s1176_s0 + $0x30] sm:$0xff]  ;;  %v716_v11 = vpack.c.bf16 %v118_v3, %v117_v2 }
  0x21   :  { %v446_v10 = vld [vmem:[%s1177_s2] sm:$0xff]  ;;  %v101_v12 = vld [vmem:[%s1175_s1 + $0x230] sm:$0xff]  ;;  %v102_v13 = vld [vmem:[%s1175_s1 + $0x238] sm:$0xff]  ;;  %v748_v17 = vpack.c.bf16 %v134_v6, %v133_v5 }
  0x22   :  { %671 = vmatpush3.bf16.msra.mxu0 %v670_v37  ;;  %v460_v14 = vld [vmem:[%s1178_s3] sm:$0xff]  ;;  %v120_v16 = vld [vmem:[%s1175_s1 + $0x2c8] sm:$0xff]  ;;  %450 = vperm.xlu0 %761, %v446_v10   ;;  %v718_v20 = vpack.c.bf16 %v102_v13, %v101_v12  ;;  %v121_v26 = vld [vmem:[%s1175_s1 + $0x2d0] sm:$0xff] }
  0x23   :  { %703 = vmatpush3.bf16.msra.mxu1 %v702_v38  ;;  %705 = vmatprep.subr.bf16.mxu0 %v704_v39  ;;  %v119_v15 = vld [vmem:[%s1175_s1 + $0x2c0] sm:$0xff]  ;;  %v136_v19 = vld [vmem:[%s1175_s1 + $0x348] sm:$0xff]  ;;  %v122_v27 = vld [vmem:[%s1175_s1 + $0x2d8] sm:$0xff] }
  0x24   :  { %737 = vmatprep.subr.bf16.mxu1 %v736_v44  ;;  %v135_v18 = vld [vmem:[%s1175_s1 + $0x340] sm:$0xff]  ;;  %464 = vperm.xlu1 %762, %v460_v14   ;;  %v447_v21 = vld [vmem:[%s1177_s2 + $0x8] sm:$0xff]  ;;  %v720_v22 = vpack.c.bf16 %v120_v16, %v119_v15  ;;  %v137_v29 = vld [vmem:[%s1175_s1 + $0x350] sm:$0xff]  ;;  %v724_v32 = vpack.c.bf16 %v122_v27, %v121_v26 }
  0x25   :  { %211 = vmatmul.mubr.f32.vlgmr.msra.gmra.mrb[0].mxu0 %v17_v47  ;;  %v103_v23 = vld [vmem:[%s1175_s1 + $0x240] sm:$0xff]  ;;  %v104_v24 = vld [vmem:[%s1175_s1 + $0x248] sm:$0xff]  ;;  %v752_v28 = vpack.c.bf16 %v136_v19, %v135_v18  ;;  %v138_v30 = vld [vmem:[%s1175_s1 + $0x358] sm:$0xff] }
  0x26   :  { %286 = vmatmul.mubr.f32.vlgmr.msra.gmra.mrb[0].mxu1 %v19_v49  ;;  %707 = vmatpush3.bf16.msra.mxu0 %v706_v48  ;;  %v461_v25 = vld [vmem:[%s1178_s3 + $0x8] sm:$0xff]  ;;  %v722_v31 = vpack.c.bf16 %v104_v24, %v103_v23  ;;  %v105_v33 = vld [vmem:[%s1175_s1 + $0x250] sm:$0xff]  ;;  %v106_v34 = vld [vmem:[%s1175_s1 + $0x258] sm:$0xff]  ;;  %v756_v37 = vpack.c.bf16 %v138_v30, %v137_v29 }
  0x27   :  { %709 = vmatprep.subr.bf16.mxu0 %v708_v50  ;;  %739 = vmatpush3.bf16.msra.mxu1 %v736_v44  ;;  %v123_v35 = vld [vmem:[%s1175_s1 + $0x2e0] sm:$0xff]  ;;  %v124_v36 = vld [vmem:[%s1175_s1 + $0x2e8] sm:$0xff]  ;;  %v726_v38 = vpack.c.bf16 %v106_v34, %v105_v33  ;;  %v125_v42 = vld [vmem:[%s1175_s1 + $0x2f0] sm:$0xff] }
  0x28   :  { %741 = vmatprep.subr.bf16.mxu1 %v740_v55  ;;  %215 = vmatprep.mubr.f32.mxu0 %v25_v58  ;;  %v728_v39 = vpack.c.bf16 %v124_v36, %v123_v35  ;;  %v107_v40 = vld [vmem:[%s1175_s1 + $0x260] sm:$0xff]  ;;  %v108_v41 = vld [vmem:[%s1175_s1 + $0x268] sm:$0xff]  ;;  %v126_v43 = vld [vmem:[%s1175_s1 + $0x2f8] sm:$0xff] }
  0x29   :  { %290 = vmatprep.mubr.f32.mxu1 %v27_v60  ;;  %216 = vmatmul.mubr.f32.gmra.mrb[2].mxu0 %v24_v61  ;;  %v730_v44 = vpack.c.bf16 %v108_v41, %v107_v40  ;;  %v732_v45 = vpack.c.bf16 %v126_v43, %v125_v42  ;;  %v109_v46 = vld [vmem:[%s1175_s1 + $0x270] sm:$0xff]  ;;  %v110_v47 = vld [vmem:[%s1175_s1 + $0x278] sm:$0xff]  ;;  %v30_v48 = vld [vmem:[%s1176_s0 + $0x68] sm:$0xff] }
  0x2a   :  { %711 = vmatpush3.bf16.msra.mxu0 %v710_v59  ;;  %291 = vmatmul.mubr.f32.gmra.mrb[2].mxu1 %v26_v1  ;;  %v734_v49 = vpack.c.bf16 %v110_v47, %v109_v46  ;;  %v21_v50 = vld [vmem:[%s1176_s0 + $0x20] sm:$0xff]  ;;  %v28_v52 = vld [vmem:[%s1176_s0 + $0x58] sm:$0xff] }
  0x2b   :  { %713 = vmatprep.subr.bf16.mxu0 %v712_v62  ;;  %743 = vmatpush3.bf16.msra.mxu1 %v740_v55  ;;  %v29_v51 = vld [vmem:[%s1176_s0 + $0x60] sm:$0xff] }
  0x2c   :  { %745 = vmatprep.subr.bf16.mxu1 %v744_v4  ;;  %360 = vmatprep.mubr.f32.mxu0 %v22_v7 }
  0x2d   :  { %637 = vmatprep.mubr.msk.f32.mxu1 %vm139_vm0, %v23_v9  ;;  %455 = vperm.xlu0 %761, %v447_v21  }
  0x2e   :  { %715 = vmatpush3.bf16.msra.mxu0 %v714_v8  ;;  %469 = vperm.xlu1 %762, %v461_v25  }
  0x2f   :  { %717 = vmatprep.subr.bf16.mxu0 %v716_v11  ;;  %747 = vmatpush3.bf16.msra.mxu1 %v744_v4 }
  0x30   :  { %749 = vmatprep.subr.bf16.mxu1 %v748_v17 }
  0x32   :  { %719 = vmatpush3.bf16.msra.mxu0 %v718_v20 }
  0x33   :  { %721 = vmatprep.subr.bf16.mxu0 %v720_v22  ;;  %751 = vmatpush3.bf16.msra.mxu1 %v748_v17 }
  0x34   :  { %753 = vmatprep.subr.bf16.mxu1 %v752_v28 }
  0x36   :  { %723 = vmatpush3.bf16.msra.mxu0 %v722_v31 }
  0x37   :  { %725 = vmatprep.subr.bf16.mxu0 %v724_v32  ;;  %755 = vmatpush3.bf16.msra.mxu1 %v752_v28 }
  0x38   :  { %757 = vmatprep.subr.bf16.mxu1 %v756_v37 }
  0x3a   :  { %727 = vmatpush3.bf16.msra.mxu0 %v726_v38 }
  0x3b   :  { %729 = vmatprep.subr.bf16.mxu0 %v728_v39  ;;  %759 = vmatpush3.bf16.msra.mxu1 %v756_v37 }
  0x3e   :  { %731 = vmatpush3.bf16.msra.mxu0 %v730_v44  ;;  %638 = vmatmul.mubr.msk.f32.vlgmr.msra.gmra.mrb[4].mxu1 %vm139_vm0, %v30_v48 }
  0x3f   :  { %733 = vmatprep.subr.bf16.mxu0 %v732_v45 }
  0x42   :  { %735 = vmatpush3.bf16.msra.mxu0 %v734_v49 }
  0x45   :  { %361 = vmatmul.mubr.f32.vlgmr.msra.gmra.mrb[4].mxu0 %v21_v50 }
  0x46   :  { %365 = vmatprep.mubr.f32.mxu0 %v29_v51 }
  0x49   :  { %366 = vmatmul.mubr.f32.gmra.mrb[6].mxu0 %v28_v52 }
  0xa1   :  { %v451_v10 = vpop.permute.xlu0 %450 }
  0xa3   :  { %v465_v14 = vpop.permute.xlu1 %464 }
  0xac   :  { %v456_v19 = vpop.permute.xlu0 %455 }
  0xad   :  { %v470_v22 = vpop.permute.xlu1 %469 }
  0xf8   :  { %v517_v53 = vpop.f32.mrb[0].mxu0 }
  0xf9   :  { %v555_v54 = vpop.f32.mrb[0].mxu1  ;;  %v518_v55 = vpop.f32.mrb[1].mxu0 }
  0xfa   :  { %v519_v56 = vadd.f32 %v518_v55, %v517_v53  ;;  %v556_v57 = vpop.f32.mrb[1].mxu1 }
  0xfb   :  { %v557_v58 = vadd.f32 %v556_v57, %v555_v54 }
  0xfc   :  { %v520_v59 = vpop.f32.mrb[2].mxu0 }
  0xfd   :  { %v288_v60 = vadd.f32 %v557_v58, %v519_v56  ;;  %v558_v61 = vpop.f32.mrb[2].mxu1  ;;  %v521_v62 = vpop.f32.mrb[3].mxu0 }
  0xfe   :  { %v522_v63 = vadd.f32 %v521_v62, %v520_v59  ;;  %v559_v0 = vpop.f32.mrb[3].mxu1 }
  0xff   :  { %v560_v1 = vadd.f32 %v559_v0, %v558_v61 }
 0x101   :  { %v293_v2 = vadd.f32 %v560_v1, %v522_v63 }
 0x111   :  { %v639_v3 = vpop.f32.mrb[4].mxu1 }
 0x112   :  { %v437_v4 = vpop.f32.mrb[5].mxu1 }
 0x118   :  { %v593_v5 = vpop.f32.mrb[4].mxu0 }
 0x119   :  { %v594_v6 = vpop.f32.mrb[5].mxu0 }
 0x11a   :  { %v595_v7 = vadd.f32 %v594_v6, %v593_v5 }
 0x11c   :  { %v596_v8 = vpop.f32.mrb[6].mxu0  ;;  %v363_v9 = vadd.f32 %v595_v7, %v288_v60 }
 0x11d   :  { %v597_v11 = vpop.f32.mrb[7].mxu0 }
 0x11e   :  { %v598_v12 = vadd.f32 %v597_v11, %v596_v8  ;;  %v438_v13 = vadd.f32 %v437_v4, %v363_v9 }
 0x120   :  { %v368_v15 = vadd.f32 %v598_v12, %v293_v2  ;;  %v458_v16 = vmul.f32 %v451_v10, %v438_v13 }
 0x122   :  { %v472_v17 = vadd.f32 %v465_v14, %v458_v16  ;;  %v443_v18 = vadd.f32 %v639_v3, %v368_v15 }
 0x124   :  { %v474_v20 = vmax.f32 %v472_v17, 0.0  ;;  %v459_v21 = vmul.f32 %v456_v19, %v443_v18 }
 0x126   :  { %v473_v23 = vadd.f32 %v470_v22, %v459_v21  ;;  %477 = vst.msk [vmem:[%s1179_s4] sm:$0xff] %vm476_vm1, %v474_v20 }
 0x128   :  { %v475_v24 = vmax.f32 %v473_v23, 0.0 }
 0x12a   :  { %478 = vst.msk [vmem:[%s1179_s4 + $0x8] sm:$0xff] %vm476_vm1, %v475_v24 }

// kernel: _lambda_.23
= control target key start
LH: loop header
LB: loop body
LE: loop exit
PB: predicated region body
PF: predicated region fallthrough
CT: control target
= control target key end

     0   :  { %v344_v0 = vmov 0.0|0.0   ;;  %v345_v4 = vmov 0   ;;  %vm75_vm0 = vcmask 392192   ;;  %vm234_vm1 = vcmask 130048   ;;  %s566_s1 = inlined_call_operand.vmem [shape: f32[432,16], index: 1, kind: input, shape index: {}]   ;;  %s567_s0 = inlined_call_operand.vmem [shape: f32[8,432], index: 0, kind: input, shape index: {}]   ;;  %s568_s2 = inlined_call_operand.vmem [shape: f32[8,1], index: 2, kind: input, shape index: {}]   ;;  %s569_s3 = inlined_call_operand.vmem [shape: f32[8,1], index: 3, kind: input, shape index: {}]   ;;  %s570_s4 = inlined_call_operand.vmem [shape: f32[8,16], index: 4, kind: output, shape index: {}]  }
   0x1   :  { %308 = vmatprep.subr.bf16.mxu1 %v344_v0  ;;  %v53_v1 = vld [vmem:[%s566_s1 + $0x100] sm:$0xff]  ;;  %v54_v2 = vld [vmem:[%s566_s1 + $0x108] sm:$0xff]  ;;  %v55_v3 = vld [vmem:[%s566_s1 + $0x110] sm:$0xff]  ;;  %343 = vset.pattern.permute.xlu0 %v345_v4 }
   0x2   :  { %v309_v5 = vpack.c.bf16 %v54_v2, %v53_v1  ;;  %v56_v6 = vld [vmem:[%s566_s1 + $0x118] sm:$0xff]  ;;  %v37_v7 = vld [vmem:[%s566_s1 + $0x80] sm:$0xff]  ;;  %v38_v8 = vld [vmem:[%s566_s1 + $0x88] sm:$0xff] }
   0x3   :  { %v276_v9 = vpack.c.bf16 %v38_v8, %v37_v7  ;;  %v21_v10 = vld [vmem:[%s566_s1] sm:$0xff]  ;;  %v22_v11 = vld [vmem:[%s566_s1 + $0x8] sm:$0xff]  ;;  %v312_v12 = vpack.c.bf16 %v56_v6, %v55_v3  ;;  %v39_v15 = vld [vmem:[%s566_s1 + $0x90] sm:$0xff] }
   0x4   :  { %310 = vmatpush1.bf16.msra.mxu1 %v309_v5  ;;  %v278_v13 = vpack.c.bf16 %v22_v11, %v21_v10  ;;  %v57_v14 = vld [vmem:[%s566_s1 + $0x120] sm:$0xff]  ;;  %v40_v16 = vld [vmem:[%s566_s1 + $0x98] sm:$0xff]  ;;  %v58_v17 = vld [vmem:[%s566_s1 + $0x128] sm:$0xff] }
   0x5   :  { %311 = vmatprep.subr.bf16.mxu1 %v344_v0  ;;  %277 = vmatprep.subr.bf16.mxu0 %v276_v9  ;;  %v280_v18 = vpack.c.bf16 %v40_v16, %v39_v15  ;;  %v23_v19 = vld [vmem:[%s566_s1 + $0x10] sm:$0xff]  ;;  %v24_v20 = vld [vmem:[%s566_s1 + $0x18] sm:$0xff]  ;;  %v41_v22 = vld [vmem:[%s566_s1 + $0xa0] sm:$0xff]  ;;  %v315_v27 = vpack.c.bf16 %v58_v17, %v57_v14 }
   0x6   :  { %279 = vmatpush3.bf16.msra.mxu0 %v278_v13  ;;  %v282_v21 = vpack.c.bf16 %v24_v20, %v23_v19  ;;  %v42_v23 = vld [vmem:[%s566_s1 + $0xa8] sm:$0xff]  ;;  %v25_v25 = vld [vmem:[%s566_s1 + $0x20] sm:$0xff]  ;;  %v43_v28 = vld [vmem:[%s566_s1 + $0xb0] sm:$0xff] }
   0x7   :  { %281 = vmatprep.subr.bf16.mxu0 %v280_v18  ;;  %v284_v24 = vpack.c.bf16 %v42_v23, %v41_v22  ;;  %v26_v26 = vld [vmem:[%s566_s1 + $0x28] sm:$0xff]  ;;  %v44_v29 = vld [vmem:[%s566_s1 + $0xb8] sm:$0xff]  ;;  %v59_v30 = vld [vmem:[%s566_s1 + $0x130] sm:$0xff] }
   0x8   :  { %313 = vmatpush1.bf16.msra.mxu1 %v312_v12  ;;  %v60_v31 = vld [vmem:[%s566_s1 + $0x138] sm:$0xff]  ;;  %v286_v32 = vpack.c.bf16 %v26_v26, %v25_v25  ;;  %v288_v33 = vpack.c.bf16 %v44_v29, %v43_v28  ;;  %v27_v34 = vld [vmem:[%s566_s1 + $0x30] sm:$0xff]  ;;  %v45_v37 = vld [vmem:[%s566_s1 + $0xc0] sm:$0xff] }
   0x9   :  { %314 = vmatprep.subr.bf16.mxu1 %v344_v0  ;;  %v28_v35 = vld [vmem:[%s566_s1 + $0x38] sm:$0xff]  ;;  %v318_v36 = vpack.c.bf16 %v60_v31, %v59_v30  ;;  %v46_v38 = vld [vmem:[%s566_s1 + $0xc8] sm:$0xff]  ;;  %v61_v39 = vld [vmem:[%s566_s1 + $0x140] sm:$0xff] }
   0xa   :  { %283 = vmatpush3.bf16.msra.mxu0 %v282_v21  ;;  %v62_v40 = vld [vmem:[%s566_s1 + $0x148] sm:$0xff]  ;;  %v290_v41 = vpack.c.bf16 %v28_v35, %v27_v34  ;;  %v292_v42 = vpack.c.bf16 %v46_v38, %v45_v37  ;;  %v29_v43 = vld [vmem:[%s566_s1 + $0x40] sm:$0xff]  ;;  %v47_v46 = vld [vmem:[%s566_s1 + $0xd0] sm:$0xff] }
   0xb   :  { %285 = vmatprep.subr.bf16.mxu0 %v284_v24  ;;  %v30_v44 = vld [vmem:[%s566_s1 + $0x48] sm:$0xff]  ;;  %v321_v45 = vpack.c.bf16 %v62_v40, %v61_v39  ;;  %v48_v47 = vld [vmem:[%s566_s1 + $0xd8] sm:$0xff]  ;;  %v63_v48 = vld [vmem:[%s566_s1 + $0x150] sm:$0xff] }
   0xc   :  { %316 = vmatpush1.bf16.msra.mxu1 %v315_v27  ;;  %v64_v49 = vld [vmem:[%s566_s1 + $0x158] sm:$0xff]  ;;  %v294_v50 = vpack.c.bf16 %v30_v44, %v29_v43  ;;  %v18_v51 = vld [vmem:[%s567_s0 + $0x8] sm:$0xff]  ;;  %v296_v52 = vpack.c.bf16 %v48_v47, %v47_v46  ;;  %v31_v53 = vld [vmem:[%s566_s1 + $0x50] sm:$0xff] }
   0xd   :  { %317 = vmatprep.subr.bf16.mxu1 %v344_v0  ;;  %v32_v54 = vld [vmem:[%s566_s1 + $0x58] sm:$0xff]  ;;  %143 = vmatprep.mubr.f32.mxu0 %v18_v51  ;;  %v324_v56 = vpack.c.bf16 %v64_v49, %v63_v48  ;;  %v49_v57 = vld [vmem:[%s566_s1 + $0xe0] sm:$0xff]  ;;  %v50_v58 = vld [vmem:[%s566_s1 + $0xe8] sm:$0xff] }
   0xe   :  { %287 = vmatpush3.bf16.msra.mxu0 %v286_v32  ;;  %v20_v55 = vld [vmem:[%s567_s0 + $0x18] sm:$0xff]  ;;  %v219_v59 = vld [vmem:[%s568_s2] sm:$0xff]  ;;  %v66_v61 = vld [vmem:[%s566_s1 + $0x168] sm:$0xff]  ;;  %v298_v62 = vpack.c.bf16 %v32_v54, %v31_v53  ;;  %v300_v1 = vpack.c.bf16 %v50_v58, %v49_v57 }
   0xf   :  { %289 = vmatprep.subr.bf16.mxu0 %v288_v33  ;;  %240 = vmatprep.mubr.msk.f32.mxu1 %vm75_vm0, %v20_v55  ;;  %v65_v60 = vld [vmem:[%s566_s1 + $0x160] sm:$0xff]  ;;  %v34_v3 = vld [vmem:[%s566_s1 + $0x68] sm:$0xff]  ;;  %v51_v5 = vld [vmem:[%s566_s1 + $0xf0] sm:$0xff] }
  0x10   :  { %319 = vmatpush1.bf16.msra.mxu1 %v318_v36  ;;  %222 = vperm.xlu0 %343, %v219_v59   ;;  %v226_v63 = vld [vmem:[%s569_s3] sm:$0xff]  ;;  %v327_v4 = vpack.c.bf16 %v66_v61, %v65_v60  ;;  %v52_v6 = vld [vmem:[%s566_s1 + $0xf8] sm:$0xff]  ;;  %v67_v7 = vld [vmem:[%s566_s1 + $0x170] sm:$0xff] }
  0x11   :  { %320 = vmatprep.subr.bf16.mxu1 %v344_v0  ;;  %v33_v2 = vld [vmem:[%s566_s1 + $0x60] sm:$0xff]  ;;  %v68_v8 = vld [vmem:[%s566_s1 + $0x178] sm:$0xff]  ;;  %v304_v10 = vpack.c.bf16 %v52_v6, %v51_v5  ;;  %v35_v11 = vld [vmem:[%s566_s1 + $0x70] sm:$0xff] }
  0x12   :  { %291 = vmatpush3.bf16.msra.mxu0 %v290_v41  ;;  %v302_v9 = vpack.c.bf16 %v34_v3, %v33_v2  ;;  %v36_v12 = vld [vmem:[%s566_s1 + $0x78] sm:$0xff]  ;;  %v330_v13 = vpack.c.bf16 %v68_v8, %v67_v7  ;;  %v69_v14 = vld [vmem:[%s566_s1 + $0x180] sm:$0xff]  ;;  %v70_v15 = vld [vmem:[%s566_s1 + $0x188] sm:$0xff] }
  0x13   :  { %293 = vmatprep.subr.bf16.mxu0 %v292_v42  ;;  %v306_v16 = vpack.c.bf16 %v36_v12, %v35_v11  ;;  %v333_v17 = vpack.c.bf16 %v70_v15, %v69_v14  ;;  %v71_v18 = vld [vmem:[%s566_s1 + $0x190] sm:$0xff]  ;;  %v72_v19 = vld [vmem:[%s566_s1 + $0x198] sm:$0xff]  ;;  %v17_v20 = vld [vmem:[%s567_s0] sm:$0xff] }
  0x14   :  { %322 = vmatpush1.bf16.msra.mxu1 %v321_v45  ;;  %229 = vperm.xlu0 %343, %v226_v63   ;;  %v336_v21 = vpack.c.bf16 %v72_v19, %v71_v18  ;;  %v73_v22 = vld [vmem:[%s566_s1 + $0x1a0] sm:$0xff]  ;;  %v74_v23 = vld [vmem:[%s566_s1 + $0x1a8] sm:$0xff]  ;;  %v19_v25 = vld [vmem:[%s567_s0 + $0x10] sm:$0xff] }
  0x15   :  { %323 = vmatprep.subr.bf16.mxu1 %v344_v0  ;;  %v339_v24 = vpack.c.bf16 %v74_v23, %v73_v22 }
  0x16   :  { %295 = vmatpush3.bf16.msra.mxu0 %v294_v50 }
  0x17   :  { %297 = vmatprep.subr.bf16.mxu0 %v296_v52 }
  0x18   :  { %325 = vmatpush1.bf16.msra.mxu1 %v324_v56 }
  0x19   :  { %326 = vmatprep.subr.bf16.mxu1 %v344_v0 }
  0x1a   :  { %299 = vmatpush3.bf16.msra.mxu0 %v298_v62 }
  0x1b   :  { %301 = vmatprep.subr.bf16.mxu0 %v300_v1 }
  0x1c   :  { %328 = vmatpush1.bf16.msra.mxu1 %v327_v4 }
  0x1d   :  { %329 = vmatprep.subr.bf16.mxu1 %v344_v0 }
  0x1e   :  { %303 = vmatpush3.bf16.msra.mxu0 %v302_v9 }
  0x1f   :  { %305 = vmatprep.subr.bf16.mxu0 %v304_v10 }
  0x20   :  { %331 = vmatpush1.bf16.msra.mxu1 %v330_v13 }
  0x21   :  { %332 = vmatprep.subr.bf16.mxu1 %v344_v0 }
  0x22   :  { %307 = vmatpush3.bf16.msra.mxu0 %v306_v16 }
  0x24   :  { %334 = vmatpush1.bf16.msra.mxu1 %v333_v17 }
  0x25   :  { %335 = vmatprep.subr.bf16.mxu1 %v344_v0  ;;  %144 = vmatmul.mubr.f32.vlgmr.msra.gmra.mrb[0].mxu0 %v17_v20 }
  0x28   :  { %337 = vmatpush1.bf16.msra.mxu1 %v336_v21 }
  0x29   :  { %338 = vmatprep.subr.bf16.mxu1 %v344_v0 }
  0x2c   :  { %340 = vmatpush1.bf16.msra.mxu1 %v339_v24 }
  0x2f   :  { %214 = vmatmul.mubr.f32.vlgmr.msra.gmra.mrb[0].mxu1 %v19_v25 }
  0x8f   :  { %v223_v29 = vpop.permute.xlu0 %222 }
  0x93   :  { %v230_v34 = vpop.permute.xlu0 %229 }
  0xf8   :  { %v273_v26 = vpop.f32.mrb[0].mxu0 }
  0xf9   :  { %v274_v27 = vpop.f32.mrb[1].mxu0 }
  0xfa   :  { %v275_v28 = vadd.f32 %v274_v27, %v273_v26 }
 0x102   :  { %v215_v30 = vpop.f32.mrb[0].mxu1 }
 0x103   :  { %v216_v31 = vadd.f32 %v275_v28, %v215_v30  ;;  %v217_v32 = vpop.f32.mrb[1].mxu1 }
 0x105   :  { %v225_v33 = vmul.f32 %v223_v29, %v216_v31 }
 0x107   :  { %v232_v35 = vadd.f32 %v230_v34, %v225_v33 }
 0x109   :  { %v233_v36 = vmax.f32 %v232_v35, 0.0 }
 0x10b   :  { %235 = vst.msk [vmem:[%s570_s4] sm:$0xff] %vm234_vm1, %v233_v36 }

// kernel: _lambda_.22
= control target key start
LH: loop header
LB: loop body
LE: loop exit
PB: predicated region body
PF: predicated region fallthrough
CT: control target
= control target key end

     0   :  { %v763_v3 = vmov 0   ;;  %vm139_vm0 = vcmask 785408   ;;  %vm476_vm1 = vcmask 130048   ;;  %s1175_s1 = inlined_call_operand.vmem [shape: f32[864,16], index: 1, kind: input, shape index: {}]   ;;  %s1176_s0 = inlined_call_operand.vmem [shape: f32[16,864], index: 0, kind: input, shape index: {}]   ;;  %s1177_s2 = inlined_call_operand.vmem [shape: f32[16,1], index: 2, kind: input, shape index: {}]   ;;  %s1178_s3 = inlined_call_operand.vmem [shape: f32[16,1], index: 3, kind: input, shape index: {}]   ;;  %s1179_s4 = inlined_call_operand.vmem [shape: f32[16,16], index: 4, kind: output, shape index: {}]  }
   0x1   :  { %v47_v0 = vld [vmem:[%s1175_s1 + $0x80] sm:$0xff]  ;;  %v48_v1 = vld [vmem:[%s1175_s1 + $0x88] sm:$0xff]  ;;  %761 = vset.pattern.permute.xlu0 %v763_v3  ;;  %762 = vset.pattern.permute.xlu1 %v763_v3  ;;  %v49_v12 = vld [vmem:[%s1175_s1 + $0x90] sm:$0xff] }
   0x2   :  { %v79_v2 = vld [vmem:[%s1175_s1 + $0x180] sm:$0xff]  ;;  %v640_v4 = vpack.c.bf16 %v48_v1, %v47_v0  ;;  %v80_v5 = vld [vmem:[%s1175_s1 + $0x188] sm:$0xff]  ;;  %v50_v14 = vld [vmem:[%s1175_s1 + $0x98] sm:$0xff] }
   0x3   :  { %v31_v6 = vld [vmem:[%s1175_s1] sm:$0xff]  ;;  %v32_v7 = vld [vmem:[%s1175_s1 + $0x8] sm:$0xff]  ;;  %v672_v8 = vpack.c.bf16 %v80_v5, %v79_v2  ;;  %v81_v15 = vld [vmem:[%s1175_s1 + $0x190] sm:$0xff]  ;;  %v644_v17 = vpack.c.bf16 %v50_v14, %v49_v12 }
   0x4   :  { %v642_v9 = vpack.c.bf16 %v32_v7, %v31_v6  ;;  %v63_v10 = vld [vmem:[%s1175_s1 + $0x100] sm:$0xff]  ;;  %v64_v11 = vld [vmem:[%s1175_s1 + $0x108] sm:$0xff]  ;;  %641 = vmatprep.subr.bf16.mxu0 %v640_v4  ;;  %v82_v16 = vld [vmem:[%s1175_s1 + $0x198] sm:$0xff] }
   0x5   :  { %v674_v13 = vpack.c.bf16 %v64_v11, %v63_v10  ;;  %673 = vmatprep.subr.bf16.mxu1 %v672_v8  ;;  %v676_v18 = vpack.c.bf16 %v82_v16, %v81_v15  ;;  %v33_v19 = vld [vmem:[%s1175_s1 + $0x10] sm:$0xff]  ;;  %v34_v20 = vld [vmem:[%s1175_s1 + $0x18] sm:$0xff]  ;;  %v51_v24 = vld [vmem:[%s1175_s1 + $0xa0] sm:$0xff] }
   0x6   :  { %643 = vmatpush3.bf16.msra.mxu0 %v642_v9  ;;  %v65_v21 = vld [vmem:[%s1175_s1 + $0x110] sm:$0xff]  ;;  %v646_v22 = vpack.c.bf16 %v34_v20, %v33_v19  ;;  %v66_v23 = vld [vmem:[%s1175_s1 + $0x118] sm:$0xff]  ;;  %v52_v25 = vld [vmem:[%s1175_s1 + $0xa8] sm:$0xff] }
   0x7   :  { %675 = vmatpush3.bf16.msra.mxu1 %v674_v13  ;;  %645 = vmatprep.subr.bf16.mxu0 %v644_v17  ;;  %v678_v26 = vpack.c.bf16 %v66_v23, %v65_v21  ;;  %v648_v27 = vpack.c.bf16 %v52_v25, %v51_v24  ;;  %v83_v28 = vld [vmem:[%s1175_s1 + $0x1a0] sm:$0xff]  ;;  %v84_v29 = vld [vmem:[%s1175_s1 + $0x1a8] sm:$0xff]  ;;  %v53_v36 = vld [vmem:[%s1175_s1 + $0xb0] sm:$0xff] }
   0x8   :  { %677 = vmatprep.subr.bf16.mxu1 %v676_v18  ;;  %v35_v30 = vld [vmem:[%s1175_s1 + $0x20] sm:$0xff]  ;;  %v680_v31 = vpack.c.bf16 %v84_v29, %v83_v28  ;;  %v36_v32 = vld [vmem:[%s1175_s1 + $0x28] sm:$0xff]  ;;  %v54_v37 = vld [vmem:[%s1175_s1 + $0xb8] sm:$0xff] }
   0x9   :  { %v67_v33 = vld [vmem:[%s1175_s1 + $0x120] sm:$0xff]  ;;  %v68_v34 = vld [vmem:[%s1175_s1 + $0x128] sm:$0xff]  ;;  %v650_v35 = vpack.c.bf16 %v36_v32, %v35_v30  ;;  %v85_v38 = vld [vmem:[%s1175_s1 + $0x1b0] sm:$0xff]  ;;  %v652_v40 = vpack.c.bf16 %v54_v37, %v53_v36 }
   0xa   :  { %647 = vmatpush3.bf16.msra.mxu0 %v646_v22  ;;  %v682_v39 = vpack.c.bf16 %v68_v34, %v67_v33  ;;  %v86_v41 = vld [vmem:[%s1175_s1 + $0x1b8] sm:$0xff]  ;;  %v37_v42 = vld [vmem:[%s1175_s1 + $0x30] sm:$0xff]  ;;  %v55_v47 = vld [vmem:[%s1175_s1 + $0xc0] sm:$0xff] }
   0xb   :  { %679 = vmatpush3.bf16.msra.mxu1 %v678_v26  ;;  %649 = vmatprep.subr.bf16.mxu0 %v648_v27  ;;  %v38_v43 = vld [vmem:[%s1175_s1 + $0x38] sm:$0xff]  ;;  %v684_v44 = vpack.c.bf16 %v86_v41, %v85_v38  ;;  %v69_v45 = vld [vmem:[%s1175_s1 + $0x130] sm:$0xff]  ;;  %v56_v48 = vld [vmem:[%s1175_s1 + $0xc8] sm:$0xff] }
   0xc   :  { %681 = vmatprep.subr.bf16.mxu1 %v680_v31  ;;  %v70_v46 = vld [vmem:[%s1175_s1 + $0x138] sm:$0xff]  ;;  %v87_v49 = vld [vmem:[%s1175_s1 + $0x1c0] sm:$0xff]  ;;  %v88_v50 = vld [vmem:[%s1175_s1 + $0x1c8] sm:$0xff]  ;;  %v654_v51 = vpack.c.bf16 %v38_v43, %v37_v42  ;;  %v656_v53 = vpack.c.bf16 %v56_v48, %v55_v47 }
   0xd   :  { %v686_v52 = vpack.c.bf16 %v70_v46, %v69_v45  ;;  %v39_v54 = vld [vmem:[%s1175_s1 + $0x40] sm:$0xff]  ;;  %v40_v55 = vld [vmem:[%s1175_s1 + $0x48] sm:$0xff]  ;;  %v688_v57 = vpack.c.bf16 %v88_v50, %v87_v49  ;;  %v57_v59 = vld [vmem:[%s1175_s1 + $0xd0] sm:$0xff] }
   0xe   :  { %651 = vmatpush3.bf16.msra.mxu0 %v650_v35  ;;  %v71_v56 = vld [vmem:[%s1175_s1 + $0x140] sm:$0xff]  ;;  %v72_v58 = vld [vmem:[%s1175_s1 + $0x148] sm:$0xff]  ;;  %v58_v60 = vld [vmem:[%s1175_s1 + $0xd8] sm:$0xff]  ;;  %v658_v63 = vpack.c.bf16 %v40_v55, %v39_v54 }
   0xf   :  { %683 = vmatpush3.bf16.msra.mxu1 %v682_v39  ;;  %653 = vmatprep.subr.bf16.mxu0 %v652_v40  ;;  %v89_v61 = vld [vmem:[%s1175_s1 + $0x1d0] sm:$0xff]  ;;  %v90_v62 = vld [vmem:[%s1175_s1 + $0x1d8] sm:$0xff]  ;;  %v690_v0 = vpack.c.bf16 %v72_v58, %v71_v56  ;;  %v660_v1 = vpack.c.bf16 %v58_v60, %v57_v59  ;;  %v59_v7 = vld [vmem:[%s1175_s1 + $0xe0] sm:$0xff] }
  0x10   :  { %685 = vmatprep.subr.bf16.mxu1 %v684_v44  ;;  %v41_v2 = vld [vmem:[%s1175_s1 + $0x50] sm:$0xff]  ;;  %v42_v3 = vld [vmem:[%s1175_s1 + $0x58] sm:$0xff]  ;;  %v692_v5 = vpack.c.bf16 %v90_v62, %v89_v61  ;;  %v60_v8 = vld [vmem:[%s1175_s1 + $0xe8] sm:$0xff] }
  0x11   :  { %v73_v4 = vld [vmem:[%s1175_s1 + $0x150] sm:$0xff]  ;;  %v74_v6 = vld [vmem:[%s1175_s1 + $0x158] sm:$0xff]  ;;  %v91_v9 = vld [vmem:[%s1175_s1 + $0x1e0] sm:$0xff]  ;;  %v662_v11 = vpack.c.bf16 %v42_v3, %v41_v2  ;;  %v664_v15 = vpack.c.bf16 %v60_v8, %v59_v7 }
  0x12   :  { %655 = vmatpush3.bf16.msra.mxu0 %v654_v51  ;;  %v92_v10 = vld [vmem:[%s1175_s1 + $0x1e8] sm:$0xff]  ;;  %v43_v12 = vld [vmem:[%s1175_s1 + $0x60] sm:$0xff]  ;;  %v694_v14 = vpack.c.bf16 %v74_v6, %v73_v4  ;;  %v20_v18 = vld [vmem:[%s1176_s0 + $0x18] sm:$0xff] }
  0x13   :  { %687 = vmatpush3.bf16.msra.mxu1 %v686_v52  ;;  %657 = vmatprep.subr.bf16.mxu0 %v656_v53  ;;  %v44_v13 = vld [vmem:[%s1175_s1 + $0x68] sm:$0xff]  ;;  %v75_v16 = vld [vmem:[%s1175_s1 + $0x160] sm:$0xff]  ;;  %v696_v19 = vpack.c.bf16 %v92_v10, %v91_v9  ;;  %v61_v21 = vld [vmem:[%s1175_s1 + $0xf0] sm:$0xff] }
  0x14   :  { %689 = vmatprep.subr.bf16.mxu1 %v688_v57  ;;  %v18_v17 = vld [vmem:[%s1176_s0 + $0x8] sm:$0xff]  ;;  %v62_v22 = vld [vmem:[%s1175_s1 + $0xf8] sm:$0xff]  ;;  %v93_v23 = vld [vmem:[%s1175_s1 + $0x1f0] sm:$0xff]  ;;  %285 = vmatprep.mubr.f32.mxu1 %v20_v18  ;;  %v666_v25 = vpack.c.bf16 %v44_v13, %v43_v12 }
  0x15   :  { %v76_v20 = vld [vmem:[%s1175_s1 + $0x168] sm:$0xff]  ;;  %210 = vmatprep.mubr.f32.mxu0 %v18_v17  ;;  %v94_v24 = vld [vmem:[%s1175_s1 + $0x1f8] sm:$0xff]  ;;  %v668_v27 = vpack.c.bf16 %v62_v22, %v61_v21  ;;  %v45_v28 = vld [vmem:[%s1175_s1 + $0x70] sm:$0xff] }
  0x16   :  { %659 = vmatpush3.bf16.msra.mxu0 %v658_v63  ;;  %v698_v26 = vpack.c.bf16 %v76_v20, %v75_v16  ;;  %v46_v29 = vld [vmem:[%s1175_s1 + $0x78] sm:$0xff]  ;;  %v77_v30 = vld [vmem:[%s1175_s1 + $0x170] sm:$0xff]  ;;  %v700_v31 = vpack.c.bf16 %v94_v24, %v93_v23  ;;  %v111_v33 = vld [vmem:[%s1175_s1 + $0x280] sm:$0xff] }
  0x17   :  { %691 = vmatpush3.bf16.msra.mxu1 %v690_v0  ;;  %661 = vmatprep.subr.bf16.mxu0 %v660_v1  ;;  %v78_v32 = vld [vmem:[%s1175_s1 + $0x178] sm:$0xff]  ;;  %v112_v34 = vld [vmem:[%s1175_s1 + $0x288] sm:$0xff]  ;;  %v127_v35 = vld [vmem:[%s1175_s1 + $0x300] sm:$0xff]  ;;  %v670_v37 = vpack.c.bf16 %v46_v29, %v45_v28 }
  0x18   :  { %693 = vmatprep.subr.bf16.mxu1 %v692_v5  ;;  %v128_v36 = vld [vmem:[%s1175_s1 + $0x308] sm:$0xff]  ;;  %v702_v38 = vpack.c.bf16 %v78_v32, %v77_v30  ;;  %v704_v39 = vpack.c.bf16 %v112_v34, %v111_v33  ;;  %v95_v40 = vld [vmem:[%s1175_s1 + $0x200] sm:$0xff]  ;;  %v113_v42 = vld [vmem:[%s1175_s1 + $0x290] sm:$0xff] }
  0x19   :  { %v96_v41 = vld [vmem:[%s1175_s1 + $0x208] sm:$0xff]  ;;  %v114_v43 = vld [vmem:[%s1175_s1 + $0x298] sm:$0xff]  ;;  %v736_v44 = vpack.c.bf16 %v128_v36, %v127_v35  ;;  %v129_v45 = vld [vmem:[%s1175_s1 + $0x310] sm:$0xff] }
  0x1a   :  { %663 = vmatpush3.bf16.msra.mxu0 %v662_v11  ;;  %v130_v46 = vld [vmem:[%s1175_s1 + $0x318] sm:$0xff]  ;;  %v17_v47 = vld [vmem:[%s1176_s0] sm:$0xff]  ;;  %v706_v48 = vpack.c.bf16 %v96_v41, %v95_v40  ;;  %v19_v49 = vld [vmem:[%s1176_s0 + $0x10] sm:$0xff]  ;;  %v708_v50 = vpack.c.bf16 %v114_v43, %v113_v42 }
  0x1b   :  { %695 = vmatpush3.bf16.msra.mxu1 %v694_v14  ;;  %665 = vmatprep.subr.bf16.mxu0 %v664_v15  ;;  %v97_v51 = vld [vmem:[%s1175_s1 + $0x210] sm:$0xff]  ;;  %v98_v52 = vld [vmem:[%s1175_s1 + $0x218] sm:$0xff]  ;;  %v115_v53 = vld [vmem:[%s1175_s1 + $0x2a0] sm:$0xff]  ;;  %v740_v55 = vpack.c.bf16 %v130_v46, %v129_v45 }
  0x1c   :  { %697 = vmatprep.subr.bf16.mxu1 %v696_v19  ;;  %v116_v54 = vld [vmem:[%s1175_s1 + $0x2a8] sm:$0xff]  ;;  %v131_v56 = vld [vmem:[%s1175_s1 + $0x320] sm:$0xff]  ;;  %v710_v59 = vpack.c.bf16 %v98_v52, %v97_v51  ;;  %v27_v60 = vld [vmem:[%s1176_s0 + $0x50] sm:$0xff] }
  0x1d   :  { %v132_v57 = vld [vmem:[%s1175_s1 + $0x328] sm:$0xff]  ;;  %v25_v58 = vld [vmem:[%s1176_s0 + $0x40] sm:$0xff]  ;;  %v24_v61 = vld [vmem:[%s1176_s0 + $0x38] sm:$0xff]  ;;  %v712_v62 = vpack.c.bf16 %v116_v54, %v115_v53 }
  0x1e   :  { %667 = vmatpush3.bf16.msra.mxu0 %v666_v25  ;;  %v99_v63 = vld [vmem:[%s1175_s1 + $0x220] sm:$0xff]  ;;  %v100_v0 = vld [vmem:[%s1175_s1 + $0x228] sm:$0xff]  ;;  %v117_v2 = vld [vmem:[%s1175_s1 + $0x2b0] sm:$0xff]  ;;  %v744_v4 = vpack.c.bf16 %v132_v57, %v131_v56 }
  0x1f   :  { %699 = vmatpush3.bf16.msra.mxu1 %v698_v26  ;;  %669 = vmatprep.subr.bf16.mxu0 %v668_v27  ;;  %v26_v1 = vld [vmem:[%s1176_s0 + $0x48] sm:$0xff]  ;;  %v118_v3 = vld [vmem:[%s1175_s1 + $0x2b8] sm:$0xff]  ;;  %v133_v5 = vld [vmem:[%s1175_s1 + $0x330] sm:$0xff]  ;;  %v714_v8 = vpack.c.bf16 %v100_v0, %v99_v63 }
  0x20   :  { %701 = vmatprep.subr.bf16.mxu1 %v700_v31  ;;  %v134_v6 = vld [vmem:[%s1175_s1 + $0x338] sm:$0xff]  ;;  %v22_v7 = vld [vmem:[%s1176_s0 + $0x28] sm:$0xff]  ;;  %v23_v9 = vld [vmem:[%s1176_s0 + $0x30] sm:$0xff]  ;;  %v716_v11 = vpack.c.bf16 %v118_v3, %v117_v2 }
  0x21   :  { %v446_v10 = vld [vmem:[%s1177_s2] sm:$0xff]  ;;  %v101_v12 = vld [vmem:[%s1175_s1 + $0x230] sm:$0xff]  ;;  %v102_v13 = vld [vmem:[%s1175_s1 + $0x238] sm:$0xff]  ;;  %v748_v17 = vpack.c.bf16 %v134_v6, %v133_v5 }
  0x22   :  { %671 = vmatpush3.bf16.msra.mxu0 %v670_v37  ;;  %v460_v14 = vld [vmem:[%s1178_s3] sm:$0xff]  ;;  %v120_v16 = vld [vmem:[%s1175_s1 + $0x2c8] sm:$0xff]  ;;  %450 = vperm.xlu0 %761, %v446_v10   ;;  %v718_v20 = vpack.c.bf16 %v102_v13, %v101_v12  ;;  %v121_v26 = vld [vmem:[%s1175_s1 + $0x2d0] sm:$0xff] }
  0x23   :  { %703 = vmatpush3.bf16.msra.mxu1 %v702_v38  ;;  %705 = vmatprep.subr.bf16.mxu0 %v704_v39  ;;  %v119_v15 = vld [vmem:[%s1175_s1 + $0x2c0] sm:$0xff]  ;;  %v136_v19 = vld [vmem:[%s1175_s1 + $0x348] sm:$0xff]  ;;  %v122_v27 = vld [vmem:[%s1175_s1 + $0x2d8] sm:$0xff] }
  0x24   :  { %737 = vmatprep.subr.bf16.mxu1 %v736_v44  ;;  %v135_v18 = vld [vmem:[%s1175_s1 + $0x340] sm:$0xff]  ;;  %464 = vperm.xlu1 %762, %v460_v14   ;;  %v447_v21 = vld [vmem:[%s1177_s2 + $0x8] sm:$0xff]  ;;  %v720_v22 = vpack.c.bf16 %v120_v16, %v119_v15  ;;  %v137_v29 = vld [vmem:[%s1175_s1 + $0x350] sm:$0xff]  ;;  %v724_v32 = vpack.c.bf16 %v122_v27, %v121_v26 }
  0x25   :  { %211 = vmatmul.mubr.f32.vlgmr.msra.gmra.mrb[0].mxu0 %v17_v47  ;;  %v103_v23 = vld [vmem:[%s1175_s1 + $0x240] sm:$0xff]  ;;  %v104_v24 = vld [vmem:[%s1175_s1 + $0x248] sm:$0xff]  ;;  %v752_v28 = vpack.c.bf16 %v136_v19, %v135_v18  ;;  %v138_v30 = vld [vmem:[%s1175_s1 + $0x358] sm:$0xff] }
  0x26   :  { %286 = vmatmul.mubr.f32.vlgmr.msra.gmra.mrb[0].mxu1 %v19_v49  ;;  %707 = vmatpush3.bf16.msra.mxu0 %v706_v48  ;;  %v461_v25 = vld [vmem:[%s1178_s3 + $0x8] sm:$0xff]  ;;  %v722_v31 = vpack.c.bf16 %v104_v24, %v103_v23  ;;  %v105_v33 = vld [vmem:[%s1175_s1 + $0x250] sm:$0xff]  ;;  %v106_v34 = vld [vmem:[%s1175_s1 + $0x258] sm:$0xff]  ;;  %v756_v37 = vpack.c.bf16 %v138_v30, %v137_v29 }
  0x27   :  { %709 = vmatprep.subr.bf16.mxu0 %v708_v50  ;;  %739 = vmatpush3.bf16.msra.mxu1 %v736_v44  ;;  %v123_v35 = vld [vmem:[%s1175_s1 + $0x2e0] sm:$0xff]  ;;  %v124_v36 = vld [vmem:[%s1175_s1 + $0x2e8] sm:$0xff]  ;;  %v726_v38 = vpack.c.bf16 %v106_v34, %v105_v33  ;;  %v125_v42 = vld [vmem:[%s1175_s1 + $0x2f0] sm:$0xff] }
  0x28   :  { %741 = vmatprep.subr.bf16.mxu1 %v740_v55  ;;  %215 = vmatprep.mubr.f32.mxu0 %v25_v58  ;;  %v728_v39 = vpack.c.bf16 %v124_v36, %v123_v35  ;;  %v107_v40 = vld [vmem:[%s1175_s1 + $0x260] sm:$0xff]  ;;  %v108_v41 = vld [vmem:[%s1175_s1 + $0x268] sm:$0xff]  ;;  %v126_v43 = vld [vmem:[%s1175_s1 + $0x2f8] sm:$0xff] }
  0x29   :  { %290 = vmatprep.mubr.f32.mxu1 %v27_v60  ;;  %216 = vmatmul.mubr.f32.gmra.mrb[2].mxu0 %v24_v61  ;;  %v730_v44 = vpack.c.bf16 %v108_v41, %v107_v40  ;;  %v732_v45 = vpack.c.bf16 %v126_v43, %v125_v42  ;;  %v109_v46 = vld [vmem:[%s1175_s1 + $0x270] sm:$0xff]  ;;  %v110_v47 = vld [vmem:[%s1175_s1 + $0x278] sm:$0xff]  ;;  %v30_v48 = vld [vmem:[%s1176_s0 + $0x68] sm:$0xff] }
  0x2a   :  { %711 = vmatpush3.bf16.msra.mxu0 %v710_v59  ;;  %291 = vmatmul.mubr.f32.gmra.mrb[2].mxu1 %v26_v1  ;;  %v734_v49 = vpack.c.bf16 %v110_v47, %v109_v46  ;;  %v21_v50 = vld [vmem:[%s1176_s0 + $0x20] sm:$0xff]  ;;  %v28_v52 = vld [vmem:[%s1176_s0 + $0x58] sm:$0xff] }
  0x2b   :  { %713 = vmatprep.subr.bf16.mxu0 %v712_v62  ;;  %743 = vmatpush3.bf16.msra.mxu1 %v740_v55  ;;  %v29_v51 = vld [vmem:[%s1176_s0 + $0x60] sm:$0xff] }
  0x2c   :  { %745 = vmatprep.subr.bf16.mxu1 %v744_v4  ;;  %360 = vmatprep.mubr.f32.mxu0 %v22_v7 }
  0x2d   :  { %637 = vmatprep.mubr.msk.f32.mxu1 %vm139_vm0, %v23_v9  ;;  %455 = vperm.xlu0 %761, %v447_v21  }
  0x2e   :  { %715 = vmatpush3.bf16.msra.mxu0 %v714_v8  ;;  %469 = vperm.xlu1 %762, %v461_v25  }
  0x2f   :  { %717 = vmatprep.subr.bf16.mxu0 %v716_v11  ;;  %747 = vmatpush3.bf16.msra.mxu1 %v744_v4 }
  0x30   :  { %749 = vmatprep.subr.bf16.mxu1 %v748_v17 }
  0x32   :  { %719 = vmatpush3.bf16.msra.mxu0 %v718_v20 }
  0x33   :  { %721 = vmatprep.subr.bf16.mxu0 %v720_v22  ;;  %751 = vmatpush3.bf16.msra.mxu1 %v748_v17 }
  0x34   :  { %753 = vmatprep.subr.bf16.mxu1 %v752_v28 }
  0x36   :  { %723 = vmatpush3.bf16.msra.mxu0 %v722_v31 }
  0x37   :  { %725 = vmatprep.subr.bf16.mxu0 %v724_v32  ;;  %755 = vmatpush3.bf16.msra.mxu1 %v752_v28 }
  0x38   :  { %757 = vmatprep.subr.bf16.mxu1 %v756_v37 }
  0x3a   :  { %727 = vmatpush3.bf16.msra.mxu0 %v726_v38 }
  0x3b   :  { %729 = vmatprep.subr.bf16.mxu0 %v728_v39  ;;  %759 = vmatpush3.bf16.msra.mxu1 %v756_v37 }
  0x3e   :  { %731 = vmatpush3.bf16.msra.mxu0 %v730_v44  ;;  %638 = vmatmul.mubr.msk.f32.vlgmr.msra.gmra.mrb[4].mxu1 %vm139_vm0, %v30_v48 }
  0x3f   :  { %733 = vmatprep.subr.bf16.mxu0 %v732_v45 }
  0x42   :  { %735 = vmatpush3.bf16.msra.mxu0 %v734_v49 }
  0x45   :  { %361 = vmatmul.mubr.f32.vlgmr.msra.gmra.mrb[4].mxu0 %v21_v50 }
  0x46   :  { %365 = vmatprep.mubr.f32.mxu0 %v29_v51 }
  0x49   :  { %366 = vmatmul.mubr.f32.gmra.mrb[6].mxu0 %v28_v52 }
  0xa1   :  { %v451_v10 = vpop.permute.xlu0 %450 }
  0xa3   :  { %v465_v14 = vpop.permute.xlu1 %464 }
  0xac   :  { %v456_v19 = vpop.permute.xlu0 %455 }
  0xad   :  { %v470_v22 = vpop.permute.xlu1 %469 }
  0xf8   :  { %v517_v53 = vpop.f32.mrb[0].mxu0 }
  0xf9   :  { %v555_v54 = vpop.f32.mrb[0].mxu1  ;;  %v518_v55 = vpop.f32.mrb[1].mxu0 }
  0xfa   :  { %v519_v56 = vadd.f32 %v518_v55, %v517_v53  ;;  %v556_v57 = vpop.f32.mrb[1].mxu1 }
  0xfb   :  { %v557_v58 = vadd.f32 %v556_v57, %v555_v54 }
  0xfc   :  { %v520_v59 = vpop.f32.mrb[2].mxu0 }
  0xfd   :  { %v288_v60 = vadd.f32 %v557_v58, %v519_v56  ;;  %v558_v61 = vpop.f32.mrb[2].mxu1  ;;  %v521_v62 = vpop.f32.mrb[3].mxu0 }
  0xfe   :  { %v522_v63 = vadd.f32 %v521_v62, %v520_v59  ;;  %v559_v0 = vpop.f32.mrb[3].mxu1 }
  0xff   :  { %v560_v1 = vadd.f32 %v559_v0, %v558_v61 }
 0x101   :  { %v293_v2 = vadd.f32 %v560_v1, %v522_v63 }
 0x111   :  { %v639_v3 = vpop.f32.mrb[4].mxu1 }
 0x112   :  { %v437_v4 = vpop.f32.mrb[5].mxu1 }
 0x118   :  { %v593_v5 = vpop.f32.mrb[4].mxu0 }
 0x119   :  { %v594_v6 = vpop.f32.mrb[5].mxu0 }
 0x11a   :  { %v595_v7 = vadd.f32 %v594_v6, %v593_v5 }
 0x11c   :  { %v596_v8 = vpop.f32.mrb[6].mxu0  ;;  %v363_v9 = vadd.f32 %v595_v7, %v288_v60 }
 0x11d   :  { %v597_v11 = vpop.f32.mrb[7].mxu0 }
 0x11e   :  { %v598_v12 = vadd.f32 %v597_v11, %v596_v8  ;;  %v438_v13 = vadd.f32 %v437_v4, %v363_v9 }
 0x120   :  { %v368_v15 = vadd.f32 %v598_v12, %v293_v2  ;;  %v458_v16 = vmul.f32 %v451_v10, %v438_v13 }
 0x122   :  { %v472_v17 = vadd.f32 %v465_v14, %v458_v16  ;;  %v443_v18 = vadd.f32 %v639_v3, %v368_v15 }
 0x124   :  { %v474_v20 = vmax.f32 %v472_v17, 0.0  ;;  %v459_v21 = vmul.f32 %v456_v19, %v443_v18 }
 0x126   :  { %v473_v23 = vadd.f32 %v470_v22, %v459_v21  ;;  %477 = vst.msk [vmem:[%s1179_s4] sm:$0xff] %vm476_vm1, %v474_v20 }
 0x128   :  { %v475_v24 = vmax.f32 %v473_v23, 0.0 }
 0x12a   :  { %478 = vst.msk [vmem:[%s1179_s4 + $0x8] sm:$0xff] %vm476_vm1, %v475_v24 }

// kernel: _lambda_.24
= control target key start
LH: loop header
LB: loop body
LE: loop exit
PB: predicated region body
PF: predicated region fallthrough
CT: control target
= control target key end

     0   :  { %v343_v0 = vmov 0.0|0.0   ;;  %v344_v4 = vmov 0   ;;  %vm75_vm0 = vcmask 392192   ;;  %s565_s1 = inlined_call_operand.vmem [shape: f32[432,128], index: 1, kind: input, shape index: {}]   ;;  %s566_s0 = inlined_call_operand.vmem [shape: f32[8,432], index: 0, kind: input, shape index: {}]   ;;  %s567_s2 = inlined_call_operand.vmem [shape: f32[8,1], index: 2, kind: input, shape index: {}]   ;;  %s568_s3 = inlined_call_operand.vmem [shape: f32[8,1], index: 3, kind: input, shape index: {}]   ;;  %s569_s4 = inlined_call_operand.vmem [shape: f32[8,128], index: 4, kind: output, shape index: {}]  }
   0x1   :  { %307 = vmatprep.subr.bf16.mxu1 %v343_v0  ;;  %v53_v1 = vld [vmem:[%s565_s1 + $0x100] sm:$0xff]  ;;  %v54_v2 = vld [vmem:[%s565_s1 + $0x108] sm:$0xff]  ;;  %v55_v3 = vld [vmem:[%s565_s1 + $0x110] sm:$0xff]  ;;  %342 = vset.pattern.permute.xlu0 %v344_v4 }
   0x2   :  { %v308_v5 = vpack.c.bf16 %v54_v2, %v53_v1  ;;  %v56_v6 = vld [vmem:[%s565_s1 + $0x118] sm:$0xff]  ;;  %v37_v7 = vld [vmem:[%s565_s1 + $0x80] sm:$0xff]  ;;  %v38_v8 = vld [vmem:[%s565_s1 + $0x88] sm:$0xff] }
   0x3   :  { %v275_v9 = vpack.c.bf16 %v38_v8, %v37_v7  ;;  %v21_v10 = vld [vmem:[%s565_s1] sm:$0xff]  ;;  %v22_v11 = vld [vmem:[%s565_s1 + $0x8] sm:$0xff]  ;;  %v311_v12 = vpack.c.bf16 %v56_v6, %v55_v3  ;;  %v39_v15 = vld [vmem:[%s565_s1 + $0x90] sm:$0xff] }
   0x4   :  { %309 = vmatpush1.bf16.msra.mxu1 %v308_v5  ;;  %v277_v13 = vpack.c.bf16 %v22_v11, %v21_v10  ;;  %v57_v14 = vld [vmem:[%s565_s1 + $0x120] sm:$0xff]  ;;  %v40_v16 = vld [vmem:[%s565_s1 + $0x98] sm:$0xff]  ;;  %v58_v17 = vld [vmem:[%s565_s1 + $0x128] sm:$0xff] }
   0x5   :  { %310 = vmatprep.subr.bf16.mxu1 %v343_v0  ;;  %276 = vmatprep.subr.bf16.mxu0 %v275_v9  ;;  %v279_v18 = vpack.c.bf16 %v40_v16, %v39_v15  ;;  %v23_v19 = vld [vmem:[%s565_s1 + $0x10] sm:$0xff]  ;;  %v24_v20 = vld [vmem:[%s565_s1 + $0x18] sm:$0xff]  ;;  %v41_v22 = vld [vmem:[%s565_s1 + $0xa0] sm:$0xff]  ;;  %v314_v27 = vpack.c.bf16 %v58_v17, %v57_v14 }
   0x6   :  { %278 = vmatpush3.bf16.msra.mxu0 %v277_v13  ;;  %v281_v21 = vpack.c.bf16 %v24_v20, %v23_v19  ;;  %v42_v23 = vld [vmem:[%s565_s1 + $0xa8] sm:$0xff]  ;;  %v25_v25 = vld [vmem:[%s565_s1 + $0x20] sm:$0xff]  ;;  %v43_v28 = vld [vmem:[%s565_s1 + $0xb0] sm:$0xff] }
   0x7   :  { %280 = vmatprep.subr.bf16.mxu0 %v279_v18  ;;  %v283_v24 = vpack.c.bf16 %v42_v23, %v41_v22  ;;  %v26_v26 = vld [vmem:[%s565_s1 + $0x28] sm:$0xff]  ;;  %v44_v29 = vld [vmem:[%s565_s1 + $0xb8] sm:$0xff]  ;;  %v59_v30 = vld [vmem:[%s565_s1 + $0x130] sm:$0xff] }
   0x8   :  { %312 = vmatpush1.bf16.msra.mxu1 %v311_v12  ;;  %v60_v31 = vld [vmem:[%s565_s1 + $0x138] sm:$0xff]  ;;  %v285_v32 = vpack.c.bf16 %v26_v26, %v25_v25  ;;  %v287_v33 = vpack.c.bf16 %v44_v29, %v43_v28  ;;  %v27_v34 = vld [vmem:[%s565_s1 + $0x30] sm:$0xff]  ;;  %v45_v37 = vld [vmem:[%s565_s1 + $0xc0] sm:$0xff] }
   0x9   :  { %313 = vmatprep.subr.bf16.mxu1 %v343_v0  ;;  %v28_v35 = vld [vmem:[%s565_s1 + $0x38] sm:$0xff]  ;;  %v317_v36 = vpack.c.bf16 %v60_v31, %v59_v30  ;;  %v46_v38 = vld [vmem:[%s565_s1 + $0xc8] sm:$0xff]  ;;  %v61_v39 = vld [vmem:[%s565_s1 + $0x140] sm:$0xff] }
   0xa   :  { %282 = vmatpush3.bf16.msra.mxu0 %v281_v21  ;;  %v62_v40 = vld [vmem:[%s565_s1 + $0x148] sm:$0xff]  ;;  %v289_v41 = vpack.c.bf16 %v28_v35, %v27_v34  ;;  %v291_v42 = vpack.c.bf16 %v46_v38, %v45_v37  ;;  %v29_v43 = vld [vmem:[%s565_s1 + $0x40] sm:$0xff]  ;;  %v47_v46 = vld [vmem:[%s565_s1 + $0xd0] sm:$0xff] }
   0xb   :  { %284 = vmatprep.subr.bf16.mxu0 %v283_v24  ;;  %v30_v44 = vld [vmem:[%s565_s1 + $0x48] sm:$0xff]  ;;  %v320_v45 = vpack.c.bf16 %v62_v40, %v61_v39  ;;  %v48_v47 = vld [vmem:[%s565_s1 + $0xd8] sm:$0xff]  ;;  %v63_v48 = vld [vmem:[%s565_s1 + $0x150] sm:$0xff] }
   0xc   :  { %315 = vmatpush1.bf16.msra.mxu1 %v314_v27  ;;  %v64_v49 = vld [vmem:[%s565_s1 + $0x158] sm:$0xff]  ;;  %v293_v50 = vpack.c.bf16 %v30_v44, %v29_v43  ;;  %v18_v51 = vld [vmem:[%s566_s0 + $0x8] sm:$0xff]  ;;  %v295_v52 = vpack.c.bf16 %v48_v47, %v47_v46  ;;  %v31_v53 = vld [vmem:[%s565_s1 + $0x50] sm:$0xff] }
   0xd   :  { %316 = vmatprep.subr.bf16.mxu1 %v343_v0  ;;  %v32_v54 = vld [vmem:[%s565_s1 + $0x58] sm:$0xff]  ;;  %143 = vmatprep.mubr.f32.mxu0 %v18_v51  ;;  %v323_v56 = vpack.c.bf16 %v64_v49, %v63_v48  ;;  %v49_v57 = vld [vmem:[%s565_s1 + $0xe0] sm:$0xff]  ;;  %v50_v58 = vld [vmem:[%s565_s1 + $0xe8] sm:$0xff] }
   0xe   :  { %286 = vmatpush3.bf16.msra.mxu0 %v285_v32  ;;  %v20_v55 = vld [vmem:[%s566_s0 + $0x18] sm:$0xff]  ;;  %v219_v59 = vld [vmem:[%s567_s2] sm:$0xff]  ;;  %v66_v61 = vld [vmem:[%s565_s1 + $0x168] sm:$0xff]  ;;  %v297_v62 = vpack.c.bf16 %v32_v54, %v31_v53  ;;  %v299_v1 = vpack.c.bf16 %v50_v58, %v49_v57 }
   0xf   :  { %288 = vmatprep.subr.bf16.mxu0 %v287_v33  ;;  %239 = vmatprep.mubr.msk.f32.mxu1 %vm75_vm0, %v20_v55  ;;  %v65_v60 = vld [vmem:[%s565_s1 + $0x160] sm:$0xff]  ;;  %v34_v3 = vld [vmem:[%s565_s1 + $0x68] sm:$0xff]  ;;  %v51_v5 = vld [vmem:[%s565_s1 + $0xf0] sm:$0xff] }
  0x10   :  { %318 = vmatpush1.bf16.msra.mxu1 %v317_v36  ;;  %222 = vperm.xlu0 %342, %v219_v59   ;;  %v226_v63 = vld [vmem:[%s568_s3] sm:$0xff]  ;;  %v326_v4 = vpack.c.bf16 %v66_v61, %v65_v60  ;;  %v52_v6 = vld [vmem:[%s565_s1 + $0xf8] sm:$0xff]  ;;  %v67_v7 = vld [vmem:[%s565_s1 + $0x170] sm:$0xff] }
  0x11   :  { %319 = vmatprep.subr.bf16.mxu1 %v343_v0  ;;  %v33_v2 = vld [vmem:[%s565_s1 + $0x60] sm:$0xff]  ;;  %v68_v8 = vld [vmem:[%s565_s1 + $0x178] sm:$0xff]  ;;  %v303_v10 = vpack.c.bf16 %v52_v6, %v51_v5  ;;  %v35_v11 = vld [vmem:[%s565_s1 + $0x70] sm:$0xff] }
  0x12   :  { %290 = vmatpush3.bf16.msra.mxu0 %v289_v41  ;;  %v301_v9 = vpack.c.bf16 %v34_v3, %v33_v2  ;;  %v36_v12 = vld [vmem:[%s565_s1 + $0x78] sm:$0xff]  ;;  %v329_v13 = vpack.c.bf16 %v68_v8, %v67_v7  ;;  %v69_v14 = vld [vmem:[%s565_s1 + $0x180] sm:$0xff]  ;;  %v70_v15 = vld [vmem:[%s565_s1 + $0x188] sm:$0xff] }
  0x13   :  { %292 = vmatprep.subr.bf16.mxu0 %v291_v42  ;;  %v305_v16 = vpack.c.bf16 %v36_v12, %v35_v11  ;;  %v332_v17 = vpack.c.bf16 %v70_v15, %v69_v14  ;;  %v71_v18 = vld [vmem:[%s565_s1 + $0x190] sm:$0xff]  ;;  %v72_v19 = vld [vmem:[%s565_s1 + $0x198] sm:$0xff]  ;;  %v17_v20 = vld [vmem:[%s566_s0] sm:$0xff] }
  0x14   :  { %321 = vmatpush1.bf16.msra.mxu1 %v320_v45  ;;  %229 = vperm.xlu0 %342, %v226_v63   ;;  %v335_v21 = vpack.c.bf16 %v72_v19, %v71_v18  ;;  %v73_v22 = vld [vmem:[%s565_s1 + $0x1a0] sm:$0xff]  ;;  %v74_v23 = vld [vmem:[%s565_s1 + $0x1a8] sm:$0xff]  ;;  %v19_v25 = vld [vmem:[%s566_s0 + $0x10] sm:$0xff] }
  0x15   :  { %322 = vmatprep.subr.bf16.mxu1 %v343_v0  ;;  %v338_v24 = vpack.c.bf16 %v74_v23, %v73_v22 }
  0x16   :  { %294 = vmatpush3.bf16.msra.mxu0 %v293_v50 }
  0x17   :  { %296 = vmatprep.subr.bf16.mxu0 %v295_v52 }
  0x18   :  { %324 = vmatpush1.bf16.msra.mxu1 %v323_v56 }
  0x19   :  { %325 = vmatprep.subr.bf16.mxu1 %v343_v0 }
  0x1a   :  { %298 = vmatpush3.bf16.msra.mxu0 %v297_v62 }
  0x1b   :  { %300 = vmatprep.subr.bf16.mxu0 %v299_v1 }
  0x1c   :  { %327 = vmatpush1.bf16.msra.mxu1 %v326_v4 }
  0x1d   :  { %328 = vmatprep.subr.bf16.mxu1 %v343_v0 }
  0x1e   :  { %302 = vmatpush3.bf16.msra.mxu0 %v301_v9 }
  0x1f   :  { %304 = vmatprep.subr.bf16.mxu0 %v303_v10 }
  0x20   :  { %330 = vmatpush1.bf16.msra.mxu1 %v329_v13 }
  0x21   :  { %331 = vmatprep.subr.bf16.mxu1 %v343_v0 }
  0x22   :  { %306 = vmatpush3.bf16.msra.mxu0 %v305_v16 }
  0x24   :  { %333 = vmatpush1.bf16.msra.mxu1 %v332_v17 }
  0x25   :  { %334 = vmatprep.subr.bf16.mxu1 %v343_v0  ;;  %144 = vmatmul.mubr.f32.vlgmr.msra.gmra.mrb[0].mxu0 %v17_v20 }
  0x28   :  { %336 = vmatpush1.bf16.msra.mxu1 %v335_v21 }
  0x29   :  { %337 = vmatprep.subr.bf16.mxu1 %v343_v0 }
  0x2c   :  { %339 = vmatpush1.bf16.msra.mxu1 %v338_v24 }
  0x2f   :  { %214 = vmatmul.mubr.f32.vlgmr.msra.gmra.mrb[0].mxu1 %v19_v25 }
  0x8f   :  { %v223_v29 = vpop.permute.xlu0 %222 }
  0x93   :  { %v230_v34 = vpop.permute.xlu0 %229 }
  0xf8   :  { %v272_v26 = vpop.f32.mrb[0].mxu0 }
  0xf9   :  { %v273_v27 = vpop.f32.mrb[1].mxu0 }
  0xfa   :  { %v274_v28 = vadd.f32 %v273_v27, %v272_v26 }
 0x102   :  { %v215_v30 = vpop.f32.mrb[0].mxu1 }
 0x103   :  { %v216_v31 = vadd.f32 %v274_v28, %v215_v30  ;;  %v217_v32 = vpop.f32.mrb[1].mxu1 }
 0x105   :  { %v225_v33 = vmul.f32 %v223_v29, %v216_v31 }
 0x107   :  { %v232_v35 = vadd.f32 %v230_v34, %v225_v33 }
 0x109   :  { %v233_v36 = vmax.f32 %v232_v35, 0.0 }
 0x10b   :  { %234 = vst [vmem:[%s569_s4] sm:$0xff] %v233_v36 }

// kernel: _lambda_.25
= control target key start
LH: loop header
LB: loop body
LE: loop exit
PB: predicated region body
PF: predicated region fallthrough
CT: control target
= control target key end

     0   :  { %v185_v0 = vmov 0.0|0.0   ;;  %v186_v4 = vmov 0   ;;  %vm47_vm0 = vcmask 719872   ;;  %v187_v45 = vmov 0.0   ;;  %s319_s1 = inlined_call_operand.vmem [shape: f32[216,128], index: 1, kind: input, shape index: {}]   ;;  %s320_s0 = inlined_call_operand.vmem [shape: f32[4,216], index: 0, kind: input, shape index: {}]   ;;  %s321_s2 = inlined_call_operand.vmem [shape: f32[4,1], index: 2, kind: input, shape index: {}]   ;;  %s322_s3 = inlined_call_operand.vmem [shape: f32[4,1], index: 3, kind: input, shape index: {}]   ;;  %s323_s4 = inlined_call_operand.vmem [shape: f32[4,128], index: 4, kind: output, shape index: {}]  }
   0x1   :  { %141 = vmatprep.subr.bf16.mxu0 %v185_v0  ;;  %v18_v1 = vld [vmem:[%s319_s1] sm:$0xff]  ;;  %v19_v2 = vld [vmem:[%s319_s1 + $0x8] sm:$0xff]  ;;  %v20_v3 = vld [vmem:[%s319_s1 + $0x10] sm:$0xff]  ;;  %183 = vset.pattern.permute.xlu0 %v186_v4 }
   0x2   :  { %v142_v5 = vpack.c.bf16 %v19_v2, %v18_v1  ;;  %v21_v6 = vld [vmem:[%s319_s1 + $0x18] sm:$0xff]  ;;  %v22_v8 = vld [vmem:[%s319_s1 + $0x20] sm:$0xff]  ;;  %v23_v9 = vld [vmem:[%s319_s1 + $0x28] sm:$0xff] }
   0x3   :  { %v145_v7 = vpack.c.bf16 %v21_v6, %v20_v3  ;;  %v148_v10 = vpack.c.bf16 %v23_v9, %v22_v8  ;;  %v24_v11 = vld [vmem:[%s319_s1 + $0x30] sm:$0xff]  ;;  %v25_v12 = vld [vmem:[%s319_s1 + $0x38] sm:$0xff]  ;;  %v17_v13 = vld [vmem:[%s320_s0] sm:$0xff] }
   0x4   :  { %143 = vmatpush1.bf16.msra.mxu0 %v142_v5  ;;  %v120_v14 = vld [vmem:[%s321_s2] sm:$0xf]  ;;  %v46_v15 = vcombine.high %v17_v13, %v17_v13  ;;  %v151_v16 = vpack.c.bf16 %v25_v12, %v24_v11  ;;  %v27_v19 = vld [vmem:[%s319_s1 + $0x48] sm:$0xff]  ;;  %v28_v21 = vld [vmem:[%s319_s1 + $0x50] sm:$0xff] }
   0x5   :  { %144 = vmatprep.subr.bf16.mxu0 %v185_v0  ;;  %123 = vperm.xlu0 %183, %v120_v14   ;;  %v127_v17 = vld [vmem:[%s322_s3] sm:$0xf]  ;;  %v29_v22 = vld [vmem:[%s319_s1 + $0x58] sm:$0xff]  ;;  %v31_v25 = vld [vmem:[%s319_s1 + $0x68] sm:$0xff] }
   0x6   :  { %v26_v18 = vld [vmem:[%s319_s1 + $0x40] sm:$0xff]  ;;  %140 = vmatprep.mubr.msk.f32.mxu0 %vm47_vm0, %v46_v15  ;;  %v157_v23 = vpack.c.bf16 %v29_v22, %v28_v21  ;;  %v32_v27 = vld [vmem:[%s319_s1 + $0x70] sm:$0xff]  ;;  %v33_v28 = vld [vmem:[%s319_s1 + $0x78] sm:$0xff] }
   0x7   :  { %v154_v20 = vpack.c.bf16 %v27_v19, %v26_v18  ;;  %v30_v24 = vld [vmem:[%s319_s1 + $0x60] sm:$0xff]  ;;  %v163_v29 = vpack.c.bf16 %v33_v28, %v32_v27  ;;  %v35_v31 = vld [vmem:[%s319_s1 + $0x88] sm:$0xff]  ;;  %v36_v33 = vld [vmem:[%s319_s1 + $0x90] sm:$0xff] }
   0x8   :  { %146 = vmatpush1.bf16.msra.mxu0 %v145_v7  ;;  %v160_v26 = vpack.c.bf16 %v31_v25, %v30_v24  ;;  %v34_v30 = vld [vmem:[%s319_s1 + $0x80] sm:$0xff]  ;;  %v37_v34 = vld [vmem:[%s319_s1 + $0x98] sm:$0xff]  ;;  %v39_v37 = vld [vmem:[%s319_s1 + $0xa8] sm:$0xff] }
   0x9   :  { %147 = vmatprep.subr.bf16.mxu0 %v185_v0  ;;  %130 = vperm.xlu0 %183, %v127_v17   ;;  %v166_v32 = vpack.c.bf16 %v35_v31, %v34_v30  ;;  %v169_v35 = vpack.c.bf16 %v37_v34, %v36_v33  ;;  %v38_v36 = vld [vmem:[%s319_s1 + $0xa0] sm:$0xff]  ;;  %v40_v39 = vld [vmem:[%s319_s1 + $0xb0] sm:$0xff]  ;;  %v41_v40 = vld [vmem:[%s319_s1 + $0xb8] sm:$0xff] }
   0xa   :  { %v172_v38 = vpack.c.bf16 %v39_v37, %v38_v36  ;;  %v175_v41 = vpack.c.bf16 %v41_v40, %v40_v39  ;;  %v42_v42 = vld [vmem:[%s319_s1 + $0xc0] sm:$0xff]  ;;  %v43_v43 = vld [vmem:[%s319_s1 + $0xc8] sm:$0xff]  ;;  %v44_v46 = vld [vmem:[%s319_s1 + $0xd0] sm:$0xff] }
   0xb   :  { %v178_v44 = vpack.c.bf16 %v43_v43, %v42_v42 }
   0xc   :  { %149 = vmatpush1.bf16.msra.mxu0 %v148_v10 }
   0xd   :  { %150 = vmatprep.subr.bf16.mxu0 %v185_v0 }
  0x10   :  { %152 = vmatpush1.bf16.msra.mxu0 %v151_v16 }
  0x11   :  { %153 = vmatprep.subr.bf16.mxu0 %v185_v0 }
  0x14   :  { %155 = vmatpush1.bf16.msra.mxu0 %v154_v20 }
  0x15   :  { %156 = vmatprep.subr.bf16.mxu0 %v185_v0 }
  0x18   :  { %158 = vmatpush1.bf16.msra.mxu0 %v157_v23 }
  0x19   :  { %159 = vmatprep.subr.bf16.mxu0 %v185_v0 }
  0x1c   :  { %161 = vmatpush1.bf16.msra.mxu0 %v160_v26 }
  0x1d   :  { %162 = vmatprep.subr.bf16.mxu0 %v185_v0 }
  0x20   :  { %164 = vmatpush1.bf16.msra.mxu0 %v163_v29 }
  0x21   :  { %165 = vmatprep.subr.bf16.mxu0 %v185_v0 }
  0x24   :  { %167 = vmatpush1.bf16.msra.mxu0 %v166_v32 }
  0x25   :  { %168 = vmatprep.subr.bf16.mxu0 %v185_v0 }
  0x28   :  { %170 = vmatpush1.bf16.msra.mxu0 %v169_v35 }
  0x29   :  { %171 = vmatprep.subr.bf16.mxu0 %v185_v0 }
  0x2c   :  { %173 = vmatpush1.bf16.msra.mxu0 %v172_v38 }
  0x2d   :  { %174 = vmatprep.subr.bf16.mxu0 %v185_v0 }
  0x30   :  { %176 = vmatpush1.bf16.msra.mxu0 %v175_v41 }
  0x31   :  { %177 = vmatprep.subr.bf16.mxu0 %v185_v0 }
  0x34   :  { %179 = vmatpush1.bf16.msra.mxu0 %v178_v44 }
  0x35   :  { %102 = vmatprep.subr.mxu0 %v187_v45 }
  0x38   :  { %103 = vmatpush1.msra.mxu0 %v44_v46 }
  0x39   :  { %115 = vmatmul.mubr.f32.vlgmr.msra.gmra.mrb[0].mxu0 %v17_v13 }
  0x84   :  { %v124_v47 = vpop.permute.xlu0 %123 }
  0x88   :  { %v131_v51 = vpop.permute.xlu0 %130 }
 0x10c   :  { %v116_v48 = vpop.f32.mrb[0].mxu0 }
 0x10d   :  { %v126_v49 = vmul.f32 %v124_v47, %v116_v48  ;;  %v118_v50 = vpop.f32.mrb[1].mxu0 }
 0x10f   :  { %v133_v52 = vadd.f32 %v131_v51, %v126_v49 }
 0x111   :  { %v134_v53 = vmax.f32 %v133_v52, 0.0 }
 0x113   :  { %135 = vst [vmem:[%s323_s4] sm:$0xf] %v134_v53 }

// kernel: _lambda_.27
= control target key start
LH: loop header
LB: loop body
LE: loop exit
PB: predicated region body
PF: predicated region fallthrough
CT: control target
= control target key end

     0   :  { %s549_s19 = smov 0   ;;  %s573_s0 = inlined_call_operand.vmem [shape: f32[1,4], index: 0, kind: input, shape index: {}]   ;;  %s574_s1 = inlined_call_operand.vmem [shape: f32[4,1024], index: 1, kind: input, shape index: {}]   ;;  %s575_s2 = inlined_call_operand.<no memory space> [shape: f32[1,1], index: 2, kind: input, shape index: {}]   ;;  %s576_s4 = inlined_call_operand.vmem [shape: f32[1,1024], index: 4, kind: output, shape index: {}]   ;;  %s577_s3 = inlined_call_operand.<no memory space> [shape: f32[1,1], index: 3, kind: input, shape index: {}]  }
   0x1   :  { %v9_v0 = vstv %s575_s2  ;;  %v11_v1 = vstv %s577_s3 }
   0x2   :  { %10 = vst [vmem:[#allocation2] sm:$0x1] %v9_v0  ;;  %12 = vst [vmem:[#allocation3] sm:$0x1] %v11_v1 }
   0x3 LB: > { %s477_s20 = sadd.s32 4294967295, %s513_s19   ;;  %p481_p0 = scmp.ge.s32.totalorder %s513_s19, 1  ;;  %s513_s19 = sphi %s549_s19, %s18_s19  }
   0x4   : > { %p167_p1 = scmp.lt.s32.totalorder %s513_s19, 3 }
   0x6   : > { %p168_p2 = pnand %p481_p0, %p167_p1 }
   0x7   : > { %s482_s2 = sshll.u32 (!%p168_p2), %s477_s20, 2  ;;  %v515_v2 = vmov (!%p168_p2), 0.0   ;;  %v516_v4 = vmov (!%p168_p2), 0   ;;  %vm214_vm0 = vcmask (!%p168_p2), 1043456   ;;  %v203_v10 = vld [vmem:[%s573_s0] sm:$0x1] (!%p168_p2)  ;;  %v371_v11 = vlaneseq (!%p168_p2) }
   0x8   : > { %171 = sbr.rel (%p168_p2) target bundleno = 249 (0xf9), region = 36  ;;  %p193_p3 = scmp.lt.s32.totalorder (!%p168_p2), %s482_s2, 7  ;;  %287 = vmatprep.mubr.f32.mxu0 (!%p168_p2), %v515_v2  ;;  %358 = vmatprep.mubr.f32.mxu1 (!%p168_p2), %v515_v2  ;;  %vm210_vm1 = vcmask (!%p168_p2), 31744   ;;  %v517_v15 = vmov (!%p168_p2), 1966171168  }
   0x9   : > { %v365_v3 = vld [vmem:[#allocation2] sm:$0x1] (!%p168_p2)  ;;  %504 = vset.pattern.permute.xlu0 (!%p168_p2), %v516_v4  ;;  %v379_v5 = vld [vmem:[#allocation3] sm:$0x1] (!%p168_p2)  ;;  %v372_v12 = vshrl.u32 (!%p168_p2), %v371_v11, 7  ;;  %v400_v16 = vunpack.c.l.s4 (!%p168_p2), %v517_v15  ;;  %vm424_vm2 = vcmp.lt.s32.totalorder (!%p168_p2), %v371_v11, 512 }
   0xa   : > { %368 = vperm.xlu0 (!%p168_p2), %504, %v365_v3  }
   0xb   : > { %v373_v14 = vsub.s32 (!%p168_p2), 0, %v372_v12  ;;  %v401_v19 = vunpack.c.0.s8 (!%p168_p2), %v400_v16 }
   0xd   : > { %v404_v31 = vsub.s32 (!%p168_p2), %v401_v19, %v372_v12 }
   0xe   : > { %382 = vperm.xlu0 (!%p168_p2), %504, %v379_v5  }
   0xf   : > { %s579_s2 = smov (!%p193_p3, %s482_s2), 7 }
  0x10   : > { %s483_s3 = sshll.u32 %s579_s2, 2  ;;  %s201_s28 = scalar_lea.vmem %s576_s4, %s579_s2 }
  0x11   : > { %s196_s23 = scalar_lea.vmem %s574_s1, %s483_s3 }
  0x12   : > { %v204_v6 = vld [vmem:[%s196_s23] sm:$0xff]  ;;  %v205_v7 = vld [vmem:[%s196_s23 + $0x8] sm:$0xff] }
  0x13   : > { %v208_v8 = vcombine.high %v204_v6, %v204_v6  ;;  %v209_v9 = vcombine.high %v205_v7, %v205_v7 }
  0x15   : > { %485 = vmatprep.subr.msk.mxu0 %vm214_vm0, %v208_v8  ;;  %488 = vmatprep.subr.msk.mxu1 %vm214_vm0, %v209_v9 }
  0x16   : > { %486 = vmatpush1.msk.msra.mxu0 %vm214_vm0, %v204_v6  ;;  %489 = vmatpush1.msk.msra.mxu1 %vm214_vm0, %v205_v7 }
  0x17   : > { %487 = vmatmul.mubr.msk.f32.vlgmr.msra.gmra.mrb[0].mxu0 %vm210_vm1, %v203_v10  ;;  %490 = vmatmul.mubr.msk.f32.vlgmr.msra.gmra.mrb[0].mxu1 %vm210_vm1, %v203_v10 }
  0x89   : > { %v369_v13 = vpop.permute.xlu0 %368 }
  0x8a   : > { %v374_v17 = vrot.slane %v369_v13, %v373_v14 }
  0x8d   : > { %v383_v18 = vpop.permute.xlu0 %382 }
  0x8e   : > { %v388_v22 = vrot.slane %v383_v18, %v373_v14 }
  0xea   : > { %v289_v20 = vpop.f32.mrb[0].mxu0  ;;  %v360_v21 = vpop.f32.mrb[0].mxu1 }
  0xeb   : > { %v375_v23 = vmul.f32 %v374_v17, %v289_v20  ;;  %v377_v24 = vmul.f32 %v374_v17, %v360_v21  ;;  %v291_v25 = vpop.f32.mrb[1].mxu0  ;;  %v362_v26 = vpop.f32.mrb[1].mxu1 }
  0xec   : > { %v376_v27 = vmul.f32 %v374_v17, %v291_v25  ;;  %v378_v28 = vmul.f32 %v374_v17, %v362_v26 }
  0xed   : > { %v389_v29 = vadd.f32 %v388_v22, %v375_v23  ;;  %v391_v30 = vadd.f32 %v388_v22, %v377_v24 }
  0xee   : > { %v390_v32 = vadd.f32 %v388_v22, %v376_v27  ;;  %v392_v33 = vadd.f32 %v388_v22, %v378_v28 }
  0xf0   : > { %v397_v34 = vcombine.low %v389_v29, %v390_v32  ;;  %v398_v35 = vcombine.low %v391_v30, %v392_v33 }
  0xf2   : > { %v405_v36 = vrot.slane %v397_v34, %v404_v31  ;;  %v412_v37 = vrot.slane %v398_v35, %v404_v31 }
  0xf4   : > { %v413_v38 = vcombine.low %v405_v36, %v412_v37 }
  0xf6   : > { %v420_v39 = vrot.slane %v413_v38, %v404_v31 }
  0xf8   : > { %426 = vst.msk [vmem:[%s201_s28] sm:$0xf] %vm424_vm2, %v420_v39 }
  0xf9 PF: > { %s18_s19 = sadd.s32 1, %s513_s19  }
  0xfa   : > { %p15_p4 = scmp.ge.s32.totalorder %s18_s19, 4  }
  0xfc   :  { %17 = sbr.rel (!%p15_p4) target bundleno = 3 (0x3), region = 66 }

// kernel: _lambda_.26
= control target key start
LH: loop header
LB: loop body
LE: loop exit
PB: predicated region body
PF: predicated region fallthrough
CT: control target
= control target key end

     0   :  { %s983_s15 = smov 0   ;;  %s985_s16 = smov 0   ;;  %s1380_s0 = inlined_call_operand.vmem [shape: f32[4,216], index: 0, kind: input, shape index: {}]   ;;  %s1381_s1 = inlined_call_operand.vmem [shape: f32[216,1024], index: 1, kind: input, shape index: {}]   ;;  %s1382_s2 = inlined_call_operand.vmem [shape: f32[4,1], index: 2, kind: input, shape index: {}]   ;;  %s1383_s3 = inlined_call_operand.vmem [shape: f32[4,1], index: 3, kind: input, shape index: {}]   ;;  %s1384_s4 = inlined_call_operand.vmem [shape: f32[4,1024], index: 4, kind: output, shape index: {}]  }
   0x1   :  { %s987_s17 = smov 0  }
   0x2 LB: > { %s786_s18 = sadd.s32 4294967295, %s955_s17   ;;  %s1000_s19 = sadd.s32 1, %s955_s17   ;;  %s955_s17 = sphi %s987_s17, %s1387_s17   ;;  %s951_s16 = sphi %s985_s16, %s1386_s16   ;;  %s947_s15 = sphi %s983_s15, %s1385_s15  }
   0x3   : > { %s39_s20 = ssub.s32 %s955_s17, %s1000_s19  ;;  %s42_s21 = sadd.s32 1, %s951_s16 }
   0x4   : > { %p40_p0 = scmp.eq.s32.totalorder %s39_s20, 0  ;;  %p49_p1 = scmp.ne.s32.totalorder %s951_s16, %s947_s15 }
   0x5   : > { %p50_p2 = scmp.eq.s32.totalorder %s955_s17, 0  ;;  %p789_p4 = scmp.ge.s32.totalorder %s955_s17, 2 }
   0x6   : > { %s1009_s22 = scalar_select %p40_p0, %s951_s16, %s42_s21  }
   0x7   : > { %p51_p3 = por %p50_p2, %p49_p1  ;;  %152 = sbr.rel (%p789_p4) target bundleno = 73 (0x49), region = 28 }
   0xe   : > { %155 = sbr.rel (!%p51_p3) target bundleno = 73 (0x49), region = 32  ;;  %s157_s23 = sand.u32 (%p51_p3), 1, %s951_s16  }
   0xf   : > { %s799_s24 = sshll.u32 (%p51_p3), %s955_s17, 5  ;;  %s904_s25 = smul.u32 (%p51_p3), 864, %s157_s23 }
  0x10   : > { %s1017_s28 = scalar_lea.vmem (%p51_p3), %s1381_s1, %s799_s24 }
  0x11   : > { %v175_v0 = vld [vmem:[%s1017_s28] sm:$0xff] (%p51_p3)  ;;  %v177_v1 = vld [vmem:[%s1017_s28 + $0x8] sm:$0xff] (%p51_p3)  ;;  %v179_v2 = vld [vmem:[%s1017_s28 + $0x10] sm:$0xff] (%p51_p3)  ;;  %s1025_s29 = scalar_lea.vmem (%p51_p3), [#allocation2], %s904_s25 }
  0x12   : > { %v181_v3 = vld [vmem:[%s1017_s28 + $0x18] sm:$0xff] (%p51_p3)  ;;  %v183_v4 = vld [vmem:[%s1017_s28 + $0x40] sm:$0xff] (%p51_p3)  ;;  %v185_v5 = vld [vmem:[%s1017_s28 + $0x48] sm:$0xff] (%p51_p3)  ;;  %176 = vst [vmem:[%s1025_s29] sm:$0xff] (%p51_p3), %v175_v0 }
  0x13   : > { %178 = vst [vmem:[%s1025_s29 + $0x8] sm:$0xff] (%p51_p3), %v177_v1  ;;  %180 = vst [vmem:[%s1025_s29 + $0x10] sm:$0xff] (%p51_p3), %v179_v2  ;;  %v187_v6 = vld [vmem:[%s1017_s28 + $0x50] sm:$0xff] (%p51_p3)  ;;  %v189_v7 = vld [vmem:[%s1017_s28 + $0x58] sm:$0xff] (%p51_p3) }
  0x14   : > { %182 = vst [vmem:[%s1025_s29 + $0x18] sm:$0xff] (%p51_p3), %v181_v3  ;;  %184 = vst [vmem:[%s1025_s29 + $0x20] sm:$0xff] (%p51_p3), %v183_v4  ;;  %v191_v8 = vld [vmem:[%s1017_s28 + $0x80] sm:$0xff] (%p51_p3)  ;;  %v193_v9 = vld [vmem:[%s1017_s28 + $0x88] sm:$0xff] (%p51_p3) }
  0x15   : > { %186 = vst [vmem:[%s1025_s29 + $0x28] sm:$0xff] %v185_v5  ;;  %188 = vst [vmem:[%s1025_s29 + $0x30] sm:$0xff] %v187_v6  ;;  %v195_v10 = vld [vmem:[%s1017_s28 + $0x90] sm:$0xff]  ;;  %v197_v11 = vld [vmem:[%s1017_s28 + $0x98] sm:$0xff] }
  0x16   : > { %190 = vst [vmem:[%s1025_s29 + $0x38] sm:$0xff] %v189_v7  ;;  %192 = vst [vmem:[%s1025_s29 + $0x40] sm:$0xff] %v191_v8  ;;  %v199_v12 = vld [vmem:[%s1017_s28 + $0xc0] sm:$0xff]  ;;  %v201_v13 = vld [vmem:[%s1017_s28 + $0xc8] sm:$0xff] }
  0x17   : > { %194 = vst [vmem:[%s1025_s29 + $0x48] sm:$0xff] %v193_v9  ;;  %196 = vst [vmem:[%s1025_s29 + $0x50] sm:$0xff] %v195_v10  ;;  %v203_v14 = vld [vmem:[%s1017_s28 + $0xd0] sm:$0xff]  ;;  %v205_v15 = vld [vmem:[%s1017_s28 + $0xd8] sm:$0xff] }
  0x18   : > { %198 = vst [vmem:[%s1025_s29 + $0x58] sm:$0xff] %v197_v11  ;;  %200 = vst [vmem:[%s1025_s29 + $0x60] sm:$0xff] %v199_v12  ;;  %v207_v16 = vld [vmem:[%s1017_s28 + $0x100] sm:$0xff]  ;;  %v209_v17 = vld [vmem:[%s1017_s28 + $0x108] sm:$0xff] }
  0x19   : > { %202 = vst [vmem:[%s1025_s29 + $0x68] sm:$0xff] %v201_v13  ;;  %204 = vst [vmem:[%s1025_s29 + $0x70] sm:$0xff] %v203_v14  ;;  %v211_v18 = vld [vmem:[%s1017_s28 + $0x110] sm:$0xff]  ;;  %v213_v19 = vld [vmem:[%s1017_s28 + $0x118] sm:$0xff] }
  0x1a   : > { %206 = vst [vmem:[%s1025_s29 + $0x78] sm:$0xff] %v205_v15  ;;  %208 = vst [vmem:[%s1025_s29 + $0x80] sm:$0xff] %v207_v16  ;;  %v215_v20 = vld [vmem:[%s1017_s28 + $0x140] sm:$0xff]  ;;  %v217_v21 = vld [vmem:[%s1017_s28 + $0x148] sm:$0xff] }
  0x1b   : > { %210 = vst [vmem:[%s1025_s29 + $0x88] sm:$0xff] %v209_v17  ;;  %212 = vst [vmem:[%s1025_s29 + $0x90] sm:$0xff] %v211_v18  ;;  %v219_v22 = vld [vmem:[%s1017_s28 + $0x150] sm:$0xff]  ;;  %v221_v23 = vld [vmem:[%s1017_s28 + $0x158] sm:$0xff] }
  0x1c   : > { %214 = vst [vmem:[%s1025_s29 + $0x98] sm:$0xff] %v213_v19  ;;  %216 = vst [vmem:[%s1025_s29 + $0xa0] sm:$0xff] %v215_v20  ;;  %v223_v24 = vld [vmem:[%s1017_s28 + $0x180] sm:$0xff]  ;;  %v225_v25 = vld [vmem:[%s1017_s28 + $0x188] sm:$0xff] }
  0x1d   : > { %218 = vst [vmem:[%s1025_s29 + $0xa8] sm:$0xff] %v217_v21  ;;  %220 = vst [vmem:[%s1025_s29 + $0xb0] sm:$0xff] %v219_v22  ;;  %v227_v26 = vld [vmem:[%s1017_s28 + $0x190] sm:$0xff]  ;;  %v229_v27 = vld [vmem:[%s1017_s28 + $0x198] sm:$0xff] }
  0x1e   : > { %222 = vst [vmem:[%s1025_s29 + $0xb8] sm:$0xff] %v221_v23  ;;  %224 = vst [vmem:[%s1025_s29 + $0xc0] sm:$0xff] %v223_v24  ;;  %v231_v28 = vld [vmem:[%s1017_s28 + $0x1c0] sm:$0xff]  ;;  %v233_v29 = vld [vmem:[%s1017_s28 + $0x1c8] sm:$0xff] }
  0x1f   : > { %226 = vst [vmem:[%s1025_s29 + $0xc8] sm:$0xff] %v225_v25  ;;  %228 = vst [vmem:[%s1025_s29 + $0xd0] sm:$0xff] %v227_v26  ;;  %v235_v30 = vld [vmem:[%s1017_s28 + $0x1d0] sm:$0xff]  ;;  %v237_v31 = vld [vmem:[%s1017_s28 + $0x1d8] sm:$0xff] }
  0x20   : > { %230 = vst [vmem:[%s1025_s29 + $0xd8] sm:$0xff] %v229_v27  ;;  %232 = vst [vmem:[%s1025_s29 + $0xe0] sm:$0xff] %v231_v28  ;;  %v239_v32 = vld [vmem:[%s1017_s28 + $0x200] sm:$0xff]  ;;  %v241_v33 = vld [vmem:[%s1017_s28 + $0x208] sm:$0xff] }
  0x21   : > { %234 = vst [vmem:[%s1025_s29 + $0xe8] sm:$0xff] %v233_v29  ;;  %236 = vst [vmem:[%s1025_s29 + $0xf0] sm:$0xff] %v235_v30  ;;  %v243_v34 = vld [vmem:[%s1017_s28 + $0x210] sm:$0xff]  ;;  %v245_v35 = vld [vmem:[%s1017_s28 + $0x218] sm:$0xff] }
  0x22   : > { %238 = vst [vmem:[%s1025_s29 + $0xf8] sm:$0xff] %v237_v31  ;;  %240 = vst [vmem:[%s1025_s29 + $0x100] sm:$0xff] %v239_v32  ;;  %v247_v36 = vld [vmem:[%s1017_s28 + $0x240] sm:$0xff]  ;;  %v249_v37 = vld [vmem:[%s1017_s28 + $0x248] sm:$0xff] }
  0x23   : > { %242 = vst [vmem:[%s1025_s29 + $0x108] sm:$0xff] %v241_v33  ;;  %244 = vst [vmem:[%s1025_s29 + $0x110] sm:$0xff] %v243_v34  ;;  %v251_v38 = vld [vmem:[%s1017_s28 + $0x250] sm:$0xff]  ;;  %v253_v39 = vld [vmem:[%s1017_s28 + $0x258] sm:$0xff] }
  0x24   : > { %246 = vst [vmem:[%s1025_s29 + $0x118] sm:$0xff] %v245_v35  ;;  %248 = vst [vmem:[%s1025_s29 + $0x120] sm:$0xff] %v247_v36  ;;  %v255_v40 = vld [vmem:[%s1017_s28 + $0x280] sm:$0xff]  ;;  %v257_v41 = vld [vmem:[%s1017_s28 + $0x288] sm:$0xff] }
  0x25   : > { %250 = vst [vmem:[%s1025_s29 + $0x128] sm:$0xff] %v249_v37  ;;  %252 = vst [vmem:[%s1025_s29 + $0x130] sm:$0xff] %v251_v38  ;;  %v259_v42 = vld [vmem:[%s1017_s28 + $0x290] sm:$0xff]  ;;  %v261_v43 = vld [vmem:[%s1017_s28 + $0x298] sm:$0xff] }
  0x26   : > { %254 = vst [vmem:[%s1025_s29 + $0x138] sm:$0xff] %v253_v39  ;;  %256 = vst [vmem:[%s1025_s29 + $0x140] sm:$0xff] %v255_v40  ;;  %v263_v44 = vld [vmem:[%s1017_s28 + $0x2c0] sm:$0xff]  ;;  %v265_v45 = vld [vmem:[%s1017_s28 + $0x2c8] sm:$0xff] }
  0x27   : > { %258 = vst [vmem:[%s1025_s29 + $0x148] sm:$0xff] %v257_v41  ;;  %260 = vst [vmem:[%s1025_s29 + $0x150] sm:$0xff] %v259_v42  ;;  %v267_v46 = vld [vmem:[%s1017_s28 + $0x2d0] sm:$0xff]  ;;  %v269_v47 = vld [vmem:[%s1017_s28 + $0x2d8] sm:$0xff] }
  0x28   : > { %262 = vst [vmem:[%s1025_s29 + $0x158] sm:$0xff] %v261_v43  ;;  %264 = vst [vmem:[%s1025_s29 + $0x160] sm:$0xff] %v263_v44  ;;  %v271_v48 = vld [vmem:[%s1017_s28 + $0x300] sm:$0xff]  ;;  %v273_v49 = vld [vmem:[%s1017_s28 + $0x308] sm:$0xff] }
  0x29   : > { %266 = vst [vmem:[%s1025_s29 + $0x168] sm:$0xff] %v265_v45  ;;  %268 = vst [vmem:[%s1025_s29 + $0x170] sm:$0xff] %v267_v46  ;;  %v275_v50 = vld [vmem:[%s1017_s28 + $0x310] sm:$0xff]  ;;  %v277_v51 = vld [vmem:[%s1017_s28 + $0x318] sm:$0xff] }
  0x2a   : > { %270 = vst [vmem:[%s1025_s29 + $0x178] sm:$0xff] %v269_v47  ;;  %272 = vst [vmem:[%s1025_s29 + $0x180] sm:$0xff] %v271_v48  ;;  %v279_v52 = vld [vmem:[%s1017_s28 + $0x340] sm:$0xff]  ;;  %v281_v53 = vld [vmem:[%s1017_s28 + $0x348] sm:$0xff] }
  0x2b   : > { %274 = vst [vmem:[%s1025_s29 + $0x188] sm:$0xff] %v273_v49  ;;  %276 = vst [vmem:[%s1025_s29 + $0x190] sm:$0xff] %v275_v50  ;;  %v283_v54 = vld [vmem:[%s1017_s28 + $0x350] sm:$0xff]  ;;  %v285_v55 = vld [vmem:[%s1017_s28 + $0x358] sm:$0xff] }
  0x2c   : > { %278 = vst [vmem:[%s1025_s29 + $0x198] sm:$0xff] %v277_v51  ;;  %280 = vst [vmem:[%s1025_s29 + $0x1a0] sm:$0xff] %v279_v52  ;;  %v287_v56 = vld [vmem:[%s1017_s28 + $0x380] sm:$0xff]  ;;  %v289_v57 = vld [vmem:[%s1017_s28 + $0x388] sm:$0xff] }
  0x2d   : > { %282 = vst [vmem:[%s1025_s29 + $0x1a8] sm:$0xff] %v281_v53  ;;  %284 = vst [vmem:[%s1025_s29 + $0x1b0] sm:$0xff] %v283_v54  ;;  %v291_v58 = vld [vmem:[%s1017_s28 + $0x390] sm:$0xff]  ;;  %v293_v59 = vld [vmem:[%s1017_s28 + $0x398] sm:$0xff] }
  0x2e   : > { %286 = vst [vmem:[%s1025_s29 + $0x1b8] sm:$0xff] %v285_v55  ;;  %288 = vst [vmem:[%s1025_s29 + $0x1c0] sm:$0xff] %v287_v56  ;;  %v295_v60 = vld [vmem:[%s1017_s28 + $0x3c0] sm:$0xff]  ;;  %v297_v61 = vld [vmem:[%s1017_s28 + $0x3c8] sm:$0xff] }
  0x2f   : > { %290 = vst [vmem:[%s1025_s29 + $0x1c8] sm:$0xff] %v289_v57  ;;  %292 = vst [vmem:[%s1025_s29 + $0x1d0] sm:$0xff] %v291_v58  ;;  %v299_v62 = vld [vmem:[%s1017_s28 + $0x3d0] sm:$0xff]  ;;  %v301_v63 = vld [vmem:[%s1017_s28 + $0x3d8] sm:$0xff] }
  0x30   : > { %294 = vst [vmem:[%s1025_s29 + $0x1d8] sm:$0xff] %v293_v59  ;;  %296 = vst [vmem:[%s1025_s29 + $0x1e0] sm:$0xff] %v295_v60  ;;  %v303_v0 = vld [vmem:[%s1017_s28 + $0x400] sm:$0xff]  ;;  %v305_v1 = vld [vmem:[%s1017_s28 + $0x408] sm:$0xff] }
  0x31   : > { %298 = vst [vmem:[%s1025_s29 + $0x1e8] sm:$0xff] %v297_v61  ;;  %300 = vst [vmem:[%s1025_s29 + $0x1f0] sm:$0xff] %v299_v62  ;;  %v307_v2 = vld [vmem:[%s1017_s28 + $0x410] sm:$0xff]  ;;  %v309_v3 = vld [vmem:[%s1017_s28 + $0x418] sm:$0xff] }
  0x32   : > { %302 = vst [vmem:[%s1025_s29 + $0x1f8] sm:$0xff] %v301_v63  ;;  %304 = vst [vmem:[%s1025_s29 + $0x200] sm:$0xff] %v303_v0  ;;  %v311_v4 = vld [vmem:[%s1017_s28 + $0x440] sm:$0xff]  ;;  %v313_v5 = vld [vmem:[%s1017_s28 + $0x448] sm:$0xff] }
  0x33   : > { %306 = vst [vmem:[%s1025_s29 + $0x208] sm:$0xff] %v305_v1  ;;  %308 = vst [vmem:[%s1025_s29 + $0x210] sm:$0xff] %v307_v2  ;;  %v315_v6 = vld [vmem:[%s1017_s28 + $0x450] sm:$0xff]  ;;  %v317_v7 = vld [vmem:[%s1017_s28 + $0x458] sm:$0xff] }
  0x34   : > { %310 = vst [vmem:[%s1025_s29 + $0x218] sm:$0xff] %v309_v3  ;;  %312 = vst [vmem:[%s1025_s29 + $0x220] sm:$0xff] %v311_v4  ;;  %v319_v8 = vld [vmem:[%s1017_s28 + $0x480] sm:$0xff]  ;;  %v321_v9 = vld [vmem:[%s1017_s28 + $0x488] sm:$0xff] }
  0x35   : > { %314 = vst [vmem:[%s1025_s29 + $0x228] sm:$0xff] %v313_v5  ;;  %316 = vst [vmem:[%s1025_s29 + $0x230] sm:$0xff] %v315_v6  ;;  %v323_v10 = vld [vmem:[%s1017_s28 + $0x490] sm:$0xff]  ;;  %v325_v11 = vld [vmem:[%s1017_s28 + $0x498] sm:$0xff] }
  0x36   : > { %318 = vst [vmem:[%s1025_s29 + $0x238] sm:$0xff] %v317_v7  ;;  %320 = vst [vmem:[%s1025_s29 + $0x240] sm:$0xff] %v319_v8  ;;  %v327_v12 = vld [vmem:[%s1017_s28 + $0x4c0] sm:$0xff]  ;;  %v329_v13 = vld [vmem:[%s1017_s28 + $0x4c8] sm:$0xff] }
  0x37   : > { %322 = vst [vmem:[%s1025_s29 + $0x248] sm:$0xff] %v321_v9  ;;  %324 = vst [vmem:[%s1025_s29 + $0x250] sm:$0xff] %v323_v10  ;;  %v331_v14 = vld [vmem:[%s1017_s28 + $0x4d0] sm:$0xff]  ;;  %v333_v15 = vld [vmem:[%s1017_s28 + $0x4d8] sm:$0xff] }
  0x38   : > { %326 = vst [vmem:[%s1025_s29 + $0x258] sm:$0xff] %v325_v11  ;;  %328 = vst [vmem:[%s1025_s29 + $0x260] sm:$0xff] %v327_v12  ;;  %v335_v16 = vld [vmem:[%s1017_s28 + $0x500] sm:$0xff]  ;;  %v337_v17 = vld [vmem:[%s1017_s28 + $0x508] sm:$0xff] }
  0x39   : > { %330 = vst [vmem:[%s1025_s29 + $0x268] sm:$0xff] %v329_v13  ;;  %332 = vst [vmem:[%s1025_s29 + $0x270] sm:$0xff] %v331_v14  ;;  %v339_v18 = vld [vmem:[%s1017_s28 + $0x510] sm:$0xff]  ;;  %v341_v19 = vld [vmem:[%s1017_s28 + $0x518] sm:$0xff] }
  0x3a   : > { %334 = vst [vmem:[%s1025_s29 + $0x278] sm:$0xff] %v333_v15  ;;  %336 = vst [vmem:[%s1025_s29 + $0x280] sm:$0xff] %v335_v16  ;;  %v343_v20 = vld [vmem:[%s1017_s28 + $0x540] sm:$0xff]  ;;  %v345_v21 = vld [vmem:[%s1017_s28 + $0x548] sm:$0xff] }
  0x3b   : > { %338 = vst [vmem:[%s1025_s29 + $0x288] sm:$0xff] %v337_v17  ;;  %340 = vst [vmem:[%s1025_s29 + $0x290] sm:$0xff] %v339_v18  ;;  %v347_v22 = vld [vmem:[%s1017_s28 + $0x550] sm:$0xff]  ;;  %v349_v23 = vld [vmem:[%s1017_s28 + $0x558] sm:$0xff] }
  0x3c   : > { %342 = vst [vmem:[%s1025_s29 + $0x298] sm:$0xff] %v341_v19  ;;  %344 = vst [vmem:[%s1025_s29 + $0x2a0] sm:$0xff] %v343_v20  ;;  %v351_v24 = vld [vmem:[%s1017_s28 + $0x580] sm:$0xff]  ;;  %v353_v25 = vld [vmem:[%s1017_s28 + $0x588] sm:$0xff] }
  0x3d   : > { %346 = vst [vmem:[%s1025_s29 + $0x2a8] sm:$0xff] %v345_v21  ;;  %348 = vst [vmem:[%s1025_s29 + $0x2b0] sm:$0xff] %v347_v22  ;;  %v355_v26 = vld [vmem:[%s1017_s28 + $0x590] sm:$0xff]  ;;  %v357_v27 = vld [vmem:[%s1017_s28 + $0x598] sm:$0xff] }
  0x3e   : > { %350 = vst [vmem:[%s1025_s29 + $0x2b8] sm:$0xff] %v349_v23  ;;  %352 = vst [vmem:[%s1025_s29 + $0x2c0] sm:$0xff] %v351_v24  ;;  %v359_v28 = vld [vmem:[%s1017_s28 + $0x5c0] sm:$0xff]  ;;  %v361_v29 = vld [vmem:[%s1017_s28 + $0x5c8] sm:$0xff] }
  0x3f   : > { %354 = vst [vmem:[%s1025_s29 + $0x2c8] sm:$0xff] %v353_v25  ;;  %356 = vst [vmem:[%s1025_s29 + $0x2d0] sm:$0xff] %v355_v26  ;;  %v363_v30 = vld [vmem:[%s1017_s28 + $0x5d0] sm:$0xff]  ;;  %v365_v31 = vld [vmem:[%s1017_s28 + $0x5d8] sm:$0xff] }
  0x40   : > { %358 = vst [vmem:[%s1025_s29 + $0x2d8] sm:$0xff] %v357_v27  ;;  %360 = vst [vmem:[%s1025_s29 + $0x2e0] sm:$0xff] %v359_v28  ;;  %v367_v32 = vld [vmem:[%s1017_s28 + $0x600] sm:$0xff]  ;;  %v369_v33 = vld [vmem:[%s1017_s28 + $0x608] sm:$0xff] }
  0x41   : > { %362 = vst [vmem:[%s1025_s29 + $0x2e8] sm:$0xff] %v361_v29  ;;  %364 = vst [vmem:[%s1025_s29 + $0x2f0] sm:$0xff] %v363_v30  ;;  %v371_v34 = vld [vmem:[%s1017_s28 + $0x610] sm:$0xff]  ;;  %v373_v35 = vld [vmem:[%s1017_s28 + $0x618] sm:$0xff] }
  0x42   : > { %366 = vst [vmem:[%s1025_s29 + $0x2f8] sm:$0xff] %v365_v31  ;;  %368 = vst [vmem:[%s1025_s29 + $0x300] sm:$0xff] %v367_v32  ;;  %v375_v36 = vld [vmem:[%s1017_s28 + $0x640] sm:$0xff]  ;;  %v377_v37 = vld [vmem:[%s1017_s28 + $0x648] sm:$0xff] }
  0x43   : > { %370 = vst [vmem:[%s1025_s29 + $0x308] sm:$0xff] %v369_v33  ;;  %372 = vst [vmem:[%s1025_s29 + $0x310] sm:$0xff] %v371_v34  ;;  %v379_v38 = vld [vmem:[%s1017_s28 + $0x650] sm:$0xff]  ;;  %v381_v39 = vld [vmem:[%s1017_s28 + $0x658] sm:$0xff] }
  0x44   : > { %374 = vst [vmem:[%s1025_s29 + $0x318] sm:$0xff] %v373_v35  ;;  %376 = vst [vmem:[%s1025_s29 + $0x320] sm:$0xff] %v375_v36  ;;  %v383_v40 = vld [vmem:[%s1017_s28 + $0x680] sm:$0xff]  ;;  %v385_v41 = vld [vmem:[%s1017_s28 + $0x688] sm:$0xff] }
  0x45   : > { %378 = vst [vmem:[%s1025_s29 + $0x328] sm:$0xff] %v377_v37  ;;  %380 = vst [vmem:[%s1025_s29 + $0x330] sm:$0xff] %v379_v38  ;;  %v387_v42 = vld [vmem:[%s1017_s28 + $0x690] sm:$0xff]  ;;  %v389_v43 = vld [vmem:[%s1017_s28 + $0x698] sm:$0xff] }
  0x46   : > { %382 = vst [vmem:[%s1025_s29 + $0x338] sm:$0xff] %v381_v39  ;;  %384 = vst [vmem:[%s1025_s29 + $0x340] sm:$0xff] %v383_v40 }
  0x47   : > { %386 = vst [vmem:[%s1025_s29 + $0x348] sm:$0xff] %v385_v41  ;;  %388 = vst [vmem:[%s1025_s29 + $0x350] sm:$0xff] %v387_v42 }
  0x48   : > { %390 = vst [vmem:[%s1025_s29 + $0x358] sm:$0xff] %v389_v43 }
  0x49 PF: > { %p792_p5 = scmp.ge.s32.totalorder %s955_s17, 1  ;;  %p395_p6 = scmp.lt.s32.totalorder %s955_s17, 3 }
  0x4b   : > { %p396_p7 = pnand %p792_p5, %p395_p6 }
  0x4c   : > { %s402_s30 = sand.u32 (!%p396_p7), 1, %s947_s15   ;;  %v1243_v44 = vld [vmem:[%s1380_s0] sm:$0xff] (!%p396_p7)  ;;  %vm545_vm0 = vcmask (!%p396_p7), 719872   ;;  %v957_v47 = vmov (!%p396_p7), 0   ;;  %s793_s13 = sshll.u32 (!%p396_p7), %s786_s18, 2 }
  0x4d   : > { %399 = sbr.rel (%p396_p7) target bundleno = 362 (0x16a), region = 55  ;;  %v690_v45 = vld [vmem:[%s1382_s2] sm:$0xf] (!%p396_p7)  ;;  %v544_v46 = vcombine.high (!%p396_p7), %v1243_v44, %v1243_v44  ;;  %931 = vset.pattern.permute.xlu0 (!%p396_p7), %v957_v47  ;;  %p429_p8 = scmp.lt.s32.totalorder (!%p396_p7), %s793_s13, 7 }
  0x4e   : > { %s905_s9 = smul.u32 (!%p396_p7), 864, %s402_s30  ;;  %693 = vperm.xlu0 (!%p396_p7), %931, %v690_v45   ;;  %v700_v48 = vld [vmem:[%s1383_s3] sm:$0xf] (!%p396_p7) }
  0x4f   : > { %795 = vmatprep.mubr.msk.f32.mxu0 (!%p396_p7), %vm545_vm0, %v544_v46  ;;  %796 = vmatprep.mubr.msk.f32.mxu1 (!%p396_p7), %vm545_vm0, %v544_v46 }
  0x50   : > { %s1253_s12 = scalar_lea.vmem (!%p396_p7), [#allocation2], %s905_s9 }
  0x51   : > { %v436_v49 = vld [vmem:[%s1253_s12 + $0x8] sm:$0xff] (!%p396_p7)  ;;  %v438_v51 = vld [vmem:[%s1253_s12 + $0x18] sm:$0xff] (!%p396_p7)  ;;  %v435_v54 = vld [vmem:[%s1253_s12] sm:$0xff] (!%p396_p7) }
  0x52   : > { %v440_v50 = vld [vmem:[%s1253_s12 + $0x28] sm:$0xff] (!%p396_p7)  ;;  %v442_v53 = vld [vmem:[%s1253_s12 + $0x38] sm:$0xff] (!%p396_p7)  ;;  %v439_v55 = vld [vmem:[%s1253_s12 + $0x20] sm:$0xff] (!%p396_p7)  ;;  %703 = vperm.xlu0 (!%p396_p7), %931, %v700_v48  }
  0x53   : > { %v800_v52 = vpack.c.bf16 (!%p396_p7), %v440_v50, %v436_v49  ;;  %v852_v56 = vpack.c.bf16 (!%p396_p7), %v442_v53, %v438_v51  ;;  %v802_v57 = vpack.c.bf16 (!%p396_p7), %v439_v55, %v435_v54  ;;  %v437_v58 = vld [vmem:[%s1253_s12 + $0x10] sm:$0xff] (!%p396_p7)  ;;  %v444_v60 = vld [vmem:[%s1253_s12 + $0x48] sm:$0xff] (!%p396_p7)  ;;  %v446_v63 = vld [vmem:[%s1253_s12 + $0x58] sm:$0xff] (!%p396_p7) }
  0x54   : > { %v441_v59 = vld [vmem:[%s1253_s12 + $0x30] sm:$0xff]  ;;  %v448_v62 = vld [vmem:[%s1253_s12 + $0x68] sm:$0xff]  ;;  %v450_v0 = vld [vmem:[%s1253_s12 + $0x78] sm:$0xff]  ;;  %s1389_s13 = smov (!%p429_p8, %s793_s13), 7 }
  0x55   : > { %801 = vmatprep.subr.bf16.mxu0 %v800_v52  ;;  %v854_v61 = vpack.c.bf16 %v441_v59, %v437_v58  ;;  %853 = vmatprep.subr.bf16.mxu1 %v852_v56  ;;  %v804_v1 = vpack.c.bf16 %v448_v62, %v444_v60  ;;  %v856_v2 = vpack.c.bf16 %v450_v0, %v446_v63  ;;  %v443_v3 = vld [vmem:[%s1253_s12 + $0x40] sm:$0xff]  ;;  %v445_v5 = vld [vmem:[%s1253_s12 + $0x50] sm:$0xff]  ;;  %v452_v8 = vld [vmem:[%s1253_s12 + $0x88] sm:$0xff]  ;;  %s794_s14 = sshll.u32 %s1389_s13, 2 }
  0x56   : > { %803 = vmatpush1.bf16.msra.mxu0 %v802_v57  ;;  %v447_v4 = vld [vmem:[%s1253_s12 + $0x60] sm:$0xff]  ;;  %v449_v7 = vld [vmem:[%s1253_s12 + $0x70] sm:$0xff]  ;;  %v456_v9 = vld [vmem:[%s1253_s12 + $0xa8] sm:$0xff]  ;;  %s432_s18 = scalar_lea.vmem %s1384_s4, %s794_s14 }
  0x57   : > { %855 = vmatpush1.bf16.msra.mxu1 %v854_v61  ;;  %v806_v6 = vpack.c.bf16 %v447_v4, %v443_v3  ;;  %805 = vmatprep.subr.bf16.mxu0 %v804_v1  ;;  %v858_v10 = vpack.c.bf16 %v449_v7, %v445_v5  ;;  %v808_v11 = vpack.c.bf16 %v456_v9, %v452_v8  ;;  %v454_v12 = vld [vmem:[%s1253_s12 + $0x98] sm:$0xff]  ;;  %v451_v14 = vld [vmem:[%s1253_s12 + $0x80] sm:$0xff]  ;;  %v453_v17 = vld [vmem:[%s1253_s12 + $0x90] sm:$0xff] }
  0x58   : > { %857 = vmatprep.subr.bf16.mxu1 %v856_v2  ;;  %v458_v13 = vld [vmem:[%s1253_s12 + $0xb8] sm:$0xff]  ;;  %v455_v16 = vld [vmem:[%s1253_s12 + $0xa0] sm:$0xff]  ;;  %v457_v18 = vld [vmem:[%s1253_s12 + $0xb0] sm:$0xff] }
  0x59   : > { %v860_v15 = vpack.c.bf16 %v458_v13, %v454_v12  ;;  %v810_v19 = vpack.c.bf16 %v455_v16, %v451_v14  ;;  %v460_v20 = vld [vmem:[%s1253_s12 + $0xc8] sm:$0xff]  ;;  %v462_v22 = vld [vmem:[%s1253_s12 + $0xd8] sm:$0xff]  ;;  %v862_v23 = vpack.c.bf16 %v457_v18, %v453_v17  ;;  %v459_v26 = vld [vmem:[%s1253_s12 + $0xc0] sm:$0xff] }
  0x5a   : > { %807 = vmatpush1.bf16.msra.mxu0 %v806_v6  ;;  %v464_v21 = vld [vmem:[%s1253_s12 + $0xe8] sm:$0xff]  ;;  %v466_v25 = vld [vmem:[%s1253_s12 + $0xf8] sm:$0xff]  ;;  %v463_v27 = vld [vmem:[%s1253_s12 + $0xe0] sm:$0xff] }
  0x5b   : > { %859 = vmatpush1.bf16.msra.mxu1 %v858_v10  ;;  %809 = vmatprep.subr.bf16.mxu0 %v808_v11  ;;  %v812_v24 = vpack.c.bf16 %v464_v21, %v460_v20  ;;  %v864_v28 = vpack.c.bf16 %v466_v25, %v462_v22  ;;  %v461_v29 = vld [vmem:[%s1253_s12 + $0xd0] sm:$0xff]  ;;  %v468_v31 = vld [vmem:[%s1253_s12 + $0x108] sm:$0xff]  ;;  %v470_v33 = vld [vmem:[%s1253_s12 + $0x118] sm:$0xff]  ;;  %v814_v35 = vpack.c.bf16 %v463_v27, %v459_v26 }
  0x5c   : > { %861 = vmatprep.subr.bf16.mxu1 %v860_v15  ;;  %v465_v30 = vld [vmem:[%s1253_s12 + $0xf0] sm:$0xff]  ;;  %v472_v32 = vld [vmem:[%s1253_s12 + $0x128] sm:$0xff]  ;;  %v474_v34 = vld [vmem:[%s1253_s12 + $0x138] sm:$0xff] }
  0x5d   : > { %v866_v36 = vpack.c.bf16 %v465_v30, %v461_v29  ;;  %v816_v37 = vpack.c.bf16 %v472_v32, %v468_v31  ;;  %v467_v38 = vld [vmem:[%s1253_s12 + $0x100] sm:$0xff]  ;;  %v469_v40 = vld [vmem:[%s1253_s12 + $0x110] sm:$0xff]  ;;  %v868_v41 = vpack.c.bf16 %v474_v34, %v470_v33  ;;  %v476_v43 = vld [vmem:[%s1253_s12 + $0x148] sm:$0xff] }
  0x5e   : > { %811 = vmatpush1.bf16.msra.mxu0 %v810_v19  ;;  %v471_v39 = vld [vmem:[%s1253_s12 + $0x120] sm:$0xff]  ;;  %v473_v42 = vld [vmem:[%s1253_s12 + $0x130] sm:$0xff]  ;;  %v480_v45 = vld [vmem:[%s1253_s12 + $0x168] sm:$0xff] }
  0x5f   : > { %863 = vmatpush1.bf16.msra.mxu1 %v862_v23  ;;  %813 = vmatprep.subr.bf16.mxu0 %v812_v24  ;;  %v478_v46 = vld [vmem:[%s1253_s12 + $0x158] sm:$0xff]  ;;  %v818_v48 = vpack.c.bf16 %v471_v39, %v467_v38  ;;  %v870_v49 = vpack.c.bf16 %v473_v42, %v469_v40  ;;  %v820_v50 = vpack.c.bf16 %v480_v45, %v476_v43  ;;  %v475_v51 = vld [vmem:[%s1253_s12 + $0x140] sm:$0xff]  ;;  %v477_v53 = vld [vmem:[%s1253_s12 + $0x150] sm:$0xff] }
  0x60   : > { %865 = vmatprep.subr.bf16.mxu1 %v864_v28  ;;  %v482_v47 = vld [vmem:[%s1253_s12 + $0x178] sm:$0xff]  ;;  %v479_v52 = vld [vmem:[%s1253_s12 + $0x160] sm:$0xff]  ;;  %v481_v55 = vld [vmem:[%s1253_s12 + $0x170] sm:$0xff] }
  0x61   : > { %v872_v54 = vpack.c.bf16 %v482_v47, %v478_v46  ;;  %v484_v56 = vld [vmem:[%s1253_s12 + $0x188] sm:$0xff]  ;;  %v486_v58 = vld [vmem:[%s1253_s12 + $0x198] sm:$0xff]  ;;  %v822_v60 = vpack.c.bf16 %v479_v52, %v475_v51  ;;  %v874_v61 = vpack.c.bf16 %v481_v55, %v477_v53  ;;  %v483_v63 = vld [vmem:[%s1253_s12 + $0x180] sm:$0xff] }
  0x62   : > { %815 = vmatpush1.bf16.msra.mxu0 %v814_v35  ;;  %v488_v57 = vld [vmem:[%s1253_s12 + $0x1a8] sm:$0xff]  ;;  %v490_v59 = vld [vmem:[%s1253_s12 + $0x1b8] sm:$0xff]  ;;  %v487_v0 = vld [vmem:[%s1253_s12 + $0x1a0] sm:$0xff] }
  0x63   : > { %867 = vmatpush1.bf16.msra.mxu1 %v866_v36  ;;  %817 = vmatprep.subr.bf16.mxu0 %v816_v37  ;;  %v824_v62 = vpack.c.bf16 %v488_v57, %v484_v56  ;;  %v485_v1 = vld [vmem:[%s1253_s12 + $0x190] sm:$0xff]  ;;  %v876_v2 = vpack.c.bf16 %v490_v59, %v486_v58  ;;  %v492_v4 = vld [vmem:[%s1253_s12 + $0x1c8] sm:$0xff]  ;;  %v494_v6 = vld [vmem:[%s1253_s12 + $0x1d8] sm:$0xff]  ;;  %v826_v8 = vpack.c.bf16 %v487_v0, %v483_v63 }
  0x64   : > { %869 = vmatprep.subr.bf16.mxu1 %v868_v41  ;;  %v489_v3 = vld [vmem:[%s1253_s12 + $0x1b0] sm:$0xff]  ;;  %v496_v5 = vld [vmem:[%s1253_s12 + $0x1e8] sm:$0xff]  ;;  %v498_v7 = vld [vmem:[%s1253_s12 + $0x1f8] sm:$0xff] }
  0x65   : > { %v878_v9 = vpack.c.bf16 %v489_v3, %v485_v1  ;;  %v828_v10 = vpack.c.bf16 %v496_v5, %v492_v4  ;;  %v491_v11 = vld [vmem:[%s1253_s12 + $0x1c0] sm:$0xff]  ;;  %v493_v13 = vld [vmem:[%s1253_s12 + $0x1d0] sm:$0xff]  ;;  %v880_v14 = vpack.c.bf16 %v498_v7, %v494_v6  ;;  %v500_v16 = vld [vmem:[%s1253_s12 + $0x208] sm:$0xff] }
  0x66   : > { %819 = vmatpush1.bf16.msra.mxu0 %v818_v48  ;;  %v495_v12 = vld [vmem:[%s1253_s12 + $0x1e0] sm:$0xff]  ;;  %v497_v15 = vld [vmem:[%s1253_s12 + $0x1f0] sm:$0xff]  ;;  %v504_v17 = vld [vmem:[%s1253_s12 + $0x228] sm:$0xff] }
  0x67   : > { %871 = vmatpush1.bf16.msra.mxu1 %v870_v49  ;;  %821 = vmatprep.subr.bf16.mxu0 %v820_v50  ;;  %v502_v18 = vld [vmem:[%s1253_s12 + $0x218] sm:$0xff]  ;;  %v830_v20 = vpack.c.bf16 %v495_v12, %v491_v11  ;;  %v882_v21 = vpack.c.bf16 %v497_v15, %v493_v13  ;;  %v832_v22 = vpack.c.bf16 %v504_v17, %v500_v16  ;;  %v499_v23 = vld [vmem:[%s1253_s12 + $0x200] sm:$0xff]  ;;  %v501_v25 = vld [vmem:[%s1253_s12 + $0x210] sm:$0xff] }
  0x68   : > { %873 = vmatprep.subr.bf16.mxu1 %v872_v54  ;;  %v506_v19 = vld [vmem:[%s1253_s12 + $0x238] sm:$0xff]  ;;  %v503_v24 = vld [vmem:[%s1253_s12 + $0x220] sm:$0xff]  ;;  %v505_v27 = vld [vmem:[%s1253_s12 + $0x230] sm:$0xff] }
  0x69   : > { %v884_v26 = vpack.c.bf16 %v506_v19, %v502_v18  ;;  %v508_v28 = vld [vmem:[%s1253_s12 + $0x248] sm:$0xff]  ;;  %v510_v30 = vld [vmem:[%s1253_s12 + $0x258] sm:$0xff]  ;;  %v834_v32 = vpack.c.bf16 %v503_v24, %v499_v23  ;;  %v886_v33 = vpack.c.bf16 %v505_v27, %v501_v25  ;;  %v507_v35 = vld [vmem:[%s1253_s12 + $0x240] sm:$0xff] }
  0x6a   : > { %823 = vmatpush1.bf16.msra.mxu0 %v822_v60  ;;  %v512_v29 = vld [vmem:[%s1253_s12 + $0x268] sm:$0xff]  ;;  %v514_v31 = vld [vmem:[%s1253_s12 + $0x278] sm:$0xff]  ;;  %v511_v36 = vld [vmem:[%s1253_s12 + $0x260] sm:$0xff] }
  0x6b   : > { %875 = vmatpush1.bf16.msra.mxu1 %v874_v61  ;;  %825 = vmatprep.subr.bf16.mxu0 %v824_v62  ;;  %v836_v34 = vpack.c.bf16 %v512_v29, %v508_v28  ;;  %v509_v37 = vld [vmem:[%s1253_s12 + $0x250] sm:$0xff]  ;;  %v888_v38 = vpack.c.bf16 %v514_v31, %v510_v30  ;;  %v516_v40 = vld [vmem:[%s1253_s12 + $0x288] sm:$0xff]  ;;  %v518_v42 = vld [vmem:[%s1253_s12 + $0x298] sm:$0xff]  ;;  %v838_v45 = vpack.c.bf16 %v511_v36, %v507_v35 }
  0x6c   : > { %877 = vmatprep.subr.bf16.mxu1 %v876_v2  ;;  %v513_v39 = vld [vmem:[%s1253_s12 + $0x270] sm:$0xff]  ;;  %v520_v41 = vld [vmem:[%s1253_s12 + $0x2a8] sm:$0xff]  ;;  %v522_v43 = vld [vmem:[%s1253_s12 + $0x2b8] sm:$0xff] }
  0x6d   : > { %v890_v46 = vpack.c.bf16 %v513_v39, %v509_v37  ;;  %v840_v47 = vpack.c.bf16 %v520_v41, %v516_v40  ;;  %v515_v48 = vld [vmem:[%s1253_s12 + $0x280] sm:$0xff]  ;;  %v517_v50 = vld [vmem:[%s1253_s12 + $0x290] sm:$0xff]  ;;  %v892_v51 = vpack.c.bf16 %v522_v43, %v518_v42  ;;  %v524_v53 = vld [vmem:[%s1253_s12 + $0x2c8] sm:$0xff] }
  0x6e   : > { %827 = vmatpush1.bf16.msra.mxu0 %v826_v8  ;;  %v519_v49 = vld [vmem:[%s1253_s12 + $0x2a0] sm:$0xff]  ;;  %v521_v52 = vld [vmem:[%s1253_s12 + $0x2b0] sm:$0xff]  ;;  %v528_v54 = vld [vmem:[%s1253_s12 + $0x2e8] sm:$0xff] }
  0x6f   : > { %879 = vmatpush1.bf16.msra.mxu1 %v878_v9  ;;  %829 = vmatprep.subr.bf16.mxu0 %v828_v10  ;;  %v526_v55 = vld [vmem:[%s1253_s12 + $0x2d8] sm:$0xff]  ;;  %v842_v57 = vpack.c.bf16 %v519_v49, %v515_v48  ;;  %v894_v58 = vpack.c.bf16 %v521_v52, %v517_v50  ;;  %v844_v59 = vpack.c.bf16 %v528_v54, %v524_v53  ;;  %v523_v60 = vld [vmem:[%s1253_s12 + $0x2c0] sm:$0xff]  ;;  %v525_v62 = vld [vmem:[%s1253_s12 + $0x2d0] sm:$0xff] }
  0x70   : > { %881 = vmatprep.subr.bf16.mxu1 %v880_v14  ;;  %v530_v56 = vld [vmem:[%s1253_s12 + $0x2f8] sm:$0xff]  ;;  %v527_v61 = vld [vmem:[%s1253_s12 + $0x2e0] sm:$0xff]  ;;  %v529_v0 = vld [vmem:[%s1253_s12 + $0x2f0] sm:$0xff] }
  0x71   : > { %v896_v63 = vpack.c.bf16 %v530_v56, %v526_v55  ;;  %v532_v1 = vld [vmem:[%s1253_s12 + $0x308] sm:$0xff]  ;;  %v534_v3 = vld [vmem:[%s1253_s12 + $0x318] sm:$0xff]  ;;  %v846_v5 = vpack.c.bf16 %v527_v61, %v523_v60  ;;  %v898_v6 = vpack.c.bf16 %v529_v0, %v525_v62  ;;  %v531_v8 = vld [vmem:[%s1253_s12 + $0x300] sm:$0xff] }
  0x72   : > { %831 = vmatpush1.bf16.msra.mxu0 %v830_v20  ;;  %v536_v2 = vld [vmem:[%s1253_s12 + $0x328] sm:$0xff]  ;;  %v538_v4 = vld [vmem:[%s1253_s12 + $0x338] sm:$0xff]  ;;  %v535_v9 = vld [vmem:[%s1253_s12 + $0x320] sm:$0xff] }
  0x73   : > { %883 = vmatpush1.bf16.msra.mxu1 %v882_v21  ;;  %833 = vmatprep.subr.bf16.mxu0 %v832_v22  ;;  %v848_v7 = vpack.c.bf16 %v536_v2, %v532_v1  ;;  %v900_v10 = vpack.c.bf16 %v538_v4, %v534_v3  ;;  %v533_v11 = vld [vmem:[%s1253_s12 + $0x310] sm:$0xff]  ;;  %v850_v13 = vpack.c.bf16 %v535_v9, %v531_v8  ;;  %v540_v15 = vld [vmem:[%s1253_s12 + $0x348] sm:$0xff]  ;;  %v542_v16 = vld [vmem:[%s1253_s12 + $0x358] sm:$0xff] }
  0x74   : > { %885 = vmatprep.subr.bf16.mxu1 %v884_v26  ;;  %v537_v12 = vld [vmem:[%s1253_s12 + $0x330] sm:$0xff]  ;;  %v539_v17 = vld [vmem:[%s1253_s12 + $0x340] sm:$0xff] }
  0x75   : > { %v902_v14 = vpack.c.bf16 %v537_v12, %v533_v11  ;;  %v541_v18 = vld [vmem:[%s1253_s12 + $0x350] sm:$0xff] }
  0x76   : > { %835 = vmatpush1.bf16.msra.mxu0 %v834_v32 }
  0x77   : > { %887 = vmatpush1.bf16.msra.mxu1 %v886_v33  ;;  %837 = vmatprep.subr.bf16.mxu0 %v836_v34 }
  0x78   : > { %889 = vmatprep.subr.bf16.mxu1 %v888_v38 }
  0x7a   : > { %839 = vmatpush1.bf16.msra.mxu0 %v838_v45 }
  0x7b   : > { %891 = vmatpush1.bf16.msra.mxu1 %v890_v46  ;;  %841 = vmatprep.subr.bf16.mxu0 %v840_v47 }
  0x7c   : > { %893 = vmatprep.subr.bf16.mxu1 %v892_v51 }
  0x7e   : > { %843 = vmatpush1.bf16.msra.mxu0 %v842_v57 }
  0x7f   : > { %895 = vmatpush1.bf16.msra.mxu1 %v894_v58  ;;  %845 = vmatprep.subr.bf16.mxu0 %v844_v59 }
  0x80   : > { %897 = vmatprep.subr.bf16.mxu1 %v896_v63 }
  0x82   : > { %847 = vmatpush1.bf16.msra.mxu0 %v846_v5 }
  0x83   : > { %899 = vmatpush1.bf16.msra.mxu1 %v898_v6  ;;  %849 = vmatprep.subr.bf16.mxu0 %v848_v7 }
  0x84   : > { %901 = vmatprep.subr.bf16.mxu1 %v900_v10 }
  0x86   : > { %851 = vmatpush1.bf16.msra.mxu0 %v850_v13 }
  0x87   : > { %903 = vmatpush1.bf16.msra.mxu1 %v902_v14  ;;  %600 = vmatprep.subr.mxu0 %v540_v15 }
  0x88   : > { %671 = vmatprep.subr.mxu1 %v542_v16 }
  0x8a   : > { %601 = vmatpush1.msra.mxu0 %v539_v17 }
  0x8b   : > { %672 = vmatpush1.msra.mxu1 %v541_v18  ;;  %613 = vmatmul.mubr.f32.vlgmr.msra.gmra.mrb[0].mxu0 %v1243_v44 }
  0x8c   : > { %684 = vmatmul.mubr.f32.vlgmr.msra.gmra.mrb[0].mxu1 %v1243_v44 }
  0xcd   : > { %v694_v19 = vpop.permute.xlu0 %693 }
  0xd1   : > { %v704_v24 = vpop.permute.xlu0 %703 }
 0x15e   : > { %v614_v20 = vpop.f32.mrb[0].mxu0 }
 0x15f   : > { %v696_v21 = vmul.f32 %v694_v19, %v614_v20  ;;  %v685_v22 = vpop.f32.mrb[0].mxu1  ;;  %v616_v23 = vpop.f32.mrb[1].mxu0 }
 0x160   : > { %v698_v25 = vmul.f32 %v694_v19, %v685_v22  ;;  %v697_v26 = vmul.f32 %v694_v19, %v616_v23  ;;  %v687_v27 = vpop.f32.mrb[1].mxu1 }
 0x161   : > { %v706_v28 = vadd.f32 %v704_v24, %v696_v21  ;;  %v699_v29 = vmul.f32 %v694_v19, %v687_v27 }
 0x162   : > { %v708_v30 = vadd.f32 %v704_v24, %v698_v25  ;;  %v707_v31 = vadd.f32 %v704_v24, %v697_v26 }
 0x163   : > { %v710_v32 = vmax.f32 %v706_v28, 0.0  ;;  %v709_v44 = vadd.f32 %v704_v24, %v699_v29 }
 0x164   : > { %v712_v33 = vmax.f32 %v708_v30, 0.0  ;;  %v711_v34 = vmax.f32 %v707_v31, 0.0 }
 0x165   : > { %v713_v35 = vmax.f32 %v709_v44, 0.0 }
 0x166   : > { %v718_v36 = vcombine.low %v710_v32, %v711_v34 }
 0x167   : > { %v719_v37 = vcombine.low %v712_v33, %v713_v35 }
 0x168   : > { %722 = vst [vmem:[%s432_s18] sm:$0xff] %v718_v36 }
 0x169   : > { %723 = vst [vmem:[%s432_s18 + $0x8] sm:$0xff] %v719_v37 }
 0x16a PF: > { %p11_p9 = scmp.ge.s32.totalorder %s1000_s19, 4   ;;  %s1385_s15 = smov %s951_s16 }
 0x16b   : > { %s1386_s16 = smov %s1009_s22  ;;  %s1387_s17 = smov %s1000_s19 }
 0x16c   :  { %13 = sbr.rel (!%p11_p9) target bundleno = 2 (0x2), region = 94 }

</bundles_post_ra>
